<compile_context>
chip_gen: v7x
topology: tpu7x:2x2x1
jax: 0.10.0
libtpu: 0.0.40
codegen_flags: <defaults>
</compile_context>

<pallas_src>
import functools

import jax
import jax.numpy as jnp
from jax.experimental import pallas as pl
from jax.experimental.pallas import tpu as pltpu

EPS = 1e-5  # nn.LayerNorm default eps


# ------------------------------ config helpers --------------------------------
@functools.lru_cache(maxsize=None)
def _vmem_limit_bytes():
    """Generation-aware scoped-VMEM limit with headroom for compiler scratch."""
    cap = 128 * 1024 * 1024
    try:
        info = pltpu.get_tpu_info()
        cap_attr = getattr(info, "vmem_capacity_bytes", None)
        if cap_attr:
            cap = int(cap_attr)
    except Exception:
        pass
    # ~70% of physical VMEM: ~45 MiB on v7x (64 MiB), ~90 MiB on v5e/v6e (128 MiB).
    return max(32 * 1024 * 1024, min(int(cap * 0.70), 100 * 1024 * 1024))


def _compiler_params(n_axes):
    return pltpu.CompilerParams(
        dimension_semantics=("parallel",) * n_axes,
        vmem_limit_bytes=_vmem_limit_bytes())


def _weight_spec(shape, grid_rank):
    """Full-array, constant-index weight block; single-buffered (fetched once)."""
    zeros = (0,) * len(shape)
    if grid_rank == 1:
        index_map = lambda b: zeros
    else:
        index_map = lambda b, t: zeros
    return pl.BlockSpec(shape, index_map, pipeline_mode=pl.Buffered(1))


def _auto_tile(n, target=256):
    """Token-tile size: multiple of 16 (bf16 sublane packing), target 256."""
    if n <= target:
        return n
    for t in range(target - target % 16, 15, -16):
        if n % t == 0:
            return t
    return n


def _layernorm_f32(x, w, b):
    """LayerNorm in f32; w/b may be bf16 (cast inside)."""
    w = w.astype(jnp.float32)
    b = b.astype(jnp.float32)
    mu = jnp.mean(x, axis=-1, keepdims=True)
    var = jnp.mean(jnp.square(x - mu), axis=-1, keepdims=True)
    return (x - mu) * jax.lax.rsqrt(var + EPS) * w + b


# ------------------------------ Pallas kernels --------------------------------
def patch_embed_kernel(tok_ref, w_ref, b_ref, pos_ref, o_ref):
    """bf16 tokens (T, Cin*p*p) @ W + b + position_embedding -> bf16 (T, C)."""
    o = jnp.dot(tok_ref[...], w_ref[...], preferred_element_type=jnp.float32)
    o = o + b_ref[...].astype(jnp.float32) + pos_ref[...].astype(jnp.float32)
    o_ref[...] = o.astype(o_ref.dtype)


def encoder_layer_kernel(x_ref,
                         ln1w_ref, ln1b_ref, qkvw_ref, qkvb_ref,
                         projw_ref, projb_ref, g1_ref,
                         ln2w_ref, ln2b_ref, fc1w_ref, fc1b_ref,
                         fc2w_ref, fc2b_ref, g2_ref,
                         o_ref,
                         qkv_sc, head_sc,
                         *, heads, scale):
    """One full TransformerEncoderLayer for a single batch element.

    x_ref: (N, C) bf16 residual stream in HBM; f32 inside the kernel.
    qkv_sc: (N, 3C) bf16 VMEM scratch (the fused QKV never touches HBM).
    head_sc: (N, C) bf16 VMEM scratch holding the concatenated head outputs.
    """
    x = x_ref[...].astype(jnp.float32)                 # (N, C) f32 residual
    n, c = x.shape
    hd = c // heads

    # ----- LN1 + fused QKV projection (full sequence) -> VMEM scratch -----
    h1 = _layernorm_f32(x, ln1w_ref[...], ln1b_ref[...])
    qkv = jnp.dot(h1.astype(jnp.bfloat16), qkvw_ref[...],
                  preferred_element_type=jnp.float32)
    qkv = qkv + qkvb_ref[...].astype(jnp.float32)
    qkv_sc[...] = qkv.astype(jnp.bfloat16)

    # ----- multi-head self-attention (static unroll over heads) -----
    # softmax(q k^T * scale) v per head; the head concat is materialized by
    # writing each head's bf16 output into its column slab of head_sc.
    dn_nt = (((1,), (1,)), ((), ()))                   # (N,hd)·(N,hd) -> (N,N)
    for h in range(heads):
        lo = h * hd
        qh = qkv_sc[:, lo:lo + hd]
        kh = qkv_sc[:, c + lo:c + lo + hd]
        vh = qkv_sc[:, 2 * c + lo:2 * c + lo + hd]
        s = jax.lax.dot_general(qh, kh, dn_nt,
                                preferred_element_type=jnp.float32) * scale
        s = s - jnp.max(s, axis=-1, keepdims=True)     # stable softmax
        p = jnp.exp(s)
        p = p / jnp.sum(p, axis=-1, keepdims=True)     # exact normalization
        oh = jnp.dot(p.astype(jnp.bfloat16), vh,
                     preferred_element_type=jnp.float32)
        head_sc[:, lo:lo + hd] = oh.astype(jnp.bfloat16)

    # ----- single full-K output projection + LayerScale residual -----
    attn_out = jnp.dot(head_sc[...], projw_ref[...],
                       preferred_element_type=jnp.float32)
    attn_out = attn_out + projb_ref[...].astype(jnp.float32)
    x = x + g1_ref[...].astype(jnp.float32) * attn_out

    # ----- LN2 + FFN + LayerScale residual -----
    h2 = _layernorm_f32(x, ln2w_ref[...], ln2b_ref[...])
    f = jnp.dot(h2.astype(jnp.bfloat16), fc1w_ref[...],
                preferred_element_type=jnp.float32)
    f = f + fc1b_ref[...].astype(jnp.float32)
    f = jax.nn.gelu(f, approximate=True)               # tanh form (EUP slot)
    f = jnp.dot(f.astype(jnp.bfloat16), fc2w_ref[...],
                preferred_element_type=jnp.float32)
    f = f + fc2b_ref[...].astype(jnp.float32)
    x = x + g2_ref[...].astype(jnp.float32) * f

    o_ref[...] = x.astype(o_ref.dtype)


def final_norm_kernel(x_ref, w_ref, b_ref, o_ref):
    x = x_ref[...].astype(jnp.float32)
    o_ref[...] = _layernorm_f32(x, w_ref[...], b_ref[...]).astype(o_ref.dtype)


# ------------------------------ pallas_call glue -------------------------------
def patch_embed(tokens, w, b, pos, tile):
    B, N, P = tokens.shape
    C = w.shape[1]
    flops = 2 * B * N * P * C
    bytes_acc = (tokens.size + w.size + b.size + pos.size + B * N * C) * 2
    return pl.pallas_call(
        patch_embed_kernel,
        out_shape=jax.ShapeDtypeStruct((B, N, C), jnp.bfloat16),
        grid=(B, N // tile),
        in_specs=[
            pl.BlockSpec((None, tile, P), lambda b, t: (b, t, 0)),
            _weight_spec(w.shape, 2),
            _weight_spec(b.shape, 2),
            pl.BlockSpec((tile, C), lambda b, t: (t, 0)),
        ],
        out_specs=pl.BlockSpec((None, tile, C), lambda b, t: (b, t, 0)),
        compiler_params=_compiler_params(2),
        cost_estimate=pl.CostEstimate(flops=flops, transcendentals=0,
                                      bytes_accessed=bytes_acc),
    )(tokens, w, b, pos)


def encoder_layer(x, lp, *, heads):
    B, N, C = x.shape
    H = lp["fc1_w"].shape[1]
    scale = float((C // heads) ** (-0.5))          # qk_scale=None -> hd**-0.5
    kern = functools.partial(encoder_layer_kernel, heads=heads, scale=scale)
    weights = [lp["ln1_w"], lp["ln1_b"], lp["qkv_w"], lp["qkv_b"],
               lp["proj_w"], lp["proj_b"], lp["g1"],
               lp["ln2_w"], lp["ln2_b"], lp["fc1_w"], lp["fc1_b"],
               lp["fc2_w"], lp["fc2_b"], lp["g2"]]
    flops = B * (2 * N * C * 3 * C        # qkv projection
                 + 4 * N * N * C          # scores + attn@v (all heads)
                 + 2 * N * C * C          # output projection
                 + 4 * N * C * H)         # ffn
    trans = B * (heads * N * N + N * H)   # softmax exp + gelu tanh (approx.)
    bytes_acc = 2 * B * N * C * 2 + sum(a.size for a in weights) * 2
    return pl.pallas_call(
        kern,
        out_shape=jax.ShapeDtypeStruct((B, N, C), jnp.bfloat16),
        grid=(B,),
        in_specs=[pl.BlockSpec((None, N, C), lambda b: (b, 0, 0))]
                 + [_weight_spec(a.shape, 1) for a in weights],
        out_specs=pl.BlockSpec((None, N, C), lambda b: (b, 0, 0)),
        scratch_shapes=[pltpu.VMEM((N, 3 * C), jnp.bfloat16),   # fused QKV
                        pltpu.VMEM((N, C), jnp.bfloat16)],      # head concat
        input_output_aliases={0: 0},      # residual updated in place in HBM
        compiler_params=_compiler_params(1),
        cost_estimate=pl.CostEstimate(flops=flops, transcendentals=trans,
                                      bytes_accessed=bytes_acc),
    )(x, *weights)


def final_norm(x, w, b, tile):
    B, N, C = x.shape
    return pl.pallas_call(
        final_norm_kernel,
        out_shape=jax.ShapeDtypeStruct((B, N, C), jnp.float32),
        grid=(B, N // tile),
        in_specs=[pl.BlockSpec((None, tile, C), lambda b, t: (b, t, 0)),
                  _weight_spec(w.shape, 2), _weight_spec(b.shape, 2)],
        out_specs=pl.BlockSpec((None, tile, C), lambda b, t: (b, t, 0)),
        compiler_params=_compiler_params(2),
    )(x, w, b)


def extract_patches(x, p):
    """NCHW image -> (B, N, Cin*p*p) tokens == Conv2d(k=s=p) + flatten(2).T."""
    B, Cin, H, W = x.shape
    gh, gw = H // p, W // p
    x = x.reshape(B, Cin, gh, p, gw, p)
    x = x.transpose(0, 2, 4, 1, 3, 5)              # (B, gh, gw, Cin, p, p)
    return x.reshape(B, gh * gw, Cin * p * p)


def vit_forward(x_img, params, cfg, token_tile=None):
    # Pre-cast tokens to bf16 (halves HBM read traffic of the mem-bound stage).
    tokens = extract_patches(x_img, cfg["patch_size"]).astype(jnp.bfloat16)
    _, N, _ = tokens.shape
    tile = token_tile if token_tile is not None else _auto_tile(N)
    x = patch_embed(tokens, params["patch_w"], params["patch_b"],
                    params["pos"], tile)
    # Dropout / DropPath are identity at inference and are omitted.
    for lp in params["layers"]:
        x = encoder_layer(x, lp, heads=cfg["heads"])
    return final_norm(x, params["norm_w"], params["norm_b"], tile)


# ------------------------------ pure-JAX reference -----------------------------
def reference_forward(x_img, params, cfg):
    params = jax.tree_util.tree_map(lambda a: a.astype(jnp.float32), params)
    heads = cfg["heads"]
    tokens = extract_patches(x_img, cfg["patch_size"]).astype(jnp.float32)
    x = tokens @ params["patch_w"] + params["patch_b"] + params["pos"][None]

    def ln(z, w, b):
        mu = jnp.mean(z, -1, keepdims=True)
        var = jnp.mean(jnp.square(z - mu), -1, keepdims=True)
        return (z - mu) * jax.lax.rsqrt(var + EPS) * w + b

    for lp in params["layers"]:
        B, N, C = x.shape
        hd = C // heads
        h = ln(x, lp["ln1_w"], lp["ln1_b"])
        qkv = (h @ lp["qkv_w"] + lp["qkv_b"]).reshape(B, N, 3, heads, hd)
        qkv = qkv.transpose(2, 0, 3, 1, 4)
        q, k, v = qkv[0], qkv[1], qkv[2]
        attn = jnp.einsum("bhnd,bhmd->bhnm", q, k) * hd ** (-0.5)
        attn = jax.nn.softmax(attn, axis=-1)
        av = jnp.einsum("bhnm,bhmd->bhnd", attn, v)
        av = av.transpose(0, 2, 1, 3).reshape(B, N, C)
        av = av @ lp["proj_w"] + lp["proj_b"]
        x = x + lp["g1"] * av
        h2 = ln(x, lp["ln2_w"], lp["ln2_b"])
        f = jax.nn.gelu(h2 @ lp["fc1_w"] + lp["fc1_b"], approximate=False)
        f = f @ lp["fc2_w"] + lp["fc2_b"]
        x = x + lp["g2"] * f
    return ln(x, params["norm_w"], params["norm_b"])


# ------------------------------ parameter init ---------------------------------
def init_params(key, cfg):
    Cin, p, C = cfg["in_channels"], cfg["patch_size"], cfg["embed"]
    gh = cfg["input_size"][0] // p
    gw = cfg["input_size"][1] // p
    N = gh * gw
    H = int(C * cfg["ffn_ratio"])
    init_value = 1e-4
    bf16 = jnp.bfloat16

    keys = iter(jax.random.split(key, 4 + 8 * cfg["depth"]))

    def w(shape):                                 # trunc_normal(std=0.02) approx
        return (0.02 * jax.random.normal(next(keys), shape)).astype(bf16)

    params = {
        "patch_w": w((Cin * p * p, C)),           # Conv2d(k=s=p) as matmul
        "patch_b": jnp.zeros((1, C), bf16),
        "pos": w((N, C)),                         # position embedding
        "norm_w": jnp.ones((1, C), bf16),
        "norm_b": jnp.zeros((1, C), bf16),
        "layers": [],
    }
    for _ in range(cfg["depth"]):
        params["layers"].append({
            "ln1_w": jnp.ones((1, C), bf16),
            "ln1_b": jnp.zeros((1, C), bf16),
            "qkv_w": w((C, 3 * C)),
            "qkv_b": jnp.zeros((1, 3 * C), bf16),  # qkv_bias=True
            "proj_w": w((C, C)),
            "proj_b": jnp.zeros((1, C), bf16),
            "g1": jnp.full((1, C), init_value, bf16),
            "ln2_w": jnp.ones((1, C), bf16),
            "ln2_b": jnp.zeros((1, C), bf16),
            "fc1_w": w((C, H)),
            "fc1_b": jnp.zeros((1, H), bf16),
            "fc2_w": w((H, C)),
            "fc2_b": jnp.zeros((1, C), bf16),
            "g2": jnp.full((1, C), init_value, bf16),
        })
    return params


# ------------------------------------ main --------------------------------------
if __name__ == "__main__":
    # Lane-dense toy config: C=128 (multiple of 128), N=16 tokens, 4 heads.
    cfg = dict(input_size=(4, 4), in_channels=16, patch_size=1,
               embed=128, depth=2, heads=4, ffn_ratio=4.0)

    root = jax.random.PRNGKey(0)
    k_img, k_par = jax.random.split(root)
    x_img = jax.random.normal(
        k_img, (2, cfg["in_channels"], *cfg["input_size"]), jnp.float32)  # NCHW

    params = init_params(k_par, cfg)

    fwd = jax.jit(functools.partial(vit_forward, cfg=cfg))
    out = jax.block_until_ready(fwd(x_img, params))

    ref = reference_forward(x_img, params, cfg)
    assert out.shape == (2, 16, cfg["embed"]), out.shape
    # bf16 inter-layer residual + bf16 matmul operands vs f32 reference:
    # expected max error ~1e-2 after the final LayerNorm normalization.
    max_err = float(jnp.max(jnp.abs(out - ref)))
    mean_err = float(jnp.mean(jnp.abs(out - ref)))
    assert max_err < 3e-2 and mean_err < 1e-2, (max_err, mean_err)

    print("KERNEL_OK")
</pallas_src>

<mosaic_0001>
module attributes {stable_mosaic.version = 11 : i64} {
  func.func @patch_embed_kernel(%arg0: i32, %arg1: i32, %arg2: memref<1x16x16xbf16, #tpu.memory_space<vmem>>, %arg3: memref<16x128xbf16, #tpu.memory_space<vmem>>, %arg4: memref<1x128xbf16, #tpu.memory_space<vmem>>, %arg5: memref<16x128xbf16, #tpu.memory_space<vmem>>, %arg6: memref<1x16x128xbf16, #tpu.memory_space<vmem>>) attributes {dimension_semantics = [#tpu.dimension_semantics<parallel>, #tpu.dimension_semantics<parallel>], iteration_bounds = array<i64: 2, 1>, scalar_prefetch = 0 : i64, scratch_operands = 0 : i64, tpu.core_type = #tpu.core_type<tc>, window_params = [{transform_indices = @transform_0, window_bounds = array<i64: 1, 16, 16>}, {pipeline_mode = #tpu.pipeline_mode<synchronous>, transform_indices = @transform_1, window_bounds = array<i64: 16, 128>}, {pipeline_mode = #tpu.pipeline_mode<synchronous>, transform_indices = @transform_2, window_bounds = array<i64: 1, 128>}, {transform_indices = @transform_3, window_bounds = array<i64: 16, 128>}, {transform_indices = @transform_4, window_bounds = array<i64: 1, 16, 128>}]} {
    %c0 = arith.constant 0 : index
    %c0_0 = arith.constant 0 : index
    %c0_1 = arith.constant 0 : index
    %0 = vector.load %arg2[%c0, %c0_0, %c0_1] : memref<1x16x16xbf16, #tpu.memory_space<vmem>>, vector<1x16x16xbf16>
    %1 = vector.shape_cast %0 : vector<1x16x16xbf16> to vector<16x16xbf16>
    %c0_2 = arith.constant 0 : index
    %c0_3 = arith.constant 0 : index
    %2 = vector.load %arg3[%c0_2, %c0_3] : memref<16x128xbf16, #tpu.memory_space<vmem>>, vector<16x128xbf16>
    %cst = arith.constant dense<0.000000e+00> : vector<16x128xf32>
    %3 = tpu.matmul %1, %2, %cst {dimension_numbers = #tpu.dot_dimension_numbers<[1], [0], [0], [1], [0, 0, 1, 1], [], []>} : vector<16x16xbf16>, vector<16x128xbf16>, vector<16x128xf32> -> vector<16x128xf32>
    %c0_4 = arith.constant 0 : index
    %c0_5 = arith.constant 0 : index
    %4 = vector.load %arg4[%c0_4, %c0_5] : memref<1x128xbf16, #tpu.memory_space<vmem>>, vector<1x128xbf16>
    %5 = arith.extf %4 : vector<1x128xbf16> to vector<1x128xf32>
    %6 = vector.broadcast %5 : vector<1x128xf32> to vector<16x128xf32>
    %7 = arith.addf %3, %6 : vector<16x128xf32>
    %c0_6 = arith.constant 0 : index
    %c0_7 = arith.constant 0 : index
    %8 = vector.load %arg5[%c0_6, %c0_7] : memref<16x128xbf16, #tpu.memory_space<vmem>>, vector<16x128xbf16>
    %9 = arith.extf %8 : vector<16x128xbf16> to vector<16x128xf32>
    %10 = arith.addf %7, %9 : vector<16x128xf32>
    %11 = arith.truncf %10 : vector<16x128xf32> to vector<16x128xbf16>
    %c0_8 = arith.constant 0 : index
    %c0_9 = arith.constant 0 : index
    %c0_10 = arith.constant 0 : index
    %12 = vector.load %arg6[%c0_8, %c0_9, %c0_10] : memref<1x16x128xbf16, #tpu.memory_space<vmem>>, vector<1x16x128xbf16>
    %13 = vector.shape_cast %12 : vector<1x16x128xbf16> to vector<16x128xbf16>
    %14 = vector.shape_cast %11 : vector<16x128xbf16> to vector<1x16x128xbf16>
    tpu.vector_store %arg6[%c0_8, %c0_9, %c0_10], %14 {strides = array<i32>} : memref<1x16x128xbf16, #tpu.memory_space<vmem>>, vector<1x16x128xbf16>,
    return
  }
  func.func @transform_0(%arg0: i32, %arg1: i32) -> (i32, i32, i32) {
    %c0_i32 = arith.constant 0 : i32
    %c0_i32_0 = arith.constant 0 : i32
    return %arg0, %arg1, %c0_i32 : i32, i32, i32
  }
  func.func @transform_1(%arg0: i32, %arg1: i32) -> (i32, i32) {
    %c0_i32 = arith.constant 0 : i32
    %c0_i32_0 = arith.constant 0 : i32
    %c0_i32_1 = arith.constant 0 : i32
    return %c0_i32, %c0_i32_0 : i32, i32
  }
  func.func @transform_2(%arg0: i32, %arg1: i32) -> (i32, i32) {
    %c0_i32 = arith.constant 0 : i32
    %c0_i32_0 = arith.constant 0 : i32
    %c0_i32_1 = arith.constant 0 : i32
    return %c0_i32, %c0_i32_0 : i32, i32
  }
  func.func @transform_3(%arg0: i32, %arg1: i32) -> (i32, i32) {
    %c0_i32 = arith.constant 0 : i32
    %c0_i32_0 = arith.constant 0 : i32
    return %arg1, %c0_i32 : i32, i32
  }
  func.func @transform_4(%arg0: i32, %arg1: i32) -> (i32, i32, i32) {
    %c0_i32 = arith.constant 0 : i32
    %c0_i32_0 = arith.constant 0 : i32
    return %arg0, %arg1, %c0_i32 : i32, i32, i32
  }
}

module attributes {stable_mosaic.version = 11 : i64} {
  func.func @final_norm_kernel(%arg0: i32, %arg1: i32, %arg2: memref<1x16x128xbf16, #tpu.memory_space<vmem>>, %arg3: memref<1x128xbf16, #tpu.memory_space<vmem>>, %arg4: memref<1x128xbf16, #tpu.memory_space<vmem>>, %arg5: memref<1x16x128xf32, #tpu.memory_space<vmem>>) attributes {dimension_semantics = [#tpu.dimension_semantics<parallel>, #tpu.dimension_semantics<parallel>], iteration_bounds = array<i64: 2, 1>, scalar_prefetch = 0 : i64, scratch_operands = 0 : i64, tpu.core_type = #tpu.core_type<tc>, window_params = [{transform_indices = @transform_0, window_bounds = array<i64: 1, 16, 128>}, {pipeline_mode = #tpu.pipeline_mode<synchronous>, transform_indices = @transform_1, window_bounds = array<i64: 1, 128>}, {pipeline_mode = #tpu.pipeline_mode<synchronous>, transform_indices = @transform_2, window_bounds = array<i64: 1, 128>}, {transform_indices = @transform_3, window_bounds = array<i64: 1, 16, 128>}]} {
    %c0 = arith.constant 0 : index
    %c0_0 = arith.constant 0 : index
    %c0_1 = arith.constant 0 : index
    %0 = vector.load %arg2[%c0, %c0_0, %c0_1] : memref<1x16x128xbf16, #tpu.memory_space<vmem>>, vector<1x16x128xbf16>
    %1 = vector.shape_cast %0 : vector<1x16x128xbf16> to vector<16x128xbf16>
    %2 = arith.extf %1 : vector<16x128xbf16> to vector<16x128xf32>
    %c0_2 = arith.constant 0 : index
    %c0_3 = arith.constant 0 : index
    %3 = vector.load %arg3[%c0_2, %c0_3] : memref<1x128xbf16, #tpu.memory_space<vmem>>, vector<1x128xbf16>
    %c0_4 = arith.constant 0 : index
    %c0_5 = arith.constant 0 : index
    %4 = vector.load %arg4[%c0_4, %c0_5] : memref<1x128xbf16, #tpu.memory_space<vmem>>, vector<1x128xbf16>
    %5 = arith.extf %3 : vector<1x128xbf16> to vector<1x128xf32>
    %6 = arith.extf %4 : vector<1x128xbf16> to vector<1x128xf32>
    %cst = arith.constant dense<0.000000e+00> : vector<16xf32>
    %7 = vector.multi_reduction <add>, %2, %cst [1] : vector<16x128xf32> to vector<16xf32>
    %8 = vector.shape_cast %7 : vector<16xf32> to vector<16x1xf32>
    %cst_6 = arith.constant 1.280000e+02 : f32
    %9 = vector.broadcast %cst_6 : f32 to vector<16x1xf32>
    %10 = arith.divf %8, %9 : vector<16x1xf32>
    %11 = vector.broadcast %10 : vector<16x1xf32> to vector<16x128xf32>
    %12 = arith.subf %2, %11 : vector<16x128xf32>
    %13 = arith.mulf %12, %12 : vector<16x128xf32>
    %cst_7 = arith.constant dense<0.000000e+00> : vector<16xf32>
    %14 = vector.multi_reduction <add>, %13, %cst_7 [1] : vector<16x128xf32> to vector<16xf32>
    %15 = vector.shape_cast %14 : vector<16xf32> to vector<16x1xf32>
    %cst_8 = arith.constant 1.280000e+02 : f32
    %16 = vector.broadcast %cst_8 : f32 to vector<16x1xf32>
    %17 = arith.divf %15, %16 : vector<16x1xf32>
    %18 = vector.broadcast %10 : vector<16x1xf32> to vector<16x128xf32>
    %19 = arith.subf %2, %18 : vector<16x128xf32>
    %cst_9 = arith.constant 9.99999974E-6 : f32
    %20 = vector.broadcast %cst_9 : f32 to vector<16x1xf32>
    %21 = arith.addf %17, %20 : vector<16x1xf32>
    %22 = math.rsqrt %21 : vector<16x1xf32>
    %23 = vector.broadcast %22 : vector<16x1xf32> to vector<16x128xf32>
    %24 = arith.mulf %19, %23 : vector<16x128xf32>
    %25 = vector.broadcast %5 : vector<1x128xf32> to vector<16x128xf32>
    %26 = arith.mulf %24, %25 : vector<16x128xf32>
    %27 = vector.broadcast %6 : vector<1x128xf32> to vector<16x128xf32>
    %28 = arith.addf %26, %27 : vector<16x128xf32>
    %c0_10 = arith.constant 0 : index
    %c0_11 = arith.constant 0 : index
    %c0_12 = arith.constant 0 : index
    %29 = vector.load %arg5[%c0_10, %c0_11, %c0_12] : memref<1x16x128xf32, #tpu.memory_space<vmem>>, vector<1x16x128xf32>
    %30 = vector.shape_cast %29 : vector<1x16x128xf32> to vector<16x128xf32>
    %31 = vector.shape_cast %28 : vector<16x128xf32> to vector<1x16x128xf32>
    tpu.vector_store %arg5[%c0_10, %c0_11, %c0_12], %31 {strides = array<i32>} : memref<1x16x128xf32, #tpu.memory_space<vmem>>, vector<1x16x128xf32>,
    return
  }
  func.func @transform_0(%arg0: i32, %arg1: i32) -> (i32, i32, i32) {
    %c0_i32 = arith.constant 0 : i32
    %c0_i32_0 = arith.constant 0 : i32
    return %arg0, %arg1, %c0_i32 : i32, i32, i32
  }
  func.func @transform_1(%arg0: i32, %arg1: i32) -> (i32, i32) {
    %c0_i32 = arith.constant 0 : i32
    %c0_i32_0 = arith.constant 0 : i32
    %c0_i32_1 = arith.constant 0 : i32
    return %c0_i32, %c0_i32_0 : i32, i32
  }
  func.func @transform_2(%arg0: i32, %arg1: i32) -> (i32, i32) {
    %c0_i32 = arith.constant 0 : i32
    %c0_i32_0 = arith.constant 0 : i32
    %c0_i32_1 = arith.constant 0 : i32
    return %c0_i32, %c0_i32_0 : i32, i32
  }
  func.func @transform_3(%arg0: i32, %arg1: i32) -> (i32, i32, i32) {
    %c0_i32 = arith.constant 0 : i32
    %c0_i32_0 = arith.constant 0 : i32
    return %arg0, %arg1, %c0_i32 : i32, i32, i32
  }
}

module attributes {stable_mosaic.version = 11 : i64} {
  func.func @encoder_layer_kernel(%arg0: i32, %arg1: memref<1x16x128xbf16, #tpu.memory_space<vmem>>, %arg2: memref<1x128xbf16, #tpu.memory_space<vmem>>, %arg3: memref<1x128xbf16, #tpu.memory_space<vmem>>, %arg4: memref<128x384xbf16, #tpu.memory_space<vmem>>, %arg5: memref<1x384xbf16, #tpu.memory_space<vmem>>, %arg6: memref<128x128xbf16, #tpu.memory_space<vmem>>, %arg7: memref<1x128xbf16, #tpu.memory_space<vmem>>, %arg8: memref<1x128xbf16, #tpu.memory_space<vmem>>, %arg9: memref<1x128xbf16, #tpu.memory_space<vmem>>, %arg10: memref<1x128xbf16, #tpu.memory_space<vmem>>, %arg11: memref<128x512xbf16, #tpu.memory_space<vmem>>, %arg12: memref<1x512xbf16, #tpu.memory_space<vmem>>, %arg13: memref<512x128xbf16, #tpu.memory_space<vmem>>, %arg14: memref<1x128xbf16, #tpu.memory_space<vmem>>, %arg15: memref<1x128xbf16, #tpu.memory_space<vmem>>, %arg16: memref<1x16x128xbf16, #tpu.memory_space<vmem>>, %arg17: memref<16x384xbf16, #tpu.memory_space<vmem>>, %arg18: memref<16x128xbf16, #tpu.memory_space<vmem>>) attributes {dimension_semantics = [#tpu.dimension_semantics<parallel>], iteration_bounds = array<i64: 2>, scalar_prefetch = 0 : i64, scratch_operands = 2 : i64, tpu.core_type = #tpu.core_type<tc>, window_params = [{transform_indices = @transform_0, window_bounds = array<i64: 1, 16, 128>}, {pipeline_mode = #tpu.pipeline_mode<synchronous>, transform_indices = @transform_1, window_bounds = array<i64: 1, 128>}, {pipeline_mode = #tpu.pipeline_mode<synchronous>, transform_indices = @transform_2, window_bounds = array<i64: 1, 128>}, {pipeline_mode = #tpu.pipeline_mode<synchronous>, transform_indices = @transform_3, window_bounds = array<i64: 128, 384>}, {pipeline_mode = #tpu.pipeline_mode<synchronous>, transform_indices = @transform_4, window_bounds = array<i64: 1, 384>}, {pipeline_mode = #tpu.pipeline_mode<synchronous>, transform_indices = @transform_5, window_bounds = array<i64: 128, 128>}, {pipeline_mode = #tpu.pipeline_mode<synchronous>, transform_indices = @transform_6, window_bounds = array<i64: 1, 128>}, {pipeline_mode = #tpu.pipeline_mode<synchronous>, transform_indices = @transform_7, window_bounds = array<i64: 1, 128>}, {pipeline_mode = #tpu.pipeline_mode<synchronous>, transform_indices = @transform_8, window_bounds = array<i64: 1, 128>}, {pipeline_mode = #tpu.pipeline_mode<synchronous>, transform_indices = @transform_9, window_bounds = array<i64: 1, 128>}, {pipeline_mode = #tpu.pipeline_mode<synchronous>, transform_indices = @transform_10, window_bounds = array<i64: 128, 512>}, {pipeline_mode = #tpu.pipeline_mode<synchronous>, transform_indices = @transform_11, window_bounds = array<i64: 1, 512>}, {pipeline_mode = #tpu.pipeline_mode<synchronous>, transform_indices = @transform_12, window_bounds = array<i64: 512, 128>}, {pipeline_mode = #tpu.pipeline_mode<synchronous>, transform_indices = @transform_13, window_bounds = array<i64: 1, 128>}, {pipeline_mode = #tpu.pipeline_mode<synchronous>, transform_indices = @transform_14, window_bounds = array<i64: 1, 128>}, {transform_indices = @transform_15, window_bounds = array<i64: 1, 16, 128>}]} {
    %c0 = arith.constant 0 : index
    %c0_0 = arith.constant 0 : index
    %c0_1 = arith.constant 0 : index
    %0 = vector.load %arg1[%c0, %c0_0, %c0_1] : memref<1x16x128xbf16, #tpu.memory_space<vmem>>, vector<1x16x128xbf16>
    %1 = vector.shape_cast %0 : vector<1x16x128xbf16> to vector<16x128xbf16>
    %2 = arith.extf %1 : vector<16x128xbf16> to vector<16x128xf32>
    %c0_2 = arith.constant 0 : index
    %c0_3 = arith.constant 0 : index
    %3 = vector.load %arg2[%c0_2, %c0_3] : memref<1x128xbf16, #tpu.memory_space<vmem>>, vector<1x128xbf16>
    %c0_4 = arith.constant 0 : index
    %c0_5 = arith.constant 0 : index
    %4 = vector.load %arg3[%c0_4, %c0_5] : memref<1x128xbf16, #tpu.memory_space<vmem>>, vector<1x128xbf16>
    %5 = arith.extf %3 : vector<1x128xbf16> to vector<1x128xf32>
    %6 = arith.extf %4 : vector<1x128xbf16> to vector<1x128xf32>
    %cst = arith.constant dense<0.000000e+00> : vector<16xf32>
    %7 = vector.multi_reduction <add>, %2, %cst [1] : vector<16x128xf32> to vector<16xf32>
    %8 = vector.shape_cast %7 : vector<16xf32> to vector<16x1xf32>
    %cst_6 = arith.constant 1.280000e+02 : f32
    %9 = vector.broadcast %cst_6 : f32 to vector<16x1xf32>
    %10 = arith.divf %8, %9 : vector<16x1xf32>
    %11 = vector.broadcast %10 : vector<16x1xf32> to vector<16x128xf32>
    %12 = arith.subf %2, %11 : vector<16x128xf32>
    %13 = arith.mulf %12, %12 : vector<16x128xf32>
    %cst_7 = arith.constant dense<0.000000e+00> : vector<16xf32>
    %14 = vector.multi_reduction <add>, %13, %cst_7 [1] : vector<16x128xf32> to vector<16xf32>
    %15 = vector.shape_cast %14 : vector<16xf32> to vector<16x1xf32>
    %cst_8 = arith.constant 1.280000e+02 : f32
    %16 = vector.broadcast %cst_8 : f32 to vector<16x1xf32>
    %17 = arith.divf %15, %16 : vector<16x1xf32>
    %18 = vector.broadcast %10 : vector<16x1xf32> to vector<16x128xf32>
    %19 = arith.subf %2, %18 : vector<16x128xf32>
    %cst_9 = arith.constant 9.99999974E-6 : f32
    %20 = vector.broadcast %cst_9 : f32 to vector<16x1xf32>
    %21 = arith.addf %17, %20 : vector<16x1xf32>
    %22 = math.rsqrt %21 : vector<16x1xf32>
    %23 = vector.broadcast %22 : vector<16x1xf32> to vector<16x128xf32>
    %24 = arith.mulf %19, %23 : vector<16x128xf32>
    %25 = vector.broadcast %5 : vector<1x128xf32> to vector<16x128xf32>
    %26 = arith.mulf %24, %25 : vector<16x128xf32>
    %27 = vector.broadcast %6 : vector<1x128xf32> to vector<16x128xf32>
    %28 = arith.addf %26, %27 : vector<16x128xf32>
    %29 = arith.truncf %28 : vector<16x128xf32> to vector<16x128xbf16>
    %c0_10 = arith.constant 0 : index
    %c0_11 = arith.constant 0 : index
    %30 = vector.load %arg4[%c0_10, %c0_11] : memref<128x384xbf16, #tpu.memory_space<vmem>>, vector<128x384xbf16>
    %cst_12 = arith.constant dense<0.000000e+00> : vector<16x384xf32>
    %31 = tpu.matmul %29, %30, %cst_12 {dimension_numbers = #tpu.dot_dimension_numbers<[1], [0], [0], [1], [0, 0, 1, 1], [], []>} : vector<16x128xbf16>, vector<128x384xbf16>, vector<16x384xf32> -> vector<16x384xf32>
    %c0_13 = arith.constant 0 : index
    %c0_14 = arith.constant 0 : index
    %32 = vector.load %arg5[%c0_13, %c0_14] : memref<1x384xbf16, #tpu.memory_space<vmem>>, vector<1x384xbf16>
    %33 = arith.extf %32 : vector<1x384xbf16> to vector<1x384xf32>
    %34 = vector.broadcast %33 : vector<1x384xf32> to vector<16x384xf32>
    %35 = arith.addf %31, %34 : vector<16x384xf32>
    %36 = arith.truncf %35 : vector<16x384xf32> to vector<16x384xbf16>
    %c0_15 = arith.constant 0 : index
    %c0_16 = arith.constant 0 : index
    %37 = vector.load %arg17[%c0_15, %c0_16] : memref<16x384xbf16, #tpu.memory_space<vmem>>, vector<16x384xbf16>
    tpu.vector_store %arg17[%c0_15, %c0_16], %36 {strides = array<i32>} : memref<16x384xbf16, #tpu.memory_space<vmem>>, vector<16x384xbf16>,
    %c0_17 = arith.constant 0 : index
    %c0_18 = arith.constant 0 : index
    %38 = vector.load %arg17[%c0_17, %c0_18] : memref<16x384xbf16, #tpu.memory_space<vmem>>, vector<16x32xbf16>
    %c0_19 = arith.constant 0 : index
    %c128 = arith.constant 128 : index
    %39 = vector.load %arg17[%c0_19, %c128] : memref<16x384xbf16, #tpu.memory_space<vmem>>, vector<16x32xbf16>
    %c0_20 = arith.constant 0 : index
    %c256 = arith.constant 256 : index
    %40 = vector.load %arg17[%c0_20, %c256] : memref<16x384xbf16, #tpu.memory_space<vmem>>, vector<16x32xbf16>
    %cst_21 = arith.constant dense<0.000000e+00> : vector<16x16xf32>
    %41 = tpu.matmul %38, %39, %cst_21 {dimension_numbers = #tpu.dot_dimension_numbers<[1], [1], [0], [0], [0, 0, 1, 0], [], []>} : vector<16x32xbf16>, vector<16x32xbf16>, vector<16x16xf32> -> vector<16x16xf32>
    %cst_22 = arith.constant 0.176776692 : f32
    %42 = vector.broadcast %cst_22 : f32 to vector<16x16xf32>
    %43 = arith.mulf %41, %42 : vector<16x16xf32>
    %cst_23 = arith.constant dense<0xFF800000> : vector<16xf32>
    %44 = vector.multi_reduction <maximumf>, %43, %cst_23 [1] : vector<16x16xf32> to vector<16xf32>
    %45 = vector.shape_cast %44 : vector<16xf32> to vector<16x1xf32>
    %46 = vector.broadcast %45 : vector<16x1xf32> to vector<16x16xf32>
    %47 = arith.subf %43, %46 : vector<16x16xf32>
    %48 = math.exp %47 : vector<16x16xf32>
    %cst_24 = arith.constant dense<0.000000e+00> : vector<16xf32>
    %49 = vector.multi_reduction <add>, %48, %cst_24 [1] : vector<16x16xf32> to vector<16xf32>
    %50 = vector.shape_cast %49 : vector<16xf32> to vector<16x1xf32>
    %51 = vector.broadcast %50 : vector<16x1xf32> to vector<16x16xf32>
    %52 = arith.divf %48, %51 : vector<16x16xf32>
    %53 = arith.truncf %52 : vector<16x16xf32> to vector<16x16xbf16>
    %cst_25 = arith.constant dense<0.000000e+00> : vector<16x32xf32>
    %54 = tpu.matmul %53, %40, %cst_25 {dimension_numbers = #tpu.dot_dimension_numbers<[1], [0], [0], [1], [0, 0, 1, 1], [], []>} : vector<16x16xbf16>, vector<16x32xbf16>, vector<16x32xf32> -> vector<16x32xf32>
    %55 = arith.truncf %54 : vector<16x32xf32> to vector<16x32xbf16>
    %c0_26 = arith.constant 0 : index
    %c0_27 = arith.constant 0 : index
    %56 = vector.load %arg18[%c0_26, %c0_27] : memref<16x128xbf16, #tpu.memory_space<vmem>>, vector<16x32xbf16>
    tpu.vector_store %arg18[%c0_26, %c0_27], %55 {strides = array<i32>} : memref<16x128xbf16, #tpu.memory_space<vmem>>, vector<16x32xbf16>,
    %c0_28 = arith.constant 0 : index
    %c32 = arith.constant 32 : index
    %57 = vector.load %arg17[%c0_28, %c32] : memref<16x384xbf16, #tpu.memory_space<vmem>>, vector<16x32xbf16>
    %c0_29 = arith.constant 0 : index
    %c160 = arith.constant 160 : index
    %58 = vector.load %arg17[%c0_29, %c160] : memref<16x384xbf16, #tpu.memory_space<vmem>>, vector<16x32xbf16>
    %c0_30 = arith.constant 0 : index
    %c288 = arith.constant 288 : index
    %59 = vector.load %arg17[%c0_30, %c288] : memref<16x384xbf16, #tpu.memory_space<vmem>>, vector<16x32xbf16>
    %cst_31 = arith.constant dense<0.000000e+00> : vector<16x16xf32>
    %60 = tpu.matmul %57, %58, %cst_31 {dimension_numbers = #tpu.dot_dimension_numbers<[1], [1], [0], [0], [0, 0, 1, 0], [], []>} : vector<16x32xbf16>, vector<16x32xbf16>, vector<16x16xf32> -> vector<16x16xf32>
    %cst_32 = arith.constant 0.176776692 : f32
    %61 = vector.broadcast %cst_32 : f32 to vector<16x16xf32>
    %62 = arith.mulf %60, %61 : vector<16x16xf32>
    %cst_33 = arith.constant dense<0xFF800000> : vector<16xf32>
    %63 = vector.multi_reduction <maximumf>, %62, %cst_33 [1] : vector<16x16xf32> to vector<16xf32>
    %64 = vector.shape_cast %63 : vector<16xf32> to vector<16x1xf32>
    %65 = vector.broadcast %64 : vector<16x1xf32> to vector<16x16xf32>
    %66 = arith.subf %62, %65 : vector<16x16xf32>
    %67 = math.exp %66 : vector<16x16xf32>
    %cst_34 = arith.constant dense<0.000000e+00> : vector<16xf32>
    %68 = vector.multi_reduction <add>, %67, %cst_34 [1] : vector<16x16xf32> to vector<16xf32>
    %69 = vector.shape_cast %68 : vector<16xf32> to vector<16x1xf32>
    %70 = vector.broadcast %69 : vector<16x1xf32> to vector<16x16xf32>
    %71 = arith.divf %67, %70 : vector<16x16xf32>
    %72 = arith.truncf %71 : vector<16x16xf32> to vector<16x16xbf16>
    %cst_35 = arith.constant dense<0.000000e+00> : vector<16x32xf32>
    %73 = tpu.matmul %72, %59, %cst_35 {dimension_numbers = #tpu.dot_dimension_numbers<[1], [0], [0], [1], [0, 0, 1, 1], [], []>} : vector<16x16xbf16>, vector<16x32xbf16>, vector<16x32xf32> -> vector<16x32xf32>
    %74 = arith.truncf %73 : vector<16x32xf32> to vector<16x32xbf16>
    %c0_36 = arith.constant 0 : index
    %c32_37 = arith.constant 32 : index
    %75 = vector.load %arg18[%c0_36, %c32_37] : memref<16x128xbf16, #tpu.memory_space<vmem>>, vector<16x32xbf16>
    tpu.vector_store %arg18[%c0_36, %c32_37], %74 {strides = array<i32>} : memref<16x128xbf16, #tpu.memory_space<vmem>>, vector<16x32xbf16>,
    %c0_38 = arith.constant 0 : index
    %c64 = arith.constant 64 : index
    %76 = vector.load %arg17[%c0_38, %c64] : memref<16x384xbf16, #tpu.memory_space<vmem>>, vector<16x32xbf16>
    %c0_39 = arith.constant 0 : index
    %c192 = arith.constant 192 : index
    %77 = vector.load %arg17[%c0_39, %c192] : memref<16x384xbf16, #tpu.memory_space<vmem>>, vector<16x32xbf16>
    %c0_40 = arith.constant 0 : index
    %c320 = arith.constant 320 : index
    %78 = vector.load %arg17[%c0_40, %c320] : memref<16x384xbf16, #tpu.memory_space<vmem>>, vector<16x32xbf16>
    %cst_41 = arith.constant dense<0.000000e+00> : vector<16x16xf32>
    %79 = tpu.matmul %76, %77, %cst_41 {dimension_numbers = #tpu.dot_dimension_numbers<[1], [1], [0], [0], [0, 0, 1, 0], [], []>} : vector<16x32xbf16>, vector<16x32xbf16>, vector<16x16xf32> -> vector<16x16xf32>
    %cst_42 = arith.constant 0.176776692 : f32
    %80 = vector.broadcast %cst_42 : f32 to vector<16x16xf32>
    %81 = arith.mulf %79, %80 : vector<16x16xf32>
    %cst_43 = arith.constant dense<0xFF800000> : vector<16xf32>
    %82 = vector.multi_reduction <maximumf>, %81, %cst_43 [1] : vector<16x16xf32> to vector<16xf32>
    %83 = vector.shape_cast %82 : vector<16xf32> to vector<16x1xf32>
    %84 = vector.broadcast %83 : vector<16x1xf32> to vector<16x16xf32>
    %85 = arith.subf %81, %84 : vector<16x16xf32>
    %86 = math.exp %85 : vector<16x16xf32>
    %cst_44 = arith.constant dense<0.000000e+00> : vector<16xf32>
    %87 = vector.multi_reduction <add>, %86, %cst_44 [1] : vector<16x16xf32> to vector<16xf32>
    %88 = vector.shape_cast %87 : vector<16xf32> to vector<16x1xf32>
    %89 = vector.broadcast %88 : vector<16x1xf32> to vector<16x16xf32>
    %90 = arith.divf %86, %89 : vector<16x16xf32>
    %91 = arith.truncf %90 : vector<16x16xf32> to vector<16x16xbf16>
    %cst_45 = arith.constant dense<0.000000e+00> : vector<16x32xf32>
    %92 = tpu.matmul %91, %78, %cst_45 {dimension_numbers = #tpu.dot_dimension_numbers<[1], [0], [0], [1], [0, 0, 1, 1], [], []>} : vector<16x16xbf16>, vector<16x32xbf16>, vector<16x32xf32> -> vector<16x32xf32>
    %93 = arith.truncf %92 : vector<16x32xf32> to vector<16x32xbf16>
    %c0_46 = arith.constant 0 : index
    %c64_47 = arith.constant 64 : index
    %94 = vector.load %arg18[%c0_46, %c64_47] : memref<16x128xbf16, #tpu.memory_space<vmem>>, vector<16x32xbf16>
    tpu.vector_store %arg18[%c0_46, %c64_47], %93 {strides = array<i32>} : memref<16x128xbf16, #tpu.memory_space<vmem>>, vector<16x32xbf16>,
    %c0_48 = arith.constant 0 : index
    %c96 = arith.constant 96 : index
    %95 = vector.load %arg17[%c0_48, %c96] : memref<16x384xbf16, #tpu.memory_space<vmem>>, vector<16x32xbf16>
    %c0_49 = arith.constant 0 : index
    %c224 = arith.constant 224 : index
    %96 = vector.load %arg17[%c0_49, %c224] : memref<16x384xbf16, #tpu.memory_space<vmem>>, vector<16x32xbf16>
    %c0_50 = arith.constant 0 : index
    %c352 = arith.constant 352 : index
    %97 = vector.load %arg17[%c0_50, %c352] : memref<16x384xbf16, #tpu.memory_space<vmem>>, vector<16x32xbf16>
    %cst_51 = arith.constant dense<0.000000e+00> : vector<16x16xf32>
    %98 = tpu.matmul %95, %96, %cst_51 {dimension_numbers = #tpu.dot_dimension_numbers<[1], [1], [0], [0], [0, 0, 1, 0], [], []>} : vector<16x32xbf16>, vector<16x32xbf16>, vector<16x16xf32> -> vector<16x16xf32>
    %cst_52 = arith.constant 0.176776692 : f32
    %99 = vector.broadcast %cst_52 : f32 to vector<16x16xf32>
    %100 = arith.mulf %98, %99 : vector<16x16xf32>
    %cst_53 = arith.constant dense<0xFF800000> : vector<16xf32>
    %101 = vector.multi_reduction <maximumf>, %100, %cst_53 [1] : vector<16x16xf32> to vector<16xf32>
    %102 = vector.shape_cast %101 : vector<16xf32> to vector<16x1xf32>
    %103 = vector.broadcast %102 : vector<16x1xf32> to vector<16x16xf32>
    %104 = arith.subf %100, %103 : vector<16x16xf32>
    %105 = math.exp %104 : vector<16x16xf32>
    %cst_54 = arith.constant dense<0.000000e+00> : vector<16xf32>
    %106 = vector.multi_reduction <add>, %105, %cst_54 [1] : vector<16x16xf32> to vector<16xf32>
    %107 = vector.shape_cast %106 : vector<16xf32> to vector<16x1xf32>
    %108 = vector.broadcast %107 : vector<16x1xf32> to vector<16x16xf32>
    %109 = arith.divf %105, %108 : vector<16x16xf32>
    %110 = arith.truncf %109 : vector<16x16xf32> to vector<16x16xbf16>
    %cst_55 = arith.constant dense<0.000000e+00> : vector<16x32xf32>
    %111 = tpu.matmul %110, %97, %cst_55 {dimension_numbers = #tpu.dot_dimension_numbers<[1], [0], [0], [1], [0, 0, 1, 1], [], []>} : vector<16x16xbf16>, vector<16x32xbf16>, vector<16x32xf32> -> vector<16x32xf32>
    %112 = arith.truncf %111 : vector<16x32xf32> to vector<16x32xbf16>
    %c0_56 = arith.constant 0 : index
    %c96_57 = arith.constant 96 : index
    %113 = vector.load %arg18[%c0_56, %c96_57] : memref<16x128xbf16, #tpu.memory_space<vmem>>, vector<16x32xbf16>
    tpu.vector_store %arg18[%c0_56, %c96_57], %112 {strides = array<i32>} : memref<16x128xbf16, #tpu.memory_space<vmem>>, vector<16x32xbf16>,
    %c0_58 = arith.constant 0 : index
    %c0_59 = arith.constant 0 : index
    %114 = vector.load %arg18[%c0_58, %c0_59] : memref<16x128xbf16, #tpu.memory_space<vmem>>, vector<16x128xbf16>
    %c0_60 = arith.constant 0 : index
    %c0_61 = arith.constant 0 : index
    %115 = vector.load %arg6[%c0_60, %c0_61] : memref<128x128xbf16, #tpu.memory_space<vmem>>, vector<128x128xbf16>
    %cst_62 = arith.constant dense<0.000000e+00> : vector<16x128xf32>
    %116 = tpu.matmul %114, %115, %cst_62 {dimension_numbers = #tpu.dot_dimension_numbers<[1], [0], [0], [1], [0, 0, 1, 1], [], []>} : vector<16x128xbf16>, vector<128x128xbf16>, vector<16x128xf32> -> vector<16x128xf32>
    %c0_63 = arith.constant 0 : index
    %c0_64 = arith.constant 0 : index
    %117 = vector.load %arg7[%c0_63, %c0_64] : memref<1x128xbf16, #tpu.memory_space<vmem>>, vector<1x128xbf16>
    %118 = arith.extf %117 : vector<1x128xbf16> to vector<1x128xf32>
    %119 = vector.broadcast %118 : vector<1x128xf32> to vector<16x128xf32>
    %120 = arith.addf %116, %119 : vector<16x128xf32>
    %c0_65 = arith.constant 0 : index
    %c0_66 = arith.constant 0 : index
    %121 = vector.load %arg8[%c0_65, %c0_66] : memref<1x128xbf16, #tpu.memory_space<vmem>>, vector<1x128xbf16>
    %122 = arith.extf %121 : vector<1x128xbf16> to vector<1x128xf32>
    %123 = vector.broadcast %122 : vector<1x128xf32> to vector<16x128xf32>
    %124 = arith.mulf %123, %120 : vector<16x128xf32>
    %125 = arith.addf %2, %124 : vector<16x128xf32>
    %c0_67 = arith.constant 0 : index
    %c0_68 = arith.constant 0 : index
    %126 = vector.load %arg9[%c0_67, %c0_68] : memref<1x128xbf16, #tpu.memory_space<vmem>>, vector<1x128xbf16>
    %c0_69 = arith.constant 0 : index
    %c0_70 = arith.constant 0 : index
    %127 = vector.load %arg10[%c0_69, %c0_70] : memref<1x128xbf16, #tpu.memory_space<vmem>>, vector<1x128xbf16>
    %128 = arith.extf %126 : vector<1x128xbf16> to vector<1x128xf32>
    %129 = arith.extf %127 : vector<1x128xbf16> to vector<1x128xf32>
    %cst_71 = arith.constant dense<0.000000e+00> : vector<16xf32>
    %130 = vector.multi_reduction <add>, %125, %cst_71 [1] : vector<16x128xf32> to vector<16xf32>
    %131 = vector.shape_cast %130 : vector<16xf32> to vector<16x1xf32>
    %cst_72 = arith.constant 1.280000e+02 : f32
    %132 = vector.broadcast %cst_72 : f32 to vector<16x1xf32>
    %133 = arith.divf %131, %132 : vector<16x1xf32>
    %134 = vector.broadcast %133 : vector<16x1xf32> to vector<16x128xf32>
    %135 = arith.subf %125, %134 : vector<16x128xf32>
    %136 = arith.mulf %135, %135 : vector<16x128xf32>
    %cst_73 = arith.constant dense<0.000000e+00> : vector<16xf32>
    %137 = vector.multi_reduction <add>, %136, %cst_73 [1] : vector<16x128xf32> to vector<16xf32>
    %138 = vector.shape_cast %137 : vector<16xf32> to vector<16x1xf32>
    %cst_74 = arith.constant 1.280000e+02 : f32
    %139 = vector.broadcast %cst_74 : f32 to vector<16x1xf32>
    %140 = arith.divf %138, %139 : vector<16x1xf32>
    %141 = vector.broadcast %133 : vector<16x1xf32> to vector<16x128xf32>
    %142 = arith.subf %125, %141 : vector<16x128xf32>
    %cst_75 = arith.constant 9.99999974E-6 : f32
    %143 = vector.broadcast %cst_75 : f32 to vector<16x1xf32>
    %144 = arith.addf %140, %143 : vector<16x1xf32>
    %145 = math.rsqrt %144 : vector<16x1xf32>
    %146 = vector.broadcast %145 : vector<16x1xf32> to vector<16x128xf32>
    %147 = arith.mulf %142, %146 : vector<16x128xf32>
    %148 = vector.broadcast %128 : vector<1x128xf32> to vector<16x128xf32>
    %149 = arith.mulf %147, %148 : vector<16x128xf32>
    %150 = vector.broadcast %129 : vector<1x128xf32> to vector<16x128xf32>
    %151 = arith.addf %149, %150 : vector<16x128xf32>
    %152 = arith.truncf %151 : vector<16x128xf32> to vector<16x128xbf16>
    %c0_76 = arith.constant 0 : index
    %c0_77 = arith.constant 0 : index
    %153 = vector.load %arg11[%c0_76, %c0_77] : memref<128x512xbf16, #tpu.memory_space<vmem>>, vector<128x512xbf16>
    %cst_78 = arith.constant dense<0.000000e+00> : vector<16x512xf32>
    %154 = tpu.matmul %152, %153, %cst_78 {dimension_numbers = #tpu.dot_dimension_numbers<[1], [0], [0], [1], [0, 0, 1, 1], [], []>} : vector<16x128xbf16>, vector<128x512xbf16>, vector<16x512xf32> -> vector<16x512xf32>
    %c0_79 = arith.constant 0 : index
    %c0_80 = arith.constant 0 : index
    %155 = vector.load %arg12[%c0_79, %c0_80] : memref<1x512xbf16, #tpu.memory_space<vmem>>, vector<1x512xbf16>
    %156 = arith.extf %155 : vector<1x512xbf16> to vector<1x512xf32>
    %157 = vector.broadcast %156 : vector<1x512xf32> to vector<16x512xf32>
    %158 = arith.addf %154, %157 : vector<16x512xf32>
    %159 = arith.mulf %158, %158 : vector<16x512xf32>
    %160 = arith.mulf %158, %159 : vector<16x512xf32>
    %cst_81 = arith.constant 4.471500e-02 : f32
    %161 = vector.broadcast %cst_81 : f32 to vector<16x512xf32>
    %162 = arith.mulf %161, %160 : vector<16x512xf32>
    %163 = arith.addf %158, %162 : vector<16x512xf32>
    %cst_82 = arith.constant 0.797884583 : f32
    %164 = vector.broadcast %cst_82 : f32 to vector<16x512xf32>
    %165 = arith.mulf %164, %163 : vector<16x512xf32>
    %166 = math.tanh %165 : vector<16x512xf32>
    %cst_83 = arith.constant 1.000000e+00 : f32
    %167 = vector.broadcast %cst_83 : f32 to vector<16x512xf32>
    %168 = arith.addf %167, %166 : vector<16x512xf32>
    %cst_84 = arith.constant 5.000000e-01 : f32
    %169 = vector.broadcast %cst_84 : f32 to vector<16x512xf32>
    %170 = arith.mulf %169, %168 : vector<16x512xf32>
    %171 = arith.mulf %158, %170 : vector<16x512xf32>
    %172 = arith.truncf %171 : vector<16x512xf32> to vector<16x512xbf16>
    %c0_85 = arith.constant 0 : index
    %c0_86 = arith.constant 0 : index
    %173 = vector.load %arg13[%c0_85, %c0_86] : memref<512x128xbf16, #tpu.memory_space<vmem>>, vector<512x128xbf16>
    %cst_87 = arith.constant dense<0.000000e+00> : vector<16x128xf32>
    %174 = tpu.matmul %172, %173, %cst_87 {dimension_numbers = #tpu.dot_dimension_numbers<[1], [0], [0], [1], [0, 0, 1, 1], [], []>} : vector<16x512xbf16>, vector<512x128xbf16>, vector<16x128xf32> -> vector<16x128xf32>
    %c0_88 = arith.constant 0 : index
    %c0_89 = arith.constant 0 : index
    %175 = vector.load %arg14[%c0_88, %c0_89] : memref<1x128xbf16, #tpu.memory_space<vmem>>, vector<1x128xbf16>
    %176 = arith.extf %175 : vector<1x128xbf16> to vector<1x128xf32>
    %177 = vector.broadcast %176 : vector<1x128xf32> to vector<16x128xf32>
    %178 = arith.addf %174, %177 : vector<16x128xf32>
    %c0_90 = arith.constant 0 : index
    %c0_91 = arith.constant 0 : index
    %179 = vector.load %arg15[%c0_90, %c0_91] : memref<1x128xbf16, #tpu.memory_space<vmem>>, vector<1x128xbf16>
    %180 = arith.extf %179 : vector<1x128xbf16> to vector<1x128xf32>
    %181 = vector.broadcast %180 : vector<1x128xf32> to vector<16x128xf32>
    %182 = arith.mulf %181, %178 : vector<16x128xf32>
    %183 = arith.addf %125, %182 : vector<16x128xf32>
    %184 = arith.truncf %183 : vector<16x128xf32> to vector<16x128xbf16>
    %c0_92 = arith.constant 0 : index
    %c0_93 = arith.constant 0 : index
    %c0_94 = arith.constant 0 : index
    %185 = vector.load %arg16[%c0_92, %c0_93, %c0_94] : memref<1x16x128xbf16, #tpu.memory_space<vmem>>, vector<1x16x128xbf16>
    %186 = vector.shape_cast %185 : vector<1x16x128xbf16> to vector<16x128xbf16>
    %187 = vector.shape_cast %184 : vector<16x128xbf16> to vector<1x16x128xbf16>
    tpu.vector_store %arg16[%c0_92, %c0_93, %c0_94], %187 {strides = array<i32>} : memref<1x16x128xbf16, #tpu.memory_space<vmem>>, vector<1x16x128xbf16>,
    return
  }
  func.func @transform_0(%arg0: i32) -> (i32, i32, i32) {
    %c0_i32 = arith.constant 0 : i32
    %c0_i32_0 = arith.constant 0 : i32
    %c0_i32_1 = arith.constant 0 : i32
    return %arg0, %c0_i32, %c0_i32_0 : i32, i32, i32
  }
  func.func @transform_1(%arg0: i32) -> (i32, i32) {
    %c0_i32 = arith.constant 0 : i32
    %c0_i32_0 = arith.constant 0 : i32
    %c0_i32_1 = arith.constant 0 : i32
    return %c0_i32, %c0_i32_0 : i32, i32
  }
  func.func @transform_2(%arg0: i32) -> (i32, i32) {
    %c0_i32 = arith.constant 0 : i32
    %c0_i32_0 = arith.constant 0 : i32
    %c0_i32_1 = arith.constant 0 : i32
    return %c0_i32, %c0_i32_0 : i32, i32
  }
  func.func @transform_3(%arg0: i32) -> (i32, i32) {
    %c0_i32 = arith.constant 0 : i32
    %c0_i32_0 = arith.constant 0 : i32
    %c0_i32_1 = arith.constant 0 : i32
    return %c0_i32, %c0_i32_0 : i32, i32
  }
  func.func @transform_4(%arg0: i32) -> (i32, i32) {
    %c0_i32 = arith.constant 0 : i32
    %c0_i32_0 = arith.constant 0 : i32
    %c0_i32_1 = arith.constant 0 : i32
    return %c0_i32, %c0_i32_0 : i32, i32
  }
  func.func @transform_5(%arg0: i32) -> (i32, i32) {
    %c0_i32 = arith.constant 0 : i32
    %c0_i32_0 = arith.constant 0 : i32
    %c0_i32_1 = arith.constant 0 : i32
    return %c0_i32, %c0_i32_0 : i32, i32
  }
  func.func @transform_6(%arg0: i32) -> (i32, i32) {
    %c0_i32 = arith.constant 0 : i32
    %c0_i32_0 = arith.constant 0 : i32
    %c0_i32_1 = arith.constant 0 : i32
    return %c0_i32, %c0_i32_0 : i32, i32
  }
  func.func @transform_7(%arg0: i32) -> (i32, i32) {
    %c0_i32 = arith.constant 0 : i32
    %c0_i32_0 = arith.constant 0 : i32
    %c0_i32_1 = arith.constant 0 : i32
    return %c0_i32, %c0_i32_0 : i32, i32
  }
  func.func @transform_8(%arg0: i32) -> (i32, i32) {
    %c0_i32 = arith.constant 0 : i32
    %c0_i32_0 = arith.constant 0 : i32
    %c0_i32_1 = arith.constant 0 : i32
    return %c0_i32, %c0_i32_0 : i32, i32
  }
  func.func @transform_9(%arg0: i32) -> (i32, i32) {
    %c0_i32 = arith.constant 0 : i32
    %c0_i32_0 = arith.constant 0 : i32
    %c0_i32_1 = arith.constant 0 : i32
    return %c0_i32, %c0_i32_0 : i32, i32
  }
  func.func @transform_10(%arg0: i32) -> (i32, i32) {
    %c0_i32 = arith.constant 0 : i32
    %c0_i32_0 = arith.constant 0 : i32
    %c0_i32_1 = arith.constant 0 : i32
    return %c0_i32, %c0_i32_0 : i32, i32
  }
  func.func @transform_11(%arg0: i32) -> (i32, i32) {
    %c0_i32 = arith.constant 0 : i32
    %c0_i32_0 = arith.constant 0 : i32
    %c0_i32_1 = arith.constant 0 : i32
    return %c0_i32, %c0_i32_0 : i32, i32
  }
  func.func @transform_12(%arg0: i32) -> (i32, i32) {
    %c0_i32 = arith.constant 0 : i32
    %c0_i32_0 = arith.constant 0 : i32
    %c0_i32_1 = arith.constant 0 : i32
    return %c0_i32, %c0_i32_0 : i32, i32
  }
  func.func @transform_13(%arg0: i32) -> (i32, i32) {
    %c0_i32 = arith.constant 0 : i32
    %c0_i32_0 = arith.constant 0 : i32
    %c0_i32_1 = arith.constant 0 : i32
    return %c0_i32, %c0_i32_0 : i32, i32
  }
  func.func @transform_14(%arg0: i32) -> (i32, i32) {
    %c0_i32 = arith.constant 0 : i32
    %c0_i32_0 = arith.constant 0 : i32
    %c0_i32_1 = arith.constant 0 : i32
    return %c0_i32, %c0_i32_0 : i32, i32
  }
  func.func @transform_15(%arg0: i32) -> (i32, i32, i32) {
    %c0_i32 = arith.constant 0 : i32
    %c0_i32_0 = arith.constant 0 : i32
    %c0_i32_1 = arith.constant 0 : i32
    return %arg0, %c0_i32, %c0_i32_0 : i32, i32, i32
  }
}

</mosaic_0001>

<bundles_post_ra>
// kernel: vit_forward.4
= control target key start
LH: loop header
LB: loop body
LE: loop exit
PB: predicated region body
PF: predicated region fallthrough
CT: control target
= control target key end

     0   :  { %9 = vsyncpa [#allocation3], 0  ;;  %s1188_s0 = inlined_call_operand.hbm [shape: bf16[2,16,16], index: 0, kind: input, shape index: {}]   ;;  %s1189_s1 = inlined_call_operand.hbm [shape: bf16[16,128], index: 1, kind: input, shape index: {}]   ;;  %s1190_s2 = inlined_call_operand.hbm [shape: bf16[1,128], index: 2, kind: input, shape index: {}]   ;;  %s1191_s3 = inlined_call_operand.hbm [shape: bf16[16,128], index: 3, kind: input, shape index: {}]   ;;  %s1192_s4 = inlined_call_operand.hbm [shape: bf16[2,16,128], index: 4, kind: output, shape index: {}]  }
   0x1   :  { %11 = vsyncpa [#allocation3 + $0x1], 0 }
   0x2   :  { %12 = vsyncpa [#allocation6], 0 }
   0x3   :  { %13 = vsyncpa [#allocation9], 0 }
   0x4   :  { %14 = vsyncpa [#allocation4], 0 }
   0x5   :  { %16 = vsyncpa [#allocation4 + $0x1], 0  ;;  %s894_s15 = smov 0   ;;  %s896_s16 = smov 0  }
   0x6   :  { %s898_s17 = smov 0   ;;  %s900_s18 = smov 0  }
   0x7   :  { %s902_s19 = smov 0   ;;  %s904_s20 = smov 0  }
   0x8 LB: > { %s504_s21 = sadd.s32 4294967295, %s856_s20   ;;  %s505_s22 = sadd.s32 4294967294, %s856_s20   ;;  %s856_s20 = sphi %s904_s20, %s22_s20   ;;  %s852_s19 = sphi %s902_s19, %s1219_s19   ;;  %s848_s18 = sphi %s900_s18, %s1218_s18   ;;  %s844_s17 = sphi %s898_s17, %s1217_s17   ;;  %s840_s16 = sphi %s896_s16, %s1216_s16   ;;  %s836_s15 = sphi %s894_s15, %s1215_s15  }
   0x9   : > { %p56_p0 = scmp.ne.s32.totalorder %s840_s16, %s836_s15  ;;  %p928_p1 = scmp.eq.s32.totalorder %s504_s21, 0 }
   0xa   : > { %p932_p2 = scmp.eq.s32.totalorder %s504_s21, 1  ;;  %p156_p3 = scmp.eq.s32.totalorder %s505_s22, 1 }
   0xb   : > { %s1198_s23 = scalar_select %p928_p1, 1, 0 }
   0xc   : > { %s1199_s24 = scalar_select %p932_p2, 1, 0 }
   0xd   : > { %p938_p4 = por %p928_p1, %p56_p0  ;;  %p506_p5 = scmp.ge.s32.totalorder %s856_s20, 1 }
   0xe   : > { %p943_p6 = por %p156_p3, %p56_p0  ;;  %p163_p7 = scmp.lt.s32.totalorder %s856_s20, 3 }
   0xf   : > { %s1200_s25 = scalar_select %p938_p4, 1, 0 }
  0x10   : > { %s1201_s26 = scalar_select %p943_p6, 1, 0 }
  0x11   : > { %p948_p8 = pnand %p506_p5, %p163_p7  ;;  %s858_s28 = smov [#allocation5]  }
  0x12   : > { %1202 = sst [smem:[#allocation15_spill]] %s1201_s26  ;;  %s175_s29 = sshll.u32 %s858_s28, 4  ;;  %s952_s29 = int_to_ptr.vmem [resolvable:$true] %s175_s29 }
  0x13   : > { %s1203_s27 = scalar_select %p948_p8, 1, 0 }
  0x14   : > { %p567_p9 = pneg %p948_p8  ;;  %s859_s5 = smov [#allocation7]  }
  0x15   : > { %s189_s6 = sshll.u32 %s859_s5, 4  ;;  %s860_s7 = smov [#allocation8]   ;;  %s963_s6 = int_to_ptr.vmem [resolvable:$true] %s189_s6 }
  0x16   : > { %p959_p11 = pnand %p567_p9, %p928_p1  ;;  %s965_s8 = sshll.u32 %s860_s7, 4  ;;  %s203_s8 = int_to_ptr.vmem [resolvable:$true] %s965_s8 }
  0x17   : > { %s652_s11 = scalar_lea.hbm %s1189_s1, 128 }
  0x18   : > { %p653_p12 = scmp.ne.s32.totalorder %s1189_s1, %s652_s11  ;;  %p975_p13 = pneg %p959_p11 }
  0x19   : > { %p659_p5 = scmp.lt.u32.totalorder %s652_s11, %s1189_s1 }
  0x1a   : > { %p655_p0 = pnand %p975_p13, %p653_p12 }
  0x1c   : > { %p656_p3 = pneg %p655_p0 }
  0x1e   : > { %p661_p7 = pnand %p659_p5, %p656_p3 }
  0x20   : > { %664 = shalt.err (!%p661_p7)
}
  0x21   : > { %s665_s28 = scalar_lea.vmem %s952_s29, 128  ;;  %p673_p1 = scmp.lt.s32.totalorder %s952_s29, %s952_s29 }
  0x22   : > { %p666_p9 = scmp.ne.s32.totalorder %s952_s29, %s665_s28  ;;  %p674_p4 = scmp.lt.s32.totalorder %s665_s28, %s665_s28 }
  0x24   : > { %p668_p10 = pnand %p666_p9, %p975_p13  ;;  %p675_p12 = por %p674_p4, %p673_p1 }
  0x26   : > { %p669_p6 = pneg %p668_p10 }
  0x28   : > { %p676_p0 = pnand %p675_p12, %p669_p6 }
  0x2a   : > { %679 = shalt.err (!%p676_p0)
}
  0x2b   : > { %s861_s5 = smov 64   ;;  %s862_s7 = smov 4  }
  0x2c   : > { %570 = dma.hbm_to_vmem [thread:$0]  (!%p959_p11), %s1189_s1, 128, %s952_s29, [#allocation6], %s861_s5, %s861_s5, %s862_s7  }
  0x2d   : > { %s680_s13 = scalar_lea.hbm %s1190_s2, 16 }
  0x2e   : > { %p681_p1 = scmp.ne.s32.totalorder %s1190_s2, %s680_s13  ;;  %p687_p10 = scmp.lt.u32.totalorder %s680_s13, %s1190_s2 }
  0x30   : > { %p683_p4 = pnand %p681_p1, %p975_p13 }
  0x32   : > { %p684_p6 = pneg %p683_p4 }
  0x34   : > { %p689_p3 = pnand %p687_p10, %p684_p6 }
  0x36   : > { %692 = shalt.err (!%p689_p3)
}
  0x37   : > { %s693_s29 = scalar_lea.vmem %s963_s6, 16  ;;  %s700_s9 = scalar_lea.vmem %s963_s6, 32 }
  0x38   : > { %p694_p5 = scmp.ne.s32.totalorder %s963_s6, %s693_s29  ;;  %p701_p12 = scmp.lt.s32.totalorder %s963_s6, %s963_s6 }
  0x39   : > { %p702_p0 = scmp.lt.s32.totalorder %s700_s9, %s693_s29 }
  0x3a   : > { %p696_p7 = pnand %p694_p5, %p975_p13 }
  0x3b   : > { %p703_p1 = por %p702_p0, %p701_p12 }
  0x3c   : > { %p697_p9 = pneg %p696_p7 }
  0x3e   : > { %p704_p4 = pnand %p703_p1, %p697_p9 }
  0x40   : > { %707 = shalt.err (!%p704_p4)
}
  0x41   : > { %573 = dma.hbm_to_vmem [thread:$0]  (!%p959_p11), %s1190_s2, 16, %s963_s6, [#allocation6]  }
  0x42   : > { %s708_s13 = scalar_lea.hbm %s1191_s3, 128 }
  0x43   : > { %p709_p6 = scmp.ne.s32.totalorder %s1191_s3, %s708_s13  ;;  %p715_p5 = scmp.lt.u32.totalorder %s708_s13, %s1191_s3 }
  0x45   : > { %p711_p10 = pnand %p709_p6, %p975_p13 }
  0x47   : > { %p712_p3 = pneg %p711_p10 }
  0x49   : > { %p717_p7 = pnand %p715_p5, %p712_p3 }
  0x4b   : > { %720 = shalt.err (!%p717_p7)
}
  0x4c   : > { %s721_s9 = scalar_lea.vmem %s203_s8, 128  ;;  %p729_p1 = scmp.lt.s32.totalorder %s203_s8, %s203_s8 }
  0x4d   : > { %p722_p9 = scmp.ne.s32.totalorder %s203_s8, %s721_s9  ;;  %p730_p4 = scmp.lt.s32.totalorder %s721_s9, %s721_s9 }
  0x4f   : > { %p724_p12 = pnand %p722_p9, %p975_p13  ;;  %p731_p8 = por %p730_p4, %p729_p1 }
  0x51   : > { %p725_p0 = pneg %p724_p12 }
  0x53   : > { %p732_p2 = pnand %p731_p8, %p725_p0 }
  0x55   : > { %735 = shalt.err (!%p732_p2)
}
  0x56   : > { %576 = dma.hbm_to_vmem [thread:$0]  (!%p959_p11), %s1191_s3, 128, %s203_s8, [#allocation9], %s861_s5, %s861_s5, %s862_s7  }
  0x57   : > { %s43_s14 = sadd.s32 1, %s844_s17  ;;  %s34_s30 = sadd.s32 1, %s852_s19 }
  0x58   : > { %p50_p2 = scmp.ne.s32.totalorder %s844_s17, %s840_s16  ;;  %p36_p8 = scmp.ge.s32.totalorder %s34_s30, 2 }
  0x59   : > { %p51_p13 = scmp.eq.s32.totalorder %s856_s20, 0  ;;  %p1206_p6 = scmp.ne.s32.totalorder %s1199_s24, 0 }
  0x5a   : > { %p588_p3 = scmp.lt.s32.totalorder %s856_s20, 2  ;;  %s1221_s30 = smov (%p36_p8, %s34_s30), 0 }
  0x5b   : > { %p1052_p10 = por %p1206_p6, %p50_p2  ;;  %p52_p5 = por %p51_p13, %p50_p2 }
  0x5c   : > { %s216_s11 = sand.u32 1, %s844_s17   ;;  %s38_s12 = ssub.s32 %s852_s19, %s1221_s30 }
  0x5d   : > { %p41_p7 = scmp.eq.s32.totalorder %s38_s12, 0  ;;  %s511_s8 = sshll.u32 %s216_s11, 3 }
  0x5e   : > { %s530_s13 = sshll.u32 %s852_s19, 7  ;;  %s220_s29 = scalar_lea.vmem [#allocation2], %s511_s8 }
  0x5f   : > { %s1064_s21 = scalar_select %p41_p7, %s844_s17, %s43_s14  }
  0x60   : > { %s1069_s24 = scalar_lea.hbm %s1188_s0, %s530_s13  ;;  %s229_s9 = sshll.u32 %s220_s29, 4  ;;  %s1071_s9 = int_to_ptr.vmem [resolvable:$true] %s229_s9 }
  0x61   : > { %p1075_p11 = pnand %p588_p3, %p52_p5  ;;  %s1079_s26 = scalar_lea.sflag [#allocation3], %s216_s11 }
  0x62   : > { %s736_s14 = scalar_lea.hbm %s1069_s24, 128  ;;  %s741_s13 = scalar_lea.hbm %s1188_s0, 256 }
  0x63   : > { %p737_p9 = scmp.ne.s32.totalorder %s1069_s24, %s736_s14  ;;  %p738_p12 = pneg %p1075_p11 }
  0x64   : > { %p742_p4 = scmp.lt.u32.totalorder %s1069_s24, %s1188_s0  ;;  %p743_p2 = scmp.lt.u32.totalorder %s741_s13, %s736_s14 }
  0x65   : > { %p739_p0 = pnand %p738_p12, %p737_p9  ;;  %p745_p13 = scmp.lt.u32.totalorder %s736_s14, %s1069_s24 }
  0x66   : > { %p744_p8 = por %p743_p2, %p742_p4 }
  0x67   : > { %p740_p1 = pneg %p739_p0 }
  0x68   : > { %p746_p6 = por %p745_p13, %p744_p8 }
  0x6a   : > { %p747_p3 = pnand %p746_p6, %p740_p1 }
  0x6c   : > { %750 = shalt.err (!%p747_p3)
}
  0x6d   : > { %s751_s11 = scalar_lea.vmem %s1071_s9, 128  ;;  %s863_s29 = smov [#allocation2]  }
  0x6e   : > { %p752_p5 = scmp.ne.s32.totalorder %s1071_s9, %s751_s11  ;;  %s756_s12 = sshll.u32 %s863_s29, 4  ;;  %s757_s12 = int_to_ptr.vmem [resolvable:$false] %s756_s12 }
  0x6f   : > { %s758_s8 = scalar_lea.vmem %s757_s12, 256  ;;  %p759_p0 = scmp.lt.s32.totalorder %s1071_s9, %s757_s12 }
  0x70   : > { %p754_p7 = pnand %p752_p5, %p738_p12  ;;  %p760_p4 = scmp.lt.s32.totalorder %s758_s8, %s751_s11 }
  0x72   : > { %p755_p9 = pneg %p754_p7  ;;  %p761_p2 = por %p760_p4, %p759_p0 }
  0x74   : > { %p762_p8 = pnand %p761_p2, %p755_p9 }
  0x76   : > { %765 = shalt.err (!%p762_p8)
}
  0x77   : > { %580 = dma.hbm_to_vmem [thread:$0]  (!%p1075_p11), %s1069_s24, 128, %s1071_s9, %s1079_s26, %s861_s5, %s861_s5, %s862_s7  }
  0x78   : > { %p1209_p12 = scmp.ne.s32.totalorder %s1203_s27, 0 }
  0x79   : > { %s1113_s14 = sand.u32 (!%p1209_p12), 1, %s840_s16   ;;  %p1210_p1 = scmp.ne.s32.totalorder (!%p1209_p12), %s1200_s25, 0 }
  0x7a   : > { %241 = sbr.rel (%p1209_p12) target bundleno = 375 (0x177), region = 36  ;;  %s515_s13 = sshll.u32 (!%p1209_p12), %s1113_s14, 3 }
  0x7b   : > { %s244_s22 = scalar_lea.sflag (!%p1209_p12), [#allocation3], %s1113_s14  ;;  %s247_s6 = scalar_lea.vmem (!%p1209_p12), [#allocation2], %s515_s13 }
  0x81   : > { %819 = dma.done.wait (%p1210_p1), %s244_s22, 128  }
  0x82   : > { %821 = vsyncadd (%p1210_p1), %s244_s22, 4294967168  ;;  %p1211_p11 = scmp.ne.s32.totalorder %s1198_s23, 0 }
  0x84   : > { %823 = dma.done.wait (%p1211_p11), [#allocation6], 144  }
  0x85   : > { %825 = vsyncadd (%p1211_p11), [#allocation6], 4294967152 }
  0x86   : > { %827 = dma.done.wait (%p1211_p11), [#allocation9], 128  }
  0x87   : > { %829 = vsyncadd (%p1211_p11), [#allocation9], 4294967168  ;;  %v864_v0 = vmov 0.0   ;;  %vm865_vm0 = vmmov 0   ;;  %v650_v1 = vld [vmem:[#allocation5] sm:$0xff]   ;;  %v651_v2 = vld [vmem:[%s247_s6] sm:$0xff]   ;;  %v294_v3 = vlaneseq }
  0x88   : > { %545 = vmatprep.subr.bf16.mxu0 %v864_v0  ;;  %547 = vmatprep.mubr.msk.bf16.mxu0 %vm865_vm0, %v864_v0  ;;  %vm309_vm1 = vcmask 130048   ;;  %v292_v5 = vld [vmem:[#allocation7] sm:$0x1]  ;;  %v535_v9 = vld [vmem:[#allocation8] sm:$0xff]   ;;  %s533_s23 = sshll.u32 %s848_s18, 7  ;;  %s283_s25 = scalar_lea.vmem [#allocation10], %s515_s13 }
  0x89   : > { %546 = vmatpush3.bf16.msra.mxu0 %v650_v1  ;;  %v295_v4 = vshrl.u32 %v294_v3, 7  ;;  %v293_v6 = vunpack.c.l.bf16 %v292_v5  ;;  %v536_v12 = vunpack.c.l.bf16 %v535_v9  ;;  %v537_v14 = vunpack.c.h.bf16 %v535_v9  ;;  %s386_s27 = sshll.u32 %s283_s25, 4  ;;  %s1137_s24 = scalar_lea.hbm %s1192_s4, %s533_s23  ;;  %s1139_s27 = int_to_ptr.vmem [resolvable:$true] %s386_s27 }
  0x8a   : > { %s371_s9 = scalar_lea.sflag [#allocation4], %s1113_s14  ;;  %s766_s26 = scalar_lea.vmem %s1139_s27, 128 }
  0x8b   : > { %v296_v7 = vsub.s32 0, %v295_v4  ;;  %p767_p13 = scmp.ne.s32.totalorder %s1139_s27, %s766_s26  ;;  %s866_s18 = smov [#allocation10]  }
  0x8c   : > { %548 = vmatmul.mubr.msk.bf16.vlgmr.msra.gmra.mrb[0].mxu0 %vm309_vm1, %v651_v2  ;;  %s770_s28 = sshll.u32 %s866_s18, 4  ;;  %s771_s28 = int_to_ptr.vmem [resolvable:$false] %s770_s28 }
  0x8d   : > { %v297_v8 = vrot.slane %v293_v6, %v296_v7  ;;  %p768_p6 = pnand %p767_p13, %p1052_p10  ;;  %s772_s11 = scalar_lea.vmem %s771_s28, 256 }
  0x8e   : > { %p773_p5 = scmp.lt.s32.totalorder %s1139_s27, %s771_s28  ;;  %p774_p7 = scmp.lt.s32.totalorder %s772_s11, %s766_s26 }
  0x8f   : > { %p769_p3 = pneg %p768_p6 }
  0x90   : > { %p775_p9 = por %p774_p7, %p773_p5 }
  0x92   : > { %p776_p0 = pnand %p775_p9, %p769_p3 }
 0x15f   : > { %v347_v10 = vpop.f32.mrb[0].mxu0 }
 0x160   : > { %v348_v11 = vadd.f32 %v347_v10, %v297_v8  ;;  %v549_v13 = vpop.f32.mrb[1].mxu0 }
 0x161   : > { %v350_v15 = vpop.f32.mrb[2].mxu0 }
 0x162   : > { %v351_v16 = vadd.f32 %v350_v15, %v297_v8  ;;  %v550_v17 = vpop.f32.mrb[3].mxu0  ;;  %v358_v18 = vadd.f32 %v536_v12, %v348_v11 }
 0x164   : > { %v359_v19 = vadd.f32 %v537_v14, %v351_v16 }
 0x166   : > { %v541_v20 = vpack.c.bf16 %v359_v19, %v358_v18 }
 0x168   : > { %542 = vst [vmem:[%s283_s25] sm:$0xff] %v541_v20  }
 0x169   : > { %779 = shalt.err (!%p776_p0)
}
 0x16a   : > { %s780_s29 = scalar_lea.hbm %s1137_s24, 128  ;;  %s784_s13 = scalar_lea.hbm %s1192_s4, 256 }
 0x16b   : > { %p781_p4 = scmp.ne.s32.totalorder %s1137_s24, %s780_s29  ;;  %p785_p12 = scmp.lt.u32.totalorder %s1137_s24, %s1192_s4 }
 0x16c   : > { %p786_p1 = scmp.lt.u32.totalorder %s784_s13, %s780_s29  ;;  %p788_p13 = scmp.lt.u32.totalorder %s780_s29, %s1137_s24 }
 0x16d   : > { %p782_p2 = pnand %p781_p4, %p1052_p10 }
 0x16e   : > { %p787_p11 = por %p786_p1, %p785_p12 }
 0x16f   : > { %p783_p8 = pneg %p782_p2 }
 0x170   : > { %p789_p6 = por %p788_p13, %p787_p11 }
 0x172   : > { %p790_p3 = pnand %p789_p6, %p783_p8 }
 0x174   : > { %793 = shalt.err (!%p790_p3)
}
 0x175   : > { %s867_s23 = smov 64   ;;  %s868_s25 = smov 4  }
 0x176   : > { %565 = dma.vmem_to_hbm [thread:$0]  (%p1052_p10), %s1139_s27, 128, %s1137_s24, %s371_s9, %s867_s23, %s867_s23, %s868_s25  }
 0x177 PF: > { %s1212_s5 = sld [smem:[#allocation15_spill]]  ;;  %s401_s7 = sand.u32 1, %s836_s15  }
 0x178   : > { %p1214_p7 = scmp.ge.s32.totalorder %s856_s20, 2  ;;  %s402_s26 = scalar_lea.sflag [#allocation4], %s401_s7 }
 0x17d   : > { %p1213_p5 = scmp.ne.s32.totalorder %s1212_s5, 0 }
 0x17f   : > { %p582_p9 = pnand %p1214_p7, %p1213_p5 }
 0x181   : > { %831 = dma.done.wait (!%p582_p9), %s402_s26, 128  }
 0x182   : > { %833 = vsyncadd (!%p582_p9), %s402_s26, 4294967168  ;;  %s22_s20 = sadd.s32 1, %s856_s20   ;;  %s1215_s15 = smov %s840_s16 }
 0x183   : > { %p19_p0 = scmp.ge.s32.totalorder %s22_s20, 4   ;;  %s1216_s16 = smov %s844_s17 }
 0x184   : > { %s1217_s17 = smov %s1064_s21  ;;  %s1218_s18 = smov %s852_s19 }
 0x185   : > { %s1219_s19 = smov %s1221_s30  ;;  %21 = sbr.rel (!%p19_p0) target bundleno = 8 (0x8), region = 94 }
 0x18c   :  { %407 = vsyncpa [#allocation3], 1 }
 0x18d   :  { %409 = vsyncpa [#allocation3 + $0x1], 1 }
 0x18e   :  { %410 = vsyncpa [#allocation6], 1 }
 0x18f   :  { %411 = vsyncpa [#allocation9], 1 }
 0x190   :  { %412 = vsyncpa [#allocation4], 1 }
 0x191   :  { %414 = vsyncpa [#allocation4 + $0x1], 1 }

// kernel: vit_forward.7
= control target key start
LH: loop header
LB: loop body
LE: loop exit
PB: predicated region body
PF: predicated region fallthrough
CT: control target
= control target key end

     0   :  { %8 = vsyncpa [#allocation3], 0  ;;  %s969_s0 = inlined_call_operand.hbm [shape: bf16[2,16,128], index: 0, kind: input, shape index: {}]   ;;  %s970_s1 = inlined_call_operand.hbm [shape: bf16[1,128], index: 1, kind: input, shape index: {}]   ;;  %s971_s2 = inlined_call_operand.hbm [shape: bf16[1,128], index: 2, kind: input, shape index: {}]   ;;  %s972_s3 = inlined_call_operand.hbm [shape: f32[2,16,128], index: 3, kind: output, shape index: {}]  }
   0x1   :  { %10 = vsyncpa [#allocation3 + $0x1], 0 }
   0x2   :  { %11 = vsyncpa [#allocation6], 0 }
   0x3   :  { %12 = vsyncpa [#allocation4], 0 }
   0x4   :  { %14 = vsyncpa [#allocation4 + $0x1], 0  ;;  %s719_s12 = smov 0   ;;  %s721_s13 = smov 0  }
   0x5   :  { %s723_s14 = smov 0   ;;  %s725_s15 = smov 0  }
   0x6   :  { %s727_s16 = smov 0   ;;  %s729_s17 = smov 0  }
   0x7 LB: > { %s401_s18 = sadd.s32 4294967295, %s689_s17   ;;  %s402_s19 = sadd.s32 4294967294, %s689_s17   ;;  %s689_s17 = sphi %s729_s17, %s20_s17   ;;  %s685_s16 = sphi %s727_s16, %s998_s16   ;;  %s681_s15 = sphi %s725_s15, %s997_s15   ;;  %s677_s14 = sphi %s723_s14, %s996_s14   ;;  %s673_s13 = sphi %s721_s13, %s995_s13   ;;  %s669_s12 = sphi %s719_s12, %s994_s12  }
   0x8   : > { %s41_s20 = sadd.s32 1, %s677_s14  ;;  %p48_p0 = scmp.ne.s32.totalorder %s677_s14, %s673_s13 }
   0x9   : > { %p49_p1 = scmp.eq.s32.totalorder %s689_s17, 0  ;;  %p54_p2 = scmp.ne.s32.totalorder %s673_s13, %s669_s12 }
   0xa   : > { %p757_p3 = scmp.eq.s32.totalorder %s401_s18, 0  ;;  %p122_p4 = scmp.eq.s32.totalorder %s401_s18, 1 }
   0xb   : > { %p761_p5 = por %p49_p1, %p48_p0  ;;  %p128_p6 = scmp.eq.s32.totalorder %s402_s19, 1 }
   0xc   : > { %s979_s21 = scalar_select %p757_p3, 1, 0 }
   0xd   : > { %p767_p7 = por %p757_p3, %p54_p2  ;;  %p771_p8 = por %p122_p4, %p48_p0 }
   0xe   : > { %p775_p9 = por %p128_p6, %p54_p2  ;;  %p403_p10 = scmp.ge.s32.totalorder %s689_s17, 1 }
   0xf   : > { %s981_s23 = scalar_select %p767_p7, 1, 0 }
  0x10   : > { %s982_s24 = scalar_select %p771_p8, 1, 0 }
  0x11   : > { %s983_s25 = scalar_select %p775_p9, 1, 0 }
  0x12   : > { %p135_p11 = scmp.lt.s32.totalorder %s689_s17, 3  ;;  %s691_s27 = smov [#allocation5]  }
  0x13   : > { %s148_s28 = sshll.u32 %s691_s27, 4  ;;  %p455_p1 = scmp.lt.s32.totalorder %s689_s17, 2  ;;  %s149_s28 = int_to_ptr.vmem [resolvable:$true] %s148_s28 }
  0x14   : > { %p782_p13 = pnand %p403_p10, %p135_p11  ;;  %s692_s30 = smov [#allocation7]  }
  0x15   : > { %p791_p4 = pnand %p455_p1, %p761_p5  ;;  %s159_s4 = sshll.u32 %s692_s30, 4  ;;  %s801_s4 = int_to_ptr.vmem [resolvable:$true] %s159_s4 }
  0x16   : > { %s984_s26 = scalar_select %p782_p13, 1, 0 }
  0x17   : > { %p438_p0 = pneg %p782_p13  ;;  %s517_s8 = scalar_lea.hbm %s970_s1, 16 }
  0x18   : > { %s985_s29 = scalar_select %p791_p4, 1, 0 }
  0x19   : > { %p797_p2 = pnand %p438_p0, %p757_p3  ;;  %p518_p5 = scmp.ne.s32.totalorder %s970_s1, %s517_s8 }
  0x1a   : > { %p524_p1 = scmp.lt.u32.totalorder %s517_s8, %s970_s1 }
  0x1b   : > { %p519_p6 = pneg %p797_p2 }
  0x1d   : > { %p520_p10 = pnand %p519_p6, %p518_p5 }
  0x1f   : > { %p521_p11 = pneg %p520_p10 }
  0x21   : > { %p526_p0 = pnand %p524_p1, %p521_p11 }
  0x23   : > { %529 = shalt.err (!%p526_p0)
}
  0x24   : > { %s530_s19 = scalar_lea.vmem %s149_s28, 16  ;;  %s537_s22 = scalar_lea.vmem %s149_s28, 32 }
  0x25   : > { %p531_p12 = scmp.ne.s32.totalorder %s149_s28, %s530_s19  ;;  %p538_p3 = scmp.lt.s32.totalorder %s149_s28, %s149_s28 }
  0x26   : > { %p539_p7 = scmp.lt.s32.totalorder %s537_s22, %s530_s19 }
  0x27   : > { %p533_p9 = pnand %p531_p12, %p519_p6 }
  0x28   : > { %p540_p13 = por %p539_p7, %p538_p3 }
  0x29   : > { %p534_p8 = pneg %p533_p9 }
  0x2b   : > { %p541_p4 = pnand %p540_p13, %p534_p8 }
  0x2d   : > { %544 = shalt.err (!%p541_p4)
}
  0x2e   : > { %441 = dma.hbm_to_vmem [thread:$0]  (!%p797_p2), %s970_s1, 16, %s149_s28, [#allocation6]  }
  0x2f   : > { %s545_s8 = scalar_lea.hbm %s971_s2, 16 }
  0x30   : > { %p546_p9 = scmp.ne.s32.totalorder %s971_s2, %s545_s8  ;;  %p552_p8 = scmp.lt.u32.totalorder %s545_s8, %s971_s2 }
  0x32   : > { %p548_p3 = pnand %p546_p9, %p519_p6 }
  0x34   : > { %p549_p7 = pneg %p548_p3 }
  0x36   : > { %p554_p12 = pnand %p552_p8, %p549_p7 }
  0x38   : > { %557 = shalt.err (!%p554_p12)
}
  0x39   : > { %s558_s28 = scalar_lea.vmem %s801_s4, 16  ;;  %s565_s19 = scalar_lea.vmem %s801_s4, 32 }
  0x3a   : > { %p559_p13 = scmp.ne.s32.totalorder %s801_s4, %s558_s28  ;;  %p566_p10 = scmp.lt.s32.totalorder %s801_s4, %s801_s4 }
  0x3b   : > { %p567_p11 = scmp.lt.s32.totalorder %s565_s19, %s558_s28 }
  0x3c   : > { %p561_p4 = pnand %p559_p13, %p519_p6 }
  0x3d   : > { %p568_p1 = por %p567_p11, %p566_p10 }
  0x3e   : > { %p562_p5 = pneg %p561_p4 }
  0x40   : > { %p569_p0 = pnand %p568_p1, %p562_p5 }
  0x42   : > { %572 = shalt.err (!%p569_p0)
}
  0x43   : > { %444 = dma.hbm_to_vmem [thread:$0]  (!%p797_p2), %s971_s2, 16, %s801_s4, [#allocation6]  }
  0x44   : > { %s32_s30 = sadd.s32 1, %s685_s16  ;;  %s170_s6 = sand.u32 1, %s677_s14  }
  0x45   : > { %p34_p6 = scmp.ge.s32.totalorder %s32_s30, 2  ;;  %s407_s7 = sshll.u32 %s170_s6, 3 }
  0x46   : > { %s420_s8 = sshll.u32 %s685_s16, 7  ;;  %s174_s4 = scalar_lea.vmem [#allocation2], %s407_s7 }
  0x47   : > { %s1000_s30 = smov (%p34_p6, %s32_s30), 0  ;;  %s859_s10 = scalar_lea.hbm %s969_s0, %s420_s8 }
  0x48   : > { %s36_s11 = ssub.s32 %s685_s16, %s1000_s30  ;;  %s183_s18 = sshll.u32 %s174_s4, 4  ;;  %s863_s18 = int_to_ptr.vmem [resolvable:$true] %s183_s18 }
  0x49   : > { %p39_p2 = scmp.eq.s32.totalorder %s36_s11, 0  ;;  %s870_s19 = scalar_lea.sflag [#allocation3], %s170_s6 }
  0x4a   : > { %s573_s22 = scalar_lea.hbm %s859_s10, 128  ;;  %p987_p3 = scmp.ne.s32.totalorder %s985_s29, 0 }
  0x4b   : > { %s868_s28 = scalar_select %p39_p2, %s677_s14, %s41_s20  }
  0x4c   : > { %p574_p9 = scmp.ne.s32.totalorder %s859_s10, %s573_s22  ;;  %p575_p7 = pneg %p987_p3 }
  0x4d   : > { %s578_s7 = scalar_lea.hbm %s969_s0, 256  ;;  %p579_p13 = scmp.lt.u32.totalorder %s859_s10, %s969_s0 }
  0x4e   : > { %p576_p8 = pnand %p575_p7, %p574_p9  ;;  %p580_p4 = scmp.lt.u32.totalorder %s578_s7, %s573_s22 }
  0x4f   : > { %p582_p10 = scmp.lt.u32.totalorder %s573_s22, %s859_s10 }
  0x50   : > { %p577_p12 = pneg %p576_p8  ;;  %p581_p5 = por %p580_p4, %p579_p13 }
  0x52   : > { %p583_p11 = por %p582_p10, %p581_p5 }
  0x54   : > { %p584_p1 = pnand %p583_p11, %p577_p12 }
  0x56   : > { %587 = shalt.err (!%p584_p1)
}
  0x57   : > { %s588_s20 = scalar_lea.vmem %s863_s18, 128  ;;  %s693_s6 = smov [#allocation2]  }
  0x58   : > { %p589_p0 = scmp.ne.s32.totalorder %s863_s18, %s588_s20  ;;  %s593_s11 = sshll.u32 %s693_s6, 4  ;;  %s594_s11 = int_to_ptr.vmem [resolvable:$false] %s593_s11 }
  0x59   : > { %s595_s4 = scalar_lea.vmem %s594_s11, 256  ;;  %p596_p9 = scmp.lt.s32.totalorder %s863_s18, %s594_s11 }
  0x5a   : > { %p591_p6 = pnand %p589_p0, %p575_p7  ;;  %p597_p8 = scmp.lt.s32.totalorder %s595_s4, %s588_s20 }
  0x5c   : > { %p592_p2 = pneg %p591_p6  ;;  %p598_p13 = por %p597_p8, %p596_p9 }
  0x5e   : > { %p599_p4 = pnand %p598_p13, %p592_p2 }
  0x60   : > { %602 = shalt.err (!%p599_p4)
}
  0x61   : > { %s694_s22 = smov 64   ;;  %s695_s27 = smov 4  }
  0x62   : > { %448 = dma.hbm_to_vmem [thread:$0]  (!%p987_p3), %s859_s10, 128, %s863_s18, %s870_s19, %s694_s22, %s694_s22, %s695_s27  }
  0x63   : > { %p988_p7 = scmp.ne.s32.totalorder %s984_s26, 0 }
  0x64   : > { %s901_s8 = sand.u32 (!%p988_p7), 1, %s673_s13   ;;  %p989_p12 = scmp.ne.s32.totalorder (!%p988_p7), %s981_s23, 0 }
  0x65   : > { %195 = sbr.rel (%p988_p7) target bundleno = 445 (0x1bd), region = 32  ;;  %s411_s7 = sshll.u32 (!%p988_p7), %s901_s8, 3 }
  0x66   : > { %s198_s5 = scalar_lea.sflag (!%p988_p7), [#allocation3], %s901_s8  ;;  %s201_s9 = scalar_lea.vmem (!%p988_p7), [#allocation2], %s411_s7 }
  0x6c   : > { %656 = dma.done.wait (%p989_p12), %s198_s5, 128  }
  0x6d   : > { %658 = vsyncadd (%p989_p12), %s198_s5, 4294967168  ;;  %p990_p5 = scmp.ne.s32.totalorder %s979_s21, 0 }
  0x6f   : > { %660 = dma.done.wait (%p990_p5), [#allocation6], 32  }
  0x70   : > { %662 = vsyncadd (%p990_p5), [#allocation6], 4294967264  ;;  %v423_v0 = vld [vmem:[%s201_s9] sm:$0xff]   ;;  %v265_v13 = vlaneseq  ;;  %v238_v18 = vld [vmem:[#allocation5] sm:$0x1]  ;;  %s414_s21 = sshll.u32 %s901_s8, 4 }
  0x71   : > { %v424_v1 = vunpack.c.l.bf16 %v423_v0  ;;  %v425_v2 = vunpack.c.h.bf16 %v423_v0  ;;  %v239_v20 = vld [vmem:[#allocation7] sm:$0x1]  ;;  %v240_v21 = vunpack.c.l.bf16 %v238_v18  ;;  %s421_s23 = sshll.u32 %s681_s15, 8  ;;  %s231_s26 = scalar_lea.vmem [#allocation8], %s414_s21 }
  0x72   : > { %v266_v17 = vshrl.u32 %v265_v13, 7  ;;  %v241_v23 = vunpack.c.l.bf16 %v239_v20  ;;  %s295_s29 = sshll.u32 %s231_s26, 4  ;;  %s918_s19 = scalar_lea.hbm %s972_s3, %s421_s23  ;;  %s920_s29 = int_to_ptr.vmem [resolvable:$true] %s295_s29 }
  0x73   : > { %242 = vadd.xlane.f32.xlu0 %v424_v1  ;;  %s280_s20 = scalar_lea.sflag [#allocation4], %s901_s8  ;;  %s603_s6 = scalar_lea.vmem %s920_s29, 256 }
  0x74   : > { %v267_v22 = vsub.s32 0, %v266_v17  ;;  %p604_p3 = scmp.ne.s32.totalorder %s920_s29, %s603_s6  ;;  %p991_p10 = scmp.ne.s32.totalorder %s982_s24, 0 }
  0x75   : > { %s696_s15 = smov [#allocation8]  }
  0x76   : > { %v268_v24 = vrot.slane %v240_v21, %v267_v22  ;;  %v274_v26 = vrot.slane %v241_v23, %v267_v22  ;;  %p605_p11 = pnand %p604_p3, %p991_p10  ;;  %s607_s11 = sshll.u32 %s696_s15, 4  ;;  %s608_s11 = int_to_ptr.vmem [resolvable:$false] %s607_s11 }
  0x77   : > { %244 = vadd.xlane.f32.xlu0 %v425_v2  ;;  %s609_s4 = scalar_lea.vmem %s608_s11, 512  ;;  %p610_p0 = scmp.lt.s32.totalorder %s920_s29, %s608_s11 }
  0x78   : > { %p606_p1 = pneg %p605_p11  ;;  %p611_p6 = scmp.lt.s32.totalorder %s609_s4, %s603_s6 }
  0x7a   : > { %p612_p2 = por %p611_p6, %p610_p0 }
  0x7c   : > { %p613_p9 = pnand %p612_p2, %p606_p1 }
 0x100   : > { %v243_v3 = vpop.xlane.xlu0 %242 }
 0x101   : > { %v247_v4 = vmul.f32 0.0078125, %v243_v3 }
 0x103   : > { %v249_v5 = vsub.f32 %v424_v1, %v247_v4 }
 0x104   : > { %v245_v6 = vpop.xlane.xlu0 %244 }
 0x105   : > { %v248_v7 = vmul.f32 0.0078125, %v245_v6  ;;  %v251_v8 = vmul.f32 %v249_v5, %v249_v5 }
 0x107   : > { %v250_v9 = vsub.f32 %v425_v2, %v248_v7  ;;  %253 = vadd.xlane.f32.xlu1 %v251_v8 }
 0x109   : > { %v252_v10 = vmul.f32 %v250_v9, %v250_v9 }
 0x10b   : > { %255 = vadd.xlane.f32.xlu1 %v252_v10 }
 0x194   : > { %v254_v11 = vpop.xlane.xlu1 %253 }
 0x195   : > { %v257_v12 = vmul.f32 0.0078125, %v254_v11 }
 0x197   : > { %v259_v14 = vadd.f32 1e-05, %v257_v12 }
 0x198   : > { %v256_v15 = vpop.xlane.xlu1 %255 }
 0x199   : > { %513 = vrsqrt.f32 %v259_v14  ;;  %v258_v16 = vmul.f32 0.0078125, %v256_v15 }
 0x19b   : > { %v260_v19 = vadd.f32 1e-05, %v258_v16 }
 0x19d   : > { %515 = vrsqrt.f32 %v260_v19 }
 0x1a3   : > { %v514_v25 = vpop.eup %513 }
 0x1a4   : > { %v263_v27 = vmul.f32 %v514_v25, %v249_v5 }
 0x1a6   : > { %v269_v28 = vmul.f32 %v268_v24, %v263_v27 }
 0x1a7   : > { %v516_v29 = vpop.eup %515 }
 0x1a8   : > { %v275_v30 = vadd.f32 %v274_v26, %v269_v28  ;;  %v264_v31 = vmul.f32 %v516_v29, %v250_v9 }
 0x1aa   : > { %v270_v32 = vmul.f32 %v268_v24, %v264_v31  ;;  %277 = vst [vmem:[%s231_s26] sm:$0xff] %v275_v30 }
 0x1ac   : > { %v276_v33 = vadd.f32 %v274_v26, %v270_v32 }
 0x1ae   : > { %278 = vst [vmem:[%s231_s26 + $0x8] sm:$0xff] %v276_v33 }
 0x1af   : > { %616 = shalt.err (!%p613_p9)
}
 0x1b0   : > { %s617_s22 = scalar_lea.hbm %s918_s19, 256  ;;  %s621_s5 = scalar_lea.hbm %s972_s3, 512 }
 0x1b1   : > { %p618_p8 = scmp.ne.s32.totalorder %s918_s19, %s617_s22  ;;  %p622_p7 = scmp.lt.u32.totalorder %s918_s19, %s972_s3 }
 0x1b2   : > { %p623_p12 = scmp.lt.u32.totalorder %s621_s5, %s617_s22  ;;  %p625_p3 = scmp.lt.u32.totalorder %s617_s22, %s918_s19 }
 0x1b3   : > { %p619_p13 = pnand %p618_p8, %p991_p10 }
 0x1b4   : > { %p624_p5 = por %p623_p12, %p622_p7 }
 0x1b5   : > { %p620_p4 = pneg %p619_p13 }
 0x1b6   : > { %p626_p11 = por %p625_p3, %p624_p5 }
 0x1b8   : > { %p627_p1 = pnand %p626_p11, %p620_p4 }
 0x1ba   : > { %630 = shalt.err (!%p627_p1)
}
 0x1bb   : > { %s697_s23 = smov 128   ;;  %s698_s26 = smov 8  }
 0x1bc   : > { %436 = dma.vmem_to_hbm [thread:$0]  (%p991_p10), %s920_s29, 256, %s918_s19, %s280_s20, %s697_s23, %s697_s23, %s698_s26  }
 0x1bd PF: > { %s310_s10 = sand.u32 1, %s669_s12   ;;  %p992_p0 = scmp.ne.s32.totalorder %s983_s25, 0 }
 0x1be   : > { %p993_p6 = scmp.ge.s32.totalorder %s689_s17, 2  ;;  %s311_s18 = scalar_lea.sflag [#allocation4], %s310_s10 }
 0x1c0   : > { %p450_p2 = pnand %p993_p6, %p992_p0 }
 0x1c2   : > { %664 = dma.done.wait (!%p450_p2), %s311_s18, 256  }
 0x1c3   : > { %666 = vsyncadd (!%p450_p2), %s311_s18, 4294967040  ;;  %s20_s17 = sadd.s32 1, %s689_s17   ;;  %s994_s12 = smov %s673_s13 }
 0x1c4   : > { %p17_p9 = scmp.ge.s32.totalorder %s20_s17, 4   ;;  %s995_s13 = smov %s677_s14 }
 0x1c5   : > { %s996_s14 = smov %s868_s28  ;;  %s997_s15 = smov %s685_s16 }
 0x1c6   : > { %s998_s16 = smov %s1000_s30  ;;  %19 = sbr.rel (!%p17_p9) target bundleno = 7 (0x7), region = 85 }
 0x1cd   :  { %316 = vsyncpa [#allocation3], 1 }
 0x1ce   :  { %318 = vsyncpa [#allocation3 + $0x1], 1 }
 0x1cf   :  { %319 = vsyncpa [#allocation6], 1 }
 0x1d0   :  { %320 = vsyncpa [#allocation4], 1 }
 0x1d1   :  { %322 = vsyncpa [#allocation4 + $0x1], 1 }

// kernel: vit_forward.5
= control target key start
LH: loop header
LB: loop body
LE: loop exit
PB: predicated region body
PF: predicated region fallthrough
CT: control target
= control target key end

     0   :  { %s4752_s0 = inlined_call_operand.hbm [shape: bf16[2,16,128], index: 0, kind: input, shape index: {}, may-alias: {0,15}]   ;;  %s4753_s1 = inlined_call_operand.hbm [shape: bf16[1,128], index: 1, kind: input, shape index: {}]   ;;  %s4754_s2 = inlined_call_operand.hbm [shape: bf16[1,128], index: 2, kind: input, shape index: {}]   ;;  %s4755_s3 = inlined_call_operand.hbm [shape: bf16[128,384], index: 3, kind: input, shape index: {}]   ;;  %s4756_s4 = inlined_call_operand.hbm [shape: bf16[1,384], index: 4, kind: input, shape index: {}]   ;;  %s4757_s5 = inlined_call_operand.hbm [shape: bf16[128,128], index: 5, kind: input, shape index: {}]   ;;  %s4758_s6 = inlined_call_operand.hbm [shape: bf16[1,128], index: 6, kind: input, shape index: {}]   ;;  %s4759_s7 = inlined_call_operand.hbm [shape: bf16[1,128], index: 7, kind: input, shape index: {}]   ;;  %s4760_s8 = inlined_call_operand.hbm [shape: bf16[1,128], index: 8, kind: input, shape index: {}]   ;;  %s4761_s9 = inlined_call_operand.hbm [shape: bf16[1,128], index: 9, kind: input, shape index: {}]   ;;  %s4762_s10 = inlined_call_operand.hbm [shape: bf16[128,512], index: 10, kind: input, shape index: {}]   ;;  %s4763_s11 = inlined_call_operand.hbm [shape: bf16[1,512], index: 11, kind: input, shape index: {}]   ;;  %s4764_s12 = inlined_call_operand.hbm [shape: bf16[512,128], index: 12, kind: input, shape index: {}]   ;;  %s4765_s13 = inlined_call_operand.hbm [shape: bf16[1,128], index: 13, kind: input, shape index: {}]   ;;  %s4766_s14 = inlined_call_operand.hbm [shape: bf16[1,128], index: 14, kind: input, shape index: {}]   ;;  %s4767_s15 = inlined_call_operand.hbm [shape: bf16[2,16,128], index: 15, kind: output, shape index: {}, may-alias: {0,15}]  }
   0x1   :  { %4781 = sst [smem:[#allocation43_spill]] %s4752_s0 }
   0x2   :  { %4782 = sst [smem:[#allocation44_spill]] %s4753_s1 }
   0x3   :  { %4783 = sst [smem:[#allocation45_spill]] %s4755_s3 }
   0x4   :  { %4784 = sst [smem:[#allocation46_spill]] %s4767_s15 }
   0x5   :  { %20 = vsyncpa [#allocation5], 0 }
   0x6   :  { %22 = vsyncpa [#allocation5 + $0x1], 0 }
   0x7   :  { %23 = vsyncpa [#allocation8], 0 }
   0x8   :  { %24 = vsyncpa [#allocation11], 0 }
   0x9   :  { %25 = vsyncpa [#allocation14], 0 }
   0xa   :  { %26 = vsyncpa [#allocation17], 0 }
   0xb   :  { %27 = vsyncpa [#allocation20], 0 }
   0xc   :  { %28 = vsyncpa [#allocation23], 0 }
   0xd   :  { %29 = vsyncpa [#allocation26], 0 }
   0xe   :  { %30 = vsyncpa [#allocation6], 0 }
   0xf   :  { %32 = vsyncpa [#allocation6 + $0x1], 0  ;;  %s4020_s18 = smov 0   ;;  %s4022_s19 = smov 0  }
  0x10   :  { %s4024_s20 = smov 0   ;;  %s4026_s21 = smov 0  }
  0x11 LB: > { %4785 = sst [smem:[#allocation38_spill]] %s3897_s18  ;;  %s3911_s22 = smov [#allocation7]   ;;  %s3909_s21 = sphi %s4026_s21, %s4834_s21   ;;  %s3905_s20 = sphi %s4024_s20, %s4833_s20   ;;  %s3901_s19 = sphi %s4022_s19, %s4832_s19   ;;  %s3897_s18 = sphi %s4020_s18, %s4831_s18  }
  0x12   : > { %4786 = sst [smem:[#allocation39_spill]] %s3901_s19  ;;  %s402_s23 = sshll.u32 %s3911_s22, 4  ;;  %s4046_s23 = int_to_ptr.vmem [resolvable:$true] %s402_s23 }
  0x13   : > { %4787 = sst [smem:[#allocation40_spill]] %s3905_s20  ;;  %s4041_s24 = sadd.s32 4294967295, %s3909_s21  }
  0x14   : > { %4788 = sst [smem:[#allocation41_spill]] %s4041_s24  ;;  %p2691_p0 = scmp.ge.s32.totalorder %s3909_s21, 1 }
  0x15   : > { %p4776_p1 = scmp.eq.s32.totalorder %s4041_s24, 0  ;;  %p389_p2 = scmp.lt.s32.totalorder %s3909_s21, 3 }
  0x16   : > { %s3912_s26 = smov [#allocation10]   ;;  %s3913_s29 = smov [#allocation13]  }
  0x17   : > { %p4048_p3 = pnand %p2691_p0, %p389_p2  ;;  %s423_s27 = sshll.u32 %s3912_s26, 4  ;;  %s4055_s27 = int_to_ptr.vmem [resolvable:$true] %s423_s27 }
  0x18   : > { %s447_s30 = sshll.u32 %s3913_s29, 4  ;;  %s4792_s1 = sld [smem:[#allocation44_spill]]  ;;  %s4063_s30 = int_to_ptr.vmem [resolvable:$true] %s447_s30 }
  0x19   : > { %s4789_s25 = scalar_select %p4048_p3, 1, 0 }
  0x1a   : > { %p3077_p5 = pneg %p4048_p3 }
  0x1b   : > { %4790 = sst [smem:[#allocation42_spill]] %s4789_s25 }
  0x1c   : > { %p4059_p6 = pnand %p3077_p5, %p4776_p1 }
  0x1e   : > { %s3393_s22 = scalar_lea.hbm %s4792_s1, 16  ;;  %p4073_p8 = pneg %p4059_p6 }
  0x1f   : > { %p3394_p7 = scmp.ne.s32.totalorder %s4792_s1, %s3393_s22  ;;  %p3400_p11 = scmp.lt.u32.totalorder %s3393_s22, %s4792_s1 }
  0x21   : > { %p3396_p9 = pnand %p4073_p8, %p3394_p7 }
  0x23   : > { %p3397_p10 = pneg %p3396_p9 }
  0x25   : > { %p3402_p12 = pnand %p3400_p11, %p3397_p10 }
  0x27   : > { %3405 = shalt.err (!%p3402_p12)
}
  0x28   : > { %s3406_s15 = scalar_lea.vmem %s4046_s23, 16  ;;  %s3413_s25 = scalar_lea.vmem %s4046_s23, 32 }
  0x29   : > { %p3407_p13 = scmp.ne.s32.totalorder %s4046_s23, %s3406_s15  ;;  %p3414_p5 = scmp.lt.s32.totalorder %s4046_s23, %s4046_s23 }
  0x2a   : > { %p3415_p7 = scmp.lt.s32.totalorder %s3413_s25, %s3406_s15 }
  0x2b   : > { %p3409_p0 = pnand %p3407_p13, %p4073_p8 }
  0x2c   : > { %p3416_p9 = por %p3415_p7, %p3414_p5 }
  0x2d   : > { %p3410_p2 = pneg %p3409_p0 }
  0x2f   : > { %p3417_p4 = pnand %p3416_p9, %p3410_p2 }
  0x31   : > { %3420 = shalt.err (!%p3417_p4)
}
  0x32   : > { %3080 = dma.hbm_to_vmem [thread:$0]  (!%p4059_p6), %s4792_s1, 16, %s4046_s23, [#allocation8]  }
  0x33   : > { %s4794_s3 = sld [smem:[#allocation45_spill]] }
  0x39   : > { %s3421_s29 = scalar_lea.hbm %s4794_s3, 3072 }
  0x3a   : > { %p3422_p10 = scmp.ne.s32.totalorder %s4794_s3, %s3421_s29  ;;  %p3428_p4 = scmp.lt.u32.totalorder %s3421_s29, %s4794_s3 }
  0x3c   : > { %p3424_p11 = pnand %p3422_p10, %p4073_p8 }
  0x3e   : > { %p3425_p12 = pneg %p3424_p11 }
  0x40   : > { %p3430_p13 = pnand %p3428_p4, %p3425_p12 }
  0x42   : > { %3433 = shalt.err (!%p3430_p13)
}
  0x43   : > { %s3434_s23 = scalar_lea.vmem %s4055_s27, 3072  ;;  %p3442_p7 = scmp.lt.s32.totalorder %s4055_s27, %s4055_s27 }
  0x44   : > { %p3435_p0 = scmp.ne.s32.totalorder %s4055_s27, %s3434_s23  ;;  %p3443_p9 = scmp.lt.s32.totalorder %s3434_s23, %s3434_s23 }
  0x46   : > { %p3437_p2 = pnand %p3435_p0, %p4073_p8  ;;  %p3444_p10 = por %p3443_p9, %p3442_p7 }
  0x48   : > { %p3438_p5 = pneg %p3437_p2 }
  0x4a   : > { %p3445_p11 = pnand %p3444_p10, %p3438_p5 }
  0x4c   : > { %3448 = shalt.err (!%p3445_p11)
}
  0x4d   : > { %s3914_s18 = smov 192   ;;  %s3915_s24 = smov 12  }
  0x4e   : > { %3086 = dma.hbm_to_vmem [thread:$0]  (!%p4059_p6), %s4794_s3, 3072, %s4055_s27, [#allocation11], %s3914_s18, %s3914_s18, %s3915_s24  }
  0x4f   : > { %s3449_s29 = scalar_lea.hbm %s4757_s5, 1024 }
  0x50   : > { %p3450_p12 = scmp.ne.s32.totalorder %s4757_s5, %s3449_s29  ;;  %p3456_p0 = scmp.lt.u32.totalorder %s3449_s29, %s4757_s5 }
  0x52   : > { %p3452_p4 = pnand %p3450_p12, %p4073_p8 }
  0x54   : > { %p3453_p13 = pneg %p3452_p4 }
  0x56   : > { %p3458_p2 = pnand %p3456_p0, %p3453_p13 }
  0x58   : > { %3461 = shalt.err (!%p3458_p2)
}
  0x59   : > { %s3462_s27 = scalar_lea.vmem %s4063_s30, 1024  ;;  %p3470_p10 = scmp.lt.s32.totalorder %s4063_s30, %s4063_s30 }
  0x5a   : > { %p3463_p5 = scmp.ne.s32.totalorder %s4063_s30, %s3462_s27  ;;  %p3471_p11 = scmp.lt.s32.totalorder %s3462_s27, %s3462_s27 }
  0x5c   : > { %p3465_p7 = pnand %p3463_p5, %p4073_p8  ;;  %p3472_p12 = por %p3471_p11, %p3470_p10 }
  0x5e   : > { %p3466_p9 = pneg %p3465_p7 }
  0x60   : > { %p3473_p4 = pnand %p3472_p12, %p3466_p9 }
  0x62   : > { %3476 = shalt.err (!%p3473_p4)
}
  0x63   : > { %s4778_s18 = smov 64   ;;  %s3917_s1 = smov 4  }
  0x64   : > { %3092 = dma.hbm_to_vmem [thread:$0]  (!%p4059_p6), %s4757_s5, 1024, %s4063_s30, [#allocation14], %s4778_s18, %s4778_s18, %s3917_s1  }
  0x65   : > { %s3918_s16 = smov [#allocation16]   ;;  %s3919_s22 = smov [#allocation19]  }
  0x66   : > { %s472_s17 = sshll.u32 %s3918_s16, 4  ;;  %s494_s29 = sshll.u32 %s3919_s22, 4  ;;  %s473_s17 = int_to_ptr.vmem [resolvable:$true] %s472_s17  ;;  %s495_s29 = int_to_ptr.vmem [resolvable:$true] %s494_s29 }
  0x67   : > { %s3477_s23 = scalar_lea.hbm %s4759_s7, 16 }
  0x68   : > { %p3478_p13 = scmp.ne.s32.totalorder %s4759_s7, %s3477_s23  ;;  %p3484_p5 = scmp.lt.u32.totalorder %s3477_s23, %s4759_s7 }
  0x6a   : > { %p3480_p0 = pnand %p3478_p13, %p4073_p8 }
  0x6c   : > { %p3481_p2 = pneg %p3480_p0 }
  0x6e   : > { %p3486_p7 = pnand %p3484_p5, %p3481_p2 }
  0x70   : > { %3489 = shalt.err (!%p3486_p7)
}
  0x71   : > { %s3490_s30 = scalar_lea.vmem %s473_s17, 16  ;;  %s3497_s24 = scalar_lea.vmem %s473_s17, 32 }
  0x72   : > { %p3491_p9 = scmp.ne.s32.totalorder %s473_s17, %s3490_s30  ;;  %p3498_p12 = scmp.lt.s32.totalorder %s473_s17, %s473_s17 }
  0x73   : > { %p3499_p4 = scmp.lt.s32.totalorder %s3497_s24, %s3490_s30 }
  0x74   : > { %p3493_p10 = pnand %p3491_p9, %p4073_p8 }
  0x75   : > { %p3500_p1 = por %p3499_p4, %p3498_p12 }
  0x76   : > { %p3494_p11 = pneg %p3493_p10 }
  0x78   : > { %p3501_p3 = pnand %p3500_p1, %p3494_p11 }
  0x7a   : > { %3504 = shalt.err (!%p3501_p3)
}
  0x7b   : > { %3098 = dma.hbm_to_vmem [thread:$0]  (!%p4059_p6), %s4759_s7, 16, %s473_s17, [#allocation17]  }
  0x7c   : > { %s3505_s16 = scalar_lea.hbm %s4761_s9, 16 }
  0x7d   : > { %p3506_p13 = scmp.ne.s32.totalorder %s4761_s9, %s3505_s16  ;;  %p3512_p3 = scmp.lt.u32.totalorder %s3505_s16, %s4761_s9 }
  0x7f   : > { %p3508_p0 = pnand %p3506_p13, %p4073_p8 }
  0x81   : > { %p3509_p1 = pneg %p3508_p0 }
  0x83   : > { %p3514_p2 = pnand %p3512_p3, %p3509_p1 }
  0x85   : > { %3517 = shalt.err (!%p3514_p2)
}
  0x86   : > { %s3518_s27 = scalar_lea.vmem %s495_s29, 16  ;;  %s3525_s17 = scalar_lea.vmem %s495_s29, 32 }
  0x87   : > { %p3519_p5 = scmp.ne.s32.totalorder %s495_s29, %s3518_s27  ;;  %p3526_p10 = scmp.lt.s32.totalorder %s495_s29, %s495_s29 }
  0x88   : > { %p3527_p11 = scmp.lt.s32.totalorder %s3525_s17, %s3518_s27 }
  0x89   : > { %p3521_p7 = pnand %p3519_p5, %p4073_p8 }
  0x8a   : > { %p3528_p12 = por %p3527_p11, %p3526_p10 }
  0x8b   : > { %p3522_p9 = pneg %p3521_p7 }
  0x8d   : > { %p3529_p4 = pnand %p3528_p12, %p3522_p9 }
  0x8f   : > { %3532 = shalt.err (!%p3529_p4)
}
  0x90   : > { %3104 = dma.hbm_to_vmem [thread:$0]  (!%p4059_p6), %s4761_s9, 16, %s495_s29, [#allocation20]  }
  0x91   : > { %s3920_s3 = smov [#allocation22]   ;;  %s3921_s19 = smov [#allocation25]  }
  0x92   : > { %s518_s0 = sshll.u32 %s3920_s3, 4  ;;  %s542_s20 = sshll.u32 %s3921_s19, 4  ;;  %s519_s0 = int_to_ptr.vmem [resolvable:$true] %s518_s0  ;;  %s543_s20 = int_to_ptr.vmem [resolvable:$true] %s542_s20 }
  0x93   : > { %s3533_s15 = scalar_lea.hbm %s4763_s11, 64 }
  0x94   : > { %p3534_p13 = scmp.ne.s32.totalorder %s4763_s11, %s3533_s15  ;;  %p3540_p3 = scmp.lt.u32.totalorder %s3533_s15, %s4763_s11 }
  0x96   : > { %p3536_p0 = pnand %p3534_p13, %p4073_p8 }
  0x98   : > { %p3537_p1 = pneg %p3536_p0 }
  0x9a   : > { %p3542_p2 = pnand %p3540_p3, %p3537_p1 }
  0x9c   : > { %3545 = shalt.err (!%p3542_p2)
}
  0x9d   : > { %s3546_s29 = scalar_lea.vmem %s519_s0, 64  ;;  %p3554_p10 = scmp.lt.s32.totalorder %s519_s0, %s519_s0 }
  0x9e   : > { %p3547_p5 = scmp.ne.s32.totalorder %s519_s0, %s3546_s29  ;;  %p3555_p11 = scmp.lt.s32.totalorder %s3546_s29, %s3546_s29 }
  0xa0   : > { %p3549_p7 = pnand %p3547_p5, %p4073_p8  ;;  %p3556_p12 = por %p3555_p11, %p3554_p10 }
  0xa2   : > { %p3550_p9 = pneg %p3549_p7 }
  0xa4   : > { %p3557_p4 = pnand %p3556_p12, %p3550_p9 }
  0xa6   : > { %3560 = shalt.err (!%p3557_p4)
}
  0xa7   : > { %3110 = dma.hbm_to_vmem [thread:$0]  (!%p4059_p6), %s4763_s11, 64, %s519_s0, [#allocation23]  }
  0xa8   : > { %s3561_s16 = scalar_lea.hbm %s4765_s13, 16 }
  0xa9   : > { %p3562_p13 = scmp.ne.s32.totalorder %s4765_s13, %s3561_s16  ;;  %p3568_p3 = scmp.lt.u32.totalorder %s3561_s16, %s4765_s13 }
  0xab   : > { %p3564_p0 = pnand %p3562_p13, %p4073_p8 }
  0xad   : > { %p3565_p1 = pneg %p3564_p0 }
  0xaf   : > { %p3570_p2 = pnand %p3568_p3, %p3565_p1 }
  0xb1   : > { %3573 = shalt.err (!%p3570_p2)
}
  0xb2   : > { %s3574_s27 = scalar_lea.vmem %s543_s20, 16  ;;  %s3581_s0 = scalar_lea.vmem %s543_s20, 32 }
  0xb3   : > { %p3575_p5 = scmp.ne.s32.totalorder %s543_s20, %s3574_s27  ;;  %p3582_p10 = scmp.lt.s32.totalorder %s543_s20, %s543_s20 }
  0xb4   : > { %p3583_p11 = scmp.lt.s32.totalorder %s3581_s0, %s3574_s27 }
  0xb5   : > { %p3577_p7 = pnand %p3575_p5, %p4073_p8 }
  0xb6   : > { %p3584_p12 = por %p3583_p11, %p3582_p10 }
  0xb7   : > { %p3578_p9 = pneg %p3577_p7 }
  0xb9   : > { %p3585_p4 = pnand %p3584_p12, %p3578_p9 }
  0xbb   : > { %3588 = shalt.err (!%p3585_p4)
}
  0xbc   : > { %3116 = dma.hbm_to_vmem [thread:$0]  (!%p4059_p6), %s4765_s13, 16, %s543_s20, [#allocation26]  }
  0xbd   : > { %s3922_s30 = smov [#allocation9]   ;;  %s3923_s3 = smov [#allocation12]  }
  0xbe   : > { %s413_s24 = sshll.u32 %s3922_s30, 4  ;;  %s437_s19 = sshll.u32 %s3923_s3, 4  ;;  %s414_s24 = int_to_ptr.vmem [resolvable:$true] %s413_s24  ;;  %s438_s19 = int_to_ptr.vmem [resolvable:$true] %s437_s19 }
  0xbf   : > { %s3589_s15 = scalar_lea.hbm %s4754_s2, 16 }
  0xc0   : > { %p3590_p13 = scmp.ne.s32.totalorder %s4754_s2, %s3589_s15  ;;  %p3596_p3 = scmp.lt.u32.totalorder %s3589_s15, %s4754_s2 }
  0xc2   : > { %p3592_p0 = pnand %p3590_p13, %p4073_p8 }
  0xc4   : > { %p3593_p1 = pneg %p3592_p0 }
  0xc6   : > { %p3598_p2 = pnand %p3596_p3, %p3593_p1 }
  0xc8   : > { %3601 = shalt.err (!%p3598_p2)
}
  0xc9   : > { %s3602_s20 = scalar_lea.vmem %s414_s24, 16  ;;  %s3609_s17 = scalar_lea.vmem %s414_s24, 32 }
  0xca   : > { %p3603_p5 = scmp.ne.s32.totalorder %s414_s24, %s3602_s20  ;;  %p3610_p10 = scmp.lt.s32.totalorder %s414_s24, %s414_s24 }
  0xcb   : > { %p3611_p11 = scmp.lt.s32.totalorder %s3609_s17, %s3602_s20 }
  0xcc   : > { %p3605_p7 = pnand %p3603_p5, %p4073_p8 }
  0xcd   : > { %p3612_p12 = por %p3611_p11, %p3610_p10 }
  0xce   : > { %p3606_p9 = pneg %p3605_p7 }
  0xd0   : > { %p3613_p4 = pnand %p3612_p12, %p3606_p9 }
  0xd2   : > { %3616 = shalt.err (!%p3613_p4)
}
  0xd3   : > { %3083 = dma.hbm_to_vmem [thread:$0]  (!%p4059_p6), %s4754_s2, 16, %s414_s24, [#allocation8]  }
  0xd4   : > { %s3617_s22 = scalar_lea.hbm %s4756_s4, 48 }
  0xd5   : > { %p3618_p13 = scmp.ne.s32.totalorder %s4756_s4, %s3617_s22  ;;  %p3624_p3 = scmp.lt.u32.totalorder %s3617_s22, %s4756_s4 }
  0xd7   : > { %p3620_p0 = pnand %p3618_p13, %p4073_p8 }
  0xd9   : > { %p3621_p1 = pneg %p3620_p0 }
  0xdb   : > { %p3626_p2 = pnand %p3624_p3, %p3621_p1 }
  0xdd   : > { %3629 = shalt.err (!%p3626_p2)
}
  0xde   : > { %s3630_s0 = scalar_lea.vmem %s438_s19, 48  ;;  %s3637_s24 = scalar_lea.vmem %s438_s19, 64 }
  0xdf   : > { %p3631_p5 = scmp.ne.s32.totalorder %s438_s19, %s3630_s0  ;;  %p3638_p10 = scmp.lt.s32.totalorder %s438_s19, %s438_s19 }
  0xe0   : > { %p3639_p11 = scmp.lt.s32.totalorder %s3637_s24, %s3630_s0 }
  0xe1   : > { %p3633_p7 = pnand %p3631_p5, %p4073_p8 }
  0xe2   : > { %p3640_p12 = por %p3639_p11, %p3638_p10 }
  0xe3   : > { %p3634_p9 = pneg %p3633_p7 }
  0xe5   : > { %p3641_p4 = pnand %p3640_p12, %p3634_p9 }
  0xe7   : > { %3644 = shalt.err (!%p3641_p4)
}
  0xe8   : > { %3089 = dma.hbm_to_vmem [thread:$0]  (!%p4059_p6), %s4756_s4, 48, %s438_s19, [#allocation11]  }
  0xe9   : > { %s3924_s29 = smov [#allocation15]   ;;  %s3925_s3 = smov [#allocation18]  }
  0xea   : > { %s461_s30 = sshll.u32 %s3924_s29, 4  ;;  %s483_s16 = sshll.u32 %s3925_s3, 4  ;;  %s462_s30 = int_to_ptr.vmem [resolvable:$true] %s461_s30  ;;  %s484_s16 = int_to_ptr.vmem [resolvable:$true] %s483_s16 }
  0xeb   : > { %s3645_s25 = scalar_lea.hbm %s4758_s6, 16 }
  0xec   : > { %p3646_p13 = scmp.ne.s32.totalorder %s4758_s6, %s3645_s25  ;;  %p3652_p3 = scmp.lt.u32.totalorder %s3645_s25, %s4758_s6 }
  0xee   : > { %p3648_p0 = pnand %p3646_p13, %p4073_p8 }
  0xf0   : > { %p3649_p1 = pneg %p3648_p0 }
  0xf2   : > { %p3654_p2 = pnand %p3652_p3, %p3649_p1 }
  0xf4   : > { %3657 = shalt.err (!%p3654_p2)
}
  0xf5   : > { %s3658_s19 = scalar_lea.vmem %s462_s30, 16  ;;  %s3665_s20 = scalar_lea.vmem %s462_s30, 32 }
  0xf6   : > { %p3659_p5 = scmp.ne.s32.totalorder %s462_s30, %s3658_s19  ;;  %p3666_p10 = scmp.lt.s32.totalorder %s462_s30, %s462_s30 }
  0xf7   : > { %p3667_p11 = scmp.lt.s32.totalorder %s3665_s20, %s3658_s19 }
  0xf8   : > { %p3661_p7 = pnand %p3659_p5, %p4073_p8 }
  0xf9   : > { %p3668_p12 = por %p3667_p11, %p3666_p10 }
  0xfa   : > { %p3662_p9 = pneg %p3661_p7 }
  0xfc   : > { %p3669_p4 = pnand %p3668_p12, %p3662_p9 }
  0xfe   : > { %3672 = shalt.err (!%p3669_p4)
}
  0xff   : > { %3095 = dma.hbm_to_vmem [thread:$0]  (!%p4059_p6), %s4758_s6, 16, %s462_s30, [#allocation14]  }
 0x100   : > { %s3673_s15 = scalar_lea.hbm %s4760_s8, 16 }
 0x101   : > { %p3674_p13 = scmp.ne.s32.totalorder %s4760_s8, %s3673_s15  ;;  %p3680_p3 = scmp.lt.u32.totalorder %s3673_s15, %s4760_s8 }
 0x103   : > { %p3676_p0 = pnand %p3674_p13, %p4073_p8 }
 0x105   : > { %p3677_p1 = pneg %p3676_p0 }
 0x107   : > { %p3682_p2 = pnand %p3680_p3, %p3677_p1 }
 0x109   : > { %3685 = shalt.err (!%p3682_p2)
}
 0x10a   : > { %s3686_s24 = scalar_lea.vmem %s484_s16, 16  ;;  %s3693_s30 = scalar_lea.vmem %s484_s16, 32 }
 0x10b   : > { %p3687_p5 = scmp.ne.s32.totalorder %s484_s16, %s3686_s24  ;;  %p3694_p10 = scmp.lt.s32.totalorder %s484_s16, %s484_s16 }
 0x10c   : > { %p3695_p11 = scmp.lt.s32.totalorder %s3693_s30, %s3686_s24 }
 0x10d   : > { %p3689_p7 = pnand %p3687_p5, %p4073_p8 }
 0x10e   : > { %p3696_p12 = por %p3695_p11, %p3694_p10 }
 0x10f   : > { %p3690_p9 = pneg %p3689_p7 }
 0x111   : > { %p3697_p4 = pnand %p3696_p12, %p3690_p9 }
 0x113   : > { %3700 = shalt.err (!%p3697_p4)
}
 0x114   : > { %3101 = dma.hbm_to_vmem [thread:$0]  (!%p4059_p6), %s4760_s8, 16, %s484_s16, [#allocation17]  }
 0x115   : > { %s3926_s17 = smov [#allocation21]   ;;  %s3701_s15 = scalar_lea.hbm %s4762_s10, 4096 }
 0x116   : > { %s504_s29 = sshll.u32 %s3926_s17, 4  ;;  %p3702_p13 = scmp.ne.s32.totalorder %s4762_s10, %s3701_s15  ;;  %s505_s29 = int_to_ptr.vmem [resolvable:$true] %s504_s29 }
 0x117   : > { %p3708_p3 = scmp.lt.u32.totalorder %s3701_s15, %s4762_s10 }
 0x118   : > { %p3704_p0 = pnand %p3702_p13, %p4073_p8 }
 0x11a   : > { %p3705_p1 = pneg %p3704_p0 }
 0x11c   : > { %p3710_p2 = pnand %p3708_p3, %p3705_p1 }
 0x11e   : > { %3713 = shalt.err (!%p3710_p2)
}
 0x11f   : > { %s3714_s16 = scalar_lea.vmem %s505_s29, 4096  ;;  %p3722_p10 = scmp.lt.s32.totalorder %s505_s29, %s505_s29 }
 0x120   : > { %p3715_p5 = scmp.ne.s32.totalorder %s505_s29, %s3714_s16  ;;  %p3723_p11 = scmp.lt.s32.totalorder %s3714_s16, %s3714_s16 }
 0x122   : > { %p3717_p7 = pnand %p3715_p5, %p4073_p8  ;;  %p3724_p12 = por %p3723_p11, %p3722_p10 }
 0x124   : > { %p3718_p9 = pneg %p3717_p7 }
 0x126   : > { %p3725_p4 = pnand %p3724_p12, %p3718_p9 }
 0x128   : > { %3728 = shalt.err (!%p3725_p4)
}
 0x129   : > { %s3927_s24 = smov 256   ;;  %s3928_s30 = smov 16  }
 0x12a   : > { %3107 = dma.hbm_to_vmem [thread:$0]  (!%p4059_p6), %s4762_s10, 4096, %s505_s29, [#allocation20], %s3927_s24, %s3927_s24, %s3928_s30  }
 0x12b   : > { %s3929_s17 = smov [#allocation24]   ;;  %s3930_s22 = smov [#allocation27]  }
 0x12c   : > { %s528_s3 = sshll.u32 %s3929_s17, 4  ;;  %s553_s15 = sshll.u32 %s3930_s22, 4  ;;  %s529_s3 = int_to_ptr.vmem [resolvable:$true] %s528_s3  ;;  %s4306_s15 = int_to_ptr.vmem [resolvable:$true] %s553_s15 }
 0x12d   : > { %s3729_s27 = scalar_lea.hbm %s4764_s12, 4096 }
 0x12e   : > { %p3730_p13 = scmp.ne.s32.totalorder %s4764_s12, %s3729_s27  ;;  %p3736_p3 = scmp.lt.u32.totalorder %s3729_s27, %s4764_s12 }
 0x130   : > { %p3732_p0 = pnand %p3730_p13, %p4073_p8 }
 0x132   : > { %p3733_p1 = pneg %p3732_p0 }
 0x134   : > { %p3738_p2 = pnand %p3736_p3, %p3733_p1 }
 0x136   : > { %3741 = shalt.err (!%p3738_p2)
}
 0x137   : > { %s3742_s24 = scalar_lea.vmem %s529_s3, 4096  ;;  %p3750_p10 = scmp.lt.s32.totalorder %s529_s3, %s529_s3 }
 0x138   : > { %p3743_p5 = scmp.ne.s32.totalorder %s529_s3, %s3742_s24  ;;  %p3751_p11 = scmp.lt.s32.totalorder %s3742_s24, %s3742_s24 }
 0x13a   : > { %p3745_p7 = pnand %p3743_p5, %p4073_p8  ;;  %p3752_p12 = por %p3751_p11, %p3750_p10 }
 0x13c   : > { %p3746_p9 = pneg %p3745_p7 }
 0x13e   : > { %p3753_p4 = pnand %p3752_p12, %p3746_p9 }
 0x140   : > { %3756 = shalt.err (!%p3753_p4)
}
 0x141   : > { %3113 = dma.hbm_to_vmem [thread:$0]  (!%p4059_p6), %s4764_s12, 4096, %s529_s3, [#allocation23], %s4778_s18, %s4778_s18, %s3917_s1  }
 0x142   : > { %s3757_s25 = scalar_lea.hbm %s4766_s14, 16 }
 0x143   : > { %p3758_p13 = scmp.ne.s32.totalorder %s4766_s14, %s3757_s25  ;;  %p3764_p3 = scmp.lt.u32.totalorder %s3757_s25, %s4766_s14 }
 0x145   : > { %p3760_p0 = pnand %p3758_p13, %p4073_p8 }
 0x147   : > { %p3761_p1 = pneg %p3760_p0 }
 0x149   : > { %p3766_p2 = pnand %p3764_p3, %p3761_p1 }
 0x14b   : > { %3769 = shalt.err (!%p3766_p2)
}
 0x14c   : > { %s3770_s3 = scalar_lea.vmem %s4306_s15, 16  ;;  %s3777_s19 = scalar_lea.vmem %s4306_s15, 32 }
 0x14d   : > { %p3771_p5 = scmp.ne.s32.totalorder %s4306_s15, %s3770_s3  ;;  %p3778_p10 = scmp.lt.s32.totalorder %s4306_s15, %s4306_s15 }
 0x14e   : > { %p3779_p11 = scmp.lt.s32.totalorder %s3777_s19, %s3770_s3 }
 0x14f   : > { %p3773_p7 = pnand %p3771_p5, %p4073_p8 }
 0x150   : > { %p3780_p12 = por %p3779_p11, %p3778_p10 }
 0x151   : > { %p3774_p9 = pneg %p3773_p7 }
 0x153   : > { %p3781_p4 = pnand %p3780_p12, %p3774_p9 }
 0x155   : > { %3784 = shalt.err (!%p3781_p4)
}
 0x156   : > { %s4795_s30 = sld [smem:[#allocation40_spill]]  ;;  %s4796_s26 = sld [smem:[#allocation39_spill]] }
 0x157   : > { %s4797_s20 = sld [smem:[#allocation38_spill]]  ;;  %s4798_s17 = sld [smem:[#allocation41_spill]] }
 0x158   : > { %3119 = dma.hbm_to_vmem [thread:$0]  (!%p4059_p6), %s4766_s14, 16, %s4306_s15, [#allocation26]  }
 0x159   : > { %s2690_s28 = sadd.s32 4294967294, %s3909_s21   ;;  %s4355_s22 = sadd.s32 1, %s3909_s21  }
 0x15a   : > { %s42_s25 = ssub.s32 %s3909_s21, %s4355_s22  ;;  %p53_p0 = scmp.eq.s32.totalorder %s3909_s21, 0 }
 0x15b   : > { %p43_p8 = scmp.eq.s32.totalorder %s42_s25, 0  ;;  %p382_p7 = scmp.eq.s32.totalorder %s2690_s28, 1 }
 0x15c   : > { %s45_s23 = sadd.s32 1, %s4795_s30  ;;  %p52_p13 = scmp.ne.s32.totalorder %s4795_s30, %s4796_s26 }
 0x15d   : > { %p58_p1 = scmp.ne.s32.totalorder %s4796_s26, %s4797_s20  ;;  %p4800_p2 = scmp.eq.s32.totalorder %s4798_s17, 0 }
 0x15e   : > { %s4366_s27 = scalar_select %p43_p8, %s4795_s30, %s45_s23  }
 0x15f   : > { %p4368_p3 = por %p53_p0, %p52_p13  ;;  %p4374_p6 = por %p4800_p2, %p58_p1 }
 0x160   : > { %p376_p5 = scmp.eq.s32.totalorder %s4798_s17, 1  ;;  %p3142_p9 = scmp.lt.s32.totalorder %s3909_s21, 2 }
 0x161   : > { %s564_s16 = sand.u32 1, %s4795_s30   ;;  %p4385_p11 = por %p382_p7, %p58_p1 }
 0x162   : > { %p4381_p10 = por %p376_p5, %p52_p13  ;;  %s2707_s29 = sshll.u32 %s564_s16, 3 }
 0x163   : > { %s4803_s19 = scalar_select %p4385_p11, 1, 0 }
 0x164   : > { %s4802_s3 = scalar_select %p4381_p10, 1, 0 }
 0x165   : > { %s2838_s24 = sshll.u32 %s3909_s21, 7  ;;  %s4804_s25 = sld [smem:[#allocation43_spill]] }
 0x166   : > { %s568_s30 = scalar_lea.vmem [#allocation4], %s2707_s29  ;;  %p4399_p12 = pnand %p3142_p9, %p4368_p3 }
 0x167   : > { %s575_s17 = sshll.u32 %s568_s30, 4  ;;  %s4403_s18 = scalar_lea.sflag [#allocation5], %s564_s16  ;;  %s4395_s17 = int_to_ptr.vmem [resolvable:$true] %s575_s17 }
 0x168   : > { %p3787_p8 = pneg %p4399_p12 }
 0x16b   : > { %s4393_s23 = scalar_lea.hbm %s4804_s25, %s2838_s24  ;;  %s3790_s0 = scalar_lea.hbm %s4804_s25, 256 }
 0x16c   : > { %s3785_s26 = scalar_lea.hbm %s4393_s23, 128  ;;  %p3791_p1 = scmp.lt.u32.totalorder %s4393_s23, %s4804_s25 }
 0x16d   : > { %p3786_p4 = scmp.ne.s32.totalorder %s4393_s23, %s3785_s26  ;;  %p3792_p3 = scmp.lt.u32.totalorder %s3790_s0, %s3785_s26 }
 0x16e   : > { %p3794_p5 = scmp.lt.u32.totalorder %s3785_s26, %s4393_s23 }
 0x16f   : > { %p3788_p13 = pnand %p3787_p8, %p3786_p4  ;;  %p3793_p2 = por %p3792_p3, %p3791_p1 }
 0x171   : > { %p3789_p0 = pneg %p3788_p13  ;;  %p3795_p7 = por %p3794_p5, %p3793_p2 }
 0x173   : > { %p3796_p9 = pnand %p3795_p7, %p3789_p0 }
 0x175   : > { %3799 = shalt.err (!%p3796_p9)
}
 0x176   : > { %s3800_s16 = scalar_lea.vmem %s4395_s17, 128  ;;  %s3931_s29 = smov [#allocation4]  }
 0x177   : > { %p3801_p4 = scmp.ne.s32.totalorder %s4395_s17, %s3800_s16  ;;  %s3805_s24 = sshll.u32 %s3931_s29, 4  ;;  %s3806_s24 = int_to_ptr.vmem [resolvable:$false] %s3805_s24 }
 0x178   : > { %s3807_s20 = scalar_lea.vmem %s3806_s24, 256  ;;  %p3808_p10 = scmp.lt.s32.totalorder %s4395_s17, %s3806_s24 }
 0x179   : > { %p3803_p13 = pnand %p3801_p4, %p3787_p8  ;;  %p3809_p1 = scmp.lt.s32.totalorder %s3807_s20, %s3800_s16 }
 0x17b   : > { %p3804_p11 = pneg %p3803_p13  ;;  %p3810_p3 = por %p3809_p1, %p3808_p10 }
 0x17d   : > { %p3811_p2 = pnand %p3810_p3, %p3804_p11 }
 0x17f   : > { %3814 = shalt.err (!%p3811_p2)
}
 0x180   : > { %s4806_s26 = smov 64   ;;  %s4807_s0 = sld [smem:[#allocation42_spill]] }
 0x181   : > { %3123 = dma.hbm_to_vmem [thread:$0]  (!%p4399_p12), %s4393_s23, 128, %s4395_s17, %s4403_s18, %s4806_s26, %s4806_s26, %s3917_s1  }
 0x186   : > { %p4808_p8 = scmp.ne.s32.totalorder %s4807_s0, 0 }
 0x187   : > { %s4809_s30 = sld [smem:[#allocation39_spill]] (!%p4808_p8) }
 0x188   : > { %587 = sbr.rel (%p4808_p8) target bundleno = 3445 (0xd75), region = 80 }
 0x18d   : > { %s4437_s29 = sand.u32 (!%p4808_p8), 1, %s4809_s30  }
 0x18e   : > { %s2711_s16 = sshll.u32 (!%p4808_p8), %s4437_s29, 3  ;;  %s590_s24 = scalar_lea.sflag (!%p4808_p8), [#allocation5], %s4437_s29 }
 0x18f   : > { %s593_s28 = scalar_lea.vmem [#allocation4], %s2711_s16 }
 0x190   : > { %3860 = dma.done.wait (%p4374_p6), %s590_s24, 128  }
 0x191   : > { %3862 = vsyncadd (%p4374_p6), %s590_s24, 4294967168  ;;  %s4810_s18 = sld [smem:[#allocation41_spill]] }
 0x197   : > { %p4811_p10 = scmp.eq.s32.totalorder %s4810_s18, 0 }
 0x199   : > { %3864 = dma.done.wait (%p4811_p10), [#allocation8], 32   ;;  %p4812_p11 = pmov %p4811_p10 }
 0x19a   : > { %p4813_p12 = pmov %p4811_p10 }
 0x19b   : > { %3866 = vsyncadd (%p4812_p11), [#allocation8], 4294967264 }
 0x19c   : > { %3868 = dma.done.wait (%p4813_p12), [#allocation11], 3120   ;;  %p4814_p0 = pmov %p4811_p10 }
 0x19e   : > { %3870 = vsyncadd (%p4814_p0), [#allocation11], 4294964176  ;;  %p4815_p5 = pmov %p4814_p0 }
 0x19f   : > { %p4816_p7 = pmov %p4814_p0 }
 0x1a0   : > { %3872 = dma.done.wait (%p4815_p5), [#allocation14], 1040  }
 0x1a1   : > { %3874 = vsyncadd (%p4816_p7), [#allocation14], 4294966256  ;;  %p4817_p6 = pmov %p4814_p0 }
 0x1a2   : > { %p4818_p9 = pmov %p4814_p0 }
 0x1a3   : > { %3876 = dma.done.wait (%p4817_p6), [#allocation17], 32  }
 0x1a4   : > { %3878 = vsyncadd (%p4818_p9), [#allocation17], 4294967264  ;;  %p4819_p4 = pmov %p4814_p0 }
 0x1a5   : > { %p4820_p13 = pmov %p4814_p0 }
 0x1a6   : > { %3880 = dma.done.wait (%p4819_p4), [#allocation20], 4112  }
 0x1a7   : > { %3882 = vsyncadd (%p4820_p13), [#allocation20], 4294963184  ;;  %p4821_p1 = pmov %p4814_p0 }
 0x1a8   : > { %p4822_p3 = pmov %p4814_p0 }
 0x1a9   : > { %3884 = dma.done.wait (%p4821_p1), [#allocation23], 4160  }
 0x1aa   : > { %3886 = vsyncadd (%p4822_p3), [#allocation23], 4294963136  ;;  %p4823_p2 = pmov %p4814_p0 }
 0x1ab   : > { %p4824_p8 = pmov %p4814_p0 }
 0x1ac   : > { %3888 = dma.done.wait (%p4823_p2), [#allocation26], 32  }
 0x1ad   : > { %3890 = vsyncadd (%p4824_p8), [#allocation26], 4294967264  ;;  %v2843_v0 = vld [vmem:[%s593_s28] sm:$0xff]   ;;  %v3932_v5 = vmov 0.0   ;;  %v3221_v7 = vld [vmem:[#allocation10 + $0x1c] ss:$12 sps:$4 sm:$0xff]   ;;  %v728_v41 = vlaneseq }
 0x1ae   : > { %v4475_v1 = vunpack.c.l.bf16 %v2843_v0  ;;  %v4478_v2 = vunpack.c.h.bf16 %v2843_v0  ;;  %v3217_v3 = vld [vmem:[#allocation10 + $0x4] ss:$12 sps:$4 sm:$0xff]   ;;  %v3219_v4 = vld [vmem:[#allocation10] ss:$12 sps:$4 sm:$0xff]   ;;  %2929 = vmatprep.subr.bf16.mxu1 %v3932_v5  ;;  %v3220_v6 = vld [vmem:[#allocation10 + $0x8] ss:$12 sps:$4 sm:$0xff]  }
 0x1af   : > { %931 = vmatprep.subr.bf16.mxu0 %v3217_v3  ;;  %2930 = vmatpush3.bf16.msra.mxu1 %v3220_v6  ;;  %v3223_v16 = vld [vmem:[#allocation10 + $0x18] ss:$12 sps:$4 sm:$0xff]   ;;  %v3224_v17 = vld [vmem:[#allocation10 + $0x20] ss:$12 sps:$4 sm:$0xff]   ;;  %v3227_v19 = vld [vmem:[#allocation10 + $0x30] ss:$12 sps:$4 sm:$0xff]  }
 0x1b0   : > { %705 = vadd.xlane.f32.xlu0 %v4475_v1  ;;  %932 = vmatpush1.bf16.msra.mxu0 %v3219_v4  ;;  %v3225_v18 = vld [vmem:[#allocation10 + $0x34] ss:$12 sps:$4 sm:$0xff]   ;;  %v3228_v20 = vld [vmem:[#allocation10 + $0x38] ss:$12 sps:$4 sm:$0xff]   ;;  %v3232_v23 = vld [vmem:[#allocation10 + $0x50] ss:$12 sps:$4 sm:$0xff]  }
 0x1b1   : > { %933 = vmatprep.subr.bf16.mxu0 %v3221_v7  ;;  %2931 = vmatprep.subr.bf16.mxu1 %v3932_v5  ;;  %v3229_v21 = vld [vmem:[#allocation10 + $0x4c] ss:$12 sps:$4 sm:$0xff]   ;;  %v3231_v22 = vld [vmem:[#allocation10 + $0x48] ss:$12 sps:$4 sm:$0xff]   ;;  %v3233_v24 = vld [vmem:[#allocation10 + $0x64] ss:$12 sps:$4 sm:$0xff]  }
 0x1b2   : > { %v3235_v25 = vld [vmem:[#allocation10 + $0x60] ss:$12 sps:$4 sm:$0xff]   ;;  %v3236_v26 = vld [vmem:[#allocation10 + $0x68] ss:$12 sps:$4 sm:$0xff]   ;;  %v3239_v28 = vld [vmem:[#allocation10 + $0x78] ss:$12 sps:$4 sm:$0xff]  }
 0x1b3   : > { %2932 = vmatpush3.bf16.msra.mxu1 %v3224_v17  ;;  %v3237_v27 = vld [vmem:[#allocation10 + $0x7c] ss:$12 sps:$4 sm:$0xff]   ;;  %v3240_v29 = vld [vmem:[#allocation10 + $0x80] ss:$12 sps:$4 sm:$0xff]   ;;  %v3933_v31 = vmov 0   ;;  %vm3934_vm0 = vmmov 0  }
 0x1b4   : > { %707 = vadd.xlane.f32.xlu0 %v4478_v2  ;;  %934 = vmatpush1.bf16.msra.mxu0 %v3223_v16  ;;  %v3241_v30 = vld [vmem:[#allocation10 + $0x94] ss:$12 sps:$4 sm:$0xff]   ;;  %v3243_v32 = vld [vmem:[#allocation10 + $0x90] ss:$12 sps:$4 sm:$0xff]   ;;  %v3244_v33 = vld [vmem:[#allocation10 + $0x98] ss:$12 sps:$4 sm:$0xff]  }
 0x1b5   : > { %2933 = vmatprep.subr.bf16.mxu1 %v3932_v5  ;;  %935 = vmatprep.subr.bf16.mxu0 %v3225_v18  ;;  %v3245_v34 = vld [vmem:[#allocation10 + $0xac] ss:$12 sps:$4 sm:$0xff]   ;;  %v3247_v35 = vld [vmem:[#allocation10 + $0xa8] ss:$12 sps:$4 sm:$0xff]   ;;  %v3248_v36 = vld [vmem:[#allocation10 + $0xb0] ss:$12 sps:$4 sm:$0xff]  }
 0x1b6   : > { %963 = vmatprep.mubr.bf16.mxu0 %v3933_v31  ;;  %2945 = vmatprep.mubr.msk.bf16.mxu1 %vm3934_vm0, %v3932_v5  ;;  %v4504_v44 = vshrl.u32 %v728_v41, 7  ;;  %v701_v45 = vld [vmem:[#allocation7] sm:$0x1]  ;;  %v702_v48 = vld [vmem:[#allocation9] sm:$0x1]  ;;  %vm1024_vm1 = vcmask 261120  }
 0x1b7   : > { %2934 = vmatpush3.bf16.msra.mxu1 %v3228_v20  ;;  %v703_v46 = vunpack.c.l.bf16 %v701_v45  ;;  %v704_v50 = vunpack.c.l.bf16 %v702_v48  ;;  %v773_v61 = vld [vmem:[#allocation12] sm:$0x7]  ;;  %vm1074_vm2 = vcmask 130048   ;;  %s3935_s1 = smov 96   ;;  %s4780_s15 = smov 64   ;;  %vm1278_vm3 = vcmask 523520  }
 0x1b8   : > { %936 = vmatpush1.bf16.msra.mxu0 %v3227_v19  ;;  %2935 = vmatprep.subr.bf16.mxu1 %v3932_v5  ;;  %v4507_v47 = vsub.s32 0, %v4504_v44  ;;  %v774_v62 = vunpack.c.l.bf16 %v773_v61  ;;  %v786_v63 = vsub.s32 4, %v4504_v44  ;;  %v782_v0 = vsub.s32 2, %v4504_v44  ;;  %s3937_s23 = smov 32   ;;  %s2841_s17 = sshll.u32 %s4810_s18, 7 }
 0x1b9   : > { %937 = vmatprep.subr.bf16.mxu0 %v3229_v21  ;;  %vm1414_vm4 = vcmask 785920   ;;  %vm1550_vm5 = vcmask 1048320   ;;  %s695_s20 = scalar_lea.vmem [#allocation28], %s2711_s16  ;;  %s4825_s24 = sld [smem:[#allocation46_spill]] }
 0x1ba   : > { %v731_v52 = vrot.slane %v703_v46, %v4507_v47  ;;  %v737_v56 = vrot.slane %v704_v50, %v4507_v47  ;;  %v779_v3 = vrot.slane %v774_v62, %v4507_v47  ;;  %v787_v4 = vrot.slane %v774_v62, %v786_v63  ;;  %s2484_s26 = sshll.u32 %s695_s20, 4  ;;  %s2471_s18 = scalar_lea.sflag [#allocation6], %s4437_s29  ;;  %s4706_s26 = int_to_ptr.vmem [resolvable:$true] %s2484_s26 }
 0x1bb   : > { %2936 = vmatpush3.bf16.msra.mxu1 %v3232_v23  ;;  %v783_v6 = vrot.slane %v774_v62, %v782_v0  ;;  %p4826_p11 = scmp.ne.s32.totalorder %s4802_s3, 0  ;;  %s3938_s16 = smov [#allocation28]  }
 0x1bc   : > { %938 = vmatpush1.bf16.msra.mxu0 %v3231_v22  ;;  %2937 = vmatprep.subr.bf16.mxu1 %v3932_v5  ;;  %v794_v7 = vrot.slane %v779_v3, %v4507_v47 }
 0x1bd   : > { %939 = vmatprep.subr.bf16.mxu0 %v3233_v24 }
 0x1bf   : > { %2938 = vmatpush3.bf16.msra.mxu1 %v3236_v26  ;;  %s4704_s28 = scalar_lea.hbm %s4825_s24, %s2841_s17 }
 0x1c0   : > { %940 = vmatpush1.bf16.msra.mxu0 %v3235_v25  ;;  %2939 = vmatprep.subr.bf16.mxu1 %v3932_v5 }
 0x1c1   : > { %941 = vmatprep.subr.bf16.mxu0 %v3237_v27 }
 0x1c3   : > { %2940 = vmatpush3.bf16.msra.mxu1 %v3240_v29 }
 0x1c4   : > { %942 = vmatpush1.bf16.msra.mxu0 %v3239_v28  ;;  %2941 = vmatprep.subr.bf16.mxu1 %v3932_v5 }
 0x1c5   : > { %943 = vmatprep.subr.bf16.mxu0 %v3241_v30 }
 0x1c7   : > { %2942 = vmatpush3.bf16.msra.mxu1 %v3244_v33 }
 0x1c8   : > { %944 = vmatpush1.bf16.msra.mxu0 %v3243_v32  ;;  %2943 = vmatprep.subr.bf16.mxu1 %v3932_v5 }
 0x1c9   : > { %945 = vmatprep.subr.bf16.mxu0 %v3245_v34 }
 0x1cb   : > { %2944 = vmatpush3.bf16.msra.mxu1 %v3248_v36 }
 0x1cc   : > { %946 = vmatpush1.bf16.msra.mxu0 %v3247_v35  ;;  %2949 = vmatprep.subr.bf16.mxu1 %v3932_v5 }
 0x1cd   : > { %2973 = vmatprep.subr.bf16.mxu0 %v3932_v5 }
 0x23d   : > { %v706_v8 = vpop.xlane.xlu0 %705 }
 0x23e   : > { %v710_v9 = vmul.f32 0.0078125, %v706_v8  ;;  %v802_v8 = vrot.slane %v787_v4, %v4507_v47 }
 0x240   : > { %v4484_v10 = vsub.f32 %v4475_v1, %v710_v9 }
 0x241   : > { %v708_v11 = vpop.xlane.xlu0 %707 }
 0x242   : > { %v711_v12 = vmul.f32 0.0078125, %v708_v11  ;;  %v714_v13 = vmul.f32 %v4484_v10, %v4484_v10  ;;  %v798_v11 = vrot.slane %v783_v6, %v4507_v47 }
 0x244   : > { %v4489_v14 = vsub.f32 %v4478_v2, %v711_v12  ;;  %716 = vadd.xlane.f32.xlu1 %v714_v13 }
 0x246   : > { %v715_v15 = vmul.f32 %v4489_v14, %v4489_v14 }
 0x248   : > { %718 = vadd.xlane.f32.xlu1 %v715_v15 }
 0x2d1   : > { %v717_v37 = vpop.xlane.xlu1 %716 }
 0x2d2   : > { %v720_v38 = vmul.f32 0.0078125, %v717_v37 }
 0x2d4   : > { %v722_v39 = vadd.f32 1e-05, %v720_v38 }
 0x2d5   : > { %v719_v40 = vpop.xlane.xlu1 %718 }
 0x2d6   : > { %3337 = vrsqrt.f32 %v722_v39  ;;  %v721_v42 = vmul.f32 0.0078125, %v719_v40 }
 0x2d8   : > { %v723_v43 = vadd.f32 1e-05, %v721_v42 }
 0x2da   : > { %3339 = vrsqrt.f32 %v723_v43 }
 0x2e0   : > { %v3338_v49 = vpop.eup %3337 }
 0x2e1   : > { %v726_v51 = vmul.f32 %v3338_v49, %v4484_v10 }
 0x2e3   : > { %v732_v55 = vmul.f32 %v731_v52, %v726_v51 }
 0x2e4   : > { %v3340_v53 = vpop.eup %3339 }
 0x2e5   : > { %v727_v54 = vmul.f32 %v3340_v53, %v4489_v14  ;;  %v738_v58 = vadd.f32 %v737_v56, %v732_v55 }
 0x2e7   : > { %v733_v57 = vmul.f32 %v731_v52, %v727_v54 }
 0x2e9   : > { %v739_v59 = vadd.f32 %v737_v56, %v733_v57 }
 0x2eb   : > { %v740_v60 = vpack.c.bf16 %v739_v59, %v738_v58 }
 0x2ed   : > { %964 = vmatmul.mubr.bf16.vlgmr.msra.gmra.mrb[0].mxu0 %v740_v60  ;;  %2946 = vmatmul.mubr.bf16.vlgmr.msra.gmra.mrb[0].mxu1 %v740_v60 }
 0x2ee   : > { %2951 = vmatprep.mubr.msk.bf16.mxu1 %vm3934_vm0, %v3932_v5  ;;  %2975 = vmatprep.mubr.msk.bf16.mxu0 %vm3934_vm0, %v3932_v5 }
 0x3c0   : > { %v965_v9 = vpop.f32.mrb[0].mxu0  ;;  %v1008_v10 = vpop.f32.mrb[0].mxu1 }
 0x3c1   : > { %v967_v12 = vpop.f32.mrb[1].mxu0  ;;  %v2947_v13 = vpop.f32.mrb[1].mxu1  ;;  %v966_v16 = vadd.f32 %v965_v9, %v794_v7  ;;  %v1009_v17 = vadd.f32 %v1008_v10, %v802_v8 }
 0x3c2   : > { %v969_v14 = vpop.f32.mrb[2].mxu0  ;;  %v1011_v15 = vpop.f32.mrb[2].mxu1  ;;  %v968_v22 = vadd.f32 %v967_v12, %v798_v11 }
 0x3c3   : > { %v970_v18 = vadd.f32 %v969_v14, %v794_v7  ;;  %v1012_v19 = vadd.f32 %v1011_v15, %v802_v8  ;;  %v971_v20 = vpop.f32.mrb[3].mxu0  ;;  %v2948_v21 = vpop.f32.mrb[3].mxu1 }
 0x3c4   : > { %v972_v23 = vadd.f32 %v971_v20, %v798_v11 }
 0x3c5   : > { %v1015_v24 = vpack.c.bf16 %v970_v18, %v966_v16  ;;  %v4527_v25 = vpack.c.bf16 %v1012_v19, %v1009_v17 }
 0x3c6   : > { %v1016_v26 = vpack.c.bf16 %v972_v23, %v968_v22 }
 0x3c8   : > { %v1029_v27 = vsel %vm1024_vm1, %v1016_v26, 0 }
 0x3c9   : > { %2950 = vmatpush3.bf16.xpose.msra.mxu1 %v1029_v27 }
 0x3ca   : > { %2955 = vmatprep.subr.bf16.mxu1 %v3932_v5 }
 0x3d0   : > { %2952 = vmatmul.mubr.msk.bf16.vlgmr.msra.gmra.mrb[4].mxu1 %vm1024_vm1, %v1015_v24 }
 0x3d1   : > { %2956 = vmatpush3.bf16.msra.mxu1 %v4527_v25  ;;  %2957 = vmatprep.mubr.msk.bf16.mxu1 %vm3934_vm0, %v3932_v5 }
 0x3d2   : > { %2961 = vmatprep.subr.bf16.mxu1 %v3932_v5 }
 0x4a3   : > { %v1065_v28 = vpop.f32.mrb[4].mxu1 }
 0x4a4   : > { %v1072_v29 = vmul.f32 0.17677669, %v1065_v28  ;;  %v2953_v30 = vpop.f32.mrb[5].mxu1 }
 0x4a5   : > { %v1068_v32 = vpop.f32.mrb[6].mxu1 }
 0x4a6   : > { %v1073_v33 = vmul.f32 0.17677669, %v1068_v32  ;;  %v2954_v34 = vpop.f32.mrb[7].mxu1  ;;  %v1075_v35 = vsel %vm1074_vm2, %v1072_v29, -inf }
 0x4a7   : > { %1076 = vmax.xlane.f32.xlu0 %v1075_v35 }
 0x4a8   : > { %v1078_v36 = vsel %vm1074_vm2, %v1073_v33, -inf }
 0x4a9   : > { %1079 = vmax.xlane.f32.xlu1 %v1078_v36 }
 0x534   : > { %v1077_v37 = vpop.xlane.xlu0 %1076 }
 0x535   : > { %v1081_v38 = vsub.f32 %v1072_v29, %v1077_v37 }
 0x536   : > { %v1080_v39 = vpop.xlane.xlu1 %1079 }
 0x537   : > { %v1083_v40 = vmul.f32 1.442695, %v1081_v38  ;;  %v1082_v41 = vsub.f32 %v1073_v33, %v1080_v39 }
 0x539   : > { %3341 = vpow2.f32 %v1083_v40  ;;  %v1085_v42 = vmul.f32 1.442695, %v1082_v41 }
 0x53b   : > { %3343 = vpow2.f32 %v1085_v42 }
 0x543   : > { %v3342_v43 = vpop.eup %3341 }
 0x544   : > { %v1087_v45 = vsel %vm1074_vm2, %v3342_v43, 0.0 }
 0x545   : > { %v3344_v46 = vpop.eup %3343  ;;  %1088 = vadd.xlane.f32.xlu0 %v1087_v45 }
 0x546   : > { %v1090_v48 = vsel %vm1074_vm2, %v3344_v46, 0.0 }
 0x547   : > { %1091 = vadd.xlane.f32.xlu1 %v1090_v48 }
 0x558   : > { %1148 = vrot.lane.b32.xlu1 %v1015_v24, %s3935_s1 }
 0x55b   : > { %1151 = vrot.lane.b32.xlu0 %v1016_v26, %s3935_s1 }
 0x55c   : > { %1287 = vrot.lane.b32.xlu1 %v1016_v26, %s4780_s15 }
 0x55f   : > { %1423 = vrot.lane.b32.xlu0 %v1016_v26, %s3937_s23 }
 0x560   : > { %1284 = vrot.lane.b32.xlu1 %v1015_v24, %s4780_s15 }
 0x564   : > { %1420 = vrot.lane.b32.xlu1 %v1015_v24, %s3937_s23 }
 0x5d2   : > { %v1089_v49 = vpop.xlane.xlu0 %1088 }
 0x5d3   : > { %3345 = vrcp.f32 %v1089_v49 }
 0x5d4   : > { %v1092_v50 = vpop.xlane.xlu1 %1091 }
 0x5d5   : > { %3347 = vrcp.f32 %v1092_v50 }
 0x5d6   : > { %v1152_v52 = vpop.permute.xlu0 %1151 }
 0x5d7   : > { %v1157_v61 = vsel %vm1024_vm1, %v1152_v52, 0 }
 0x5d8   : > { %v1149_v51 = vpop.permute.xlu1 %1148 }
 0x5da   : > { %v1424_v59 = vpop.permute.xlu0 %1423 }
 0x5db   : > { %v1429_v3 = vsel %vm1024_vm1, %v1424_v59, 0 }
 0x5dc   : > { %v1288_v53 = vpop.permute.xlu1 %1287 }
 0x5dd   : > { %v3346_v54 = vpop.eup %3345  ;;  %v1293_v55 = vsel %vm1024_vm1, %v1288_v53, 0 }
 0x5de   : > { %2974 = vmatpush3.bf16.xpose.msra.mxu0 %v1293_v55  ;;  %v1094_v57 = vmul.f32 %v3346_v54, %v3342_v43 }
 0x5df   : > { %v3348_v56 = vpop.eup %3347  ;;  %2985 = vmatprep.subr.bf16.mxu0 %v3932_v5 }
 0x5e0   : > { %v1096_v58 = vmul.f32 %v3348_v56, %v3344_v46  ;;  %v1285_v62 = vpop.permute.xlu1 %1284 }
 0x5e2   : > { %v1097_v60 = vpack.c.bf16 %v1096_v58, %v1094_v57 }
 0x5e4   : > { %2958 = vmatmul.mubr.msk.bf16.vlgmr.msra.gmra.mrb[8].mxu1 %vm1074_vm2, %v1097_v60  ;;  %v1421_v4 = vpop.permute.xlu1 %1420 }
 0x5e5   : > { %2962 = vmatpush3.bf16.xpose.msra.mxu1 %v1157_v61  ;;  %2976 = vmatmul.mubr.msk.bf16.vlgmr.msra.gmra.mrb[4].mxu0 %vm1024_vm1, %v1285_v62 }
 0x5e6   : > { %2986 = vmatpush3.bf16.xpose.msra.mxu0 %v1429_v3  ;;  %2963 = vmatprep.mubr.msk.bf16.mxu1 %vm3934_vm0, %v3932_v5 }
 0x5e7   : > { %2987 = vmatprep.mubr.msk.bf16.mxu0 %vm3934_vm0, %v3932_v5  ;;  %2967 = vmatprep.subr.bf16.mxu1 %v3932_v5 }
 0x5e8   : > { %2997 = vmatprep.subr.bf16.mxu0 %v3932_v5 }
 0x5ec   : > { %2964 = vmatmul.mubr.msk.bf16.vlgmr.msra.gmra.mrb[12].mxu1 %vm1024_vm1, %v1149_v51 }
 0x5ed   : > { %2988 = vmatmul.mubr.msk.bf16.vlgmr.msra.gmra.mrb[8].mxu0 %vm1024_vm1, %v1421_v4  ;;  %2969 = vmatprep.mubr.msk.bf16.mxu1 %vm3934_vm0, %v3932_v5 }
 0x5ee   : > { %3013 = vmatprep.mubr.msk.bf16.mxu0 %vm3934_vm0, %v3932_v5 }
 0x6b7   : > { %v1135_v6 = vpop.f32.mrb[8].mxu1 }
 0x6b8   : > { %v2959_v7 = vpop.f32.mrb[9].mxu1  ;;  %v1329_v8 = vpop.f32.mrb[4].mxu0 }
 0x6b9   : > { %v1138_v9 = vpop.f32.mrb[10].mxu1  ;;  %v2977_v10 = vpop.f32.mrb[5].mxu0  ;;  %v1336_v19 = vmul.f32 0.17677669, %v1329_v8 }
 0x6ba   : > { %v1142_v11 = vpack.c.bf16 %v1138_v9, %v1135_v6  ;;  %v2960_v12 = vpop.f32.mrb[11].mxu1  ;;  %v1332_v13 = vpop.f32.mrb[6].mxu0 }
 0x6bb   : > { %v2978_v14 = vpop.f32.mrb[7].mxu0  ;;  %v1337_v30 = vmul.f32 0.17677669, %v1332_v13  ;;  %v1338_v32 = vsel %vm1074_vm2, %v1336_v19, -inf }
 0x6bc   : > { %1143 = vst.msk [vmem:[#allocation3] sm:$0xff] %vm1024_vm1, %v1142_v11 }
 0x6bd   : > { %v1341_v35 = vsel %vm1074_vm2, %v1337_v30, -inf }
 0x6bf   : > { %v1193_v15 = vpop.f32.mrb[12].mxu1 }
 0x6c0   : > { %v1200_v16 = vmul.f32 0.17677669, %v1193_v15  ;;  %v2965_v17 = vpop.f32.mrb[13].mxu1  ;;  %v1465_v18 = vpop.f32.mrb[8].mxu0 }
 0x6c1   : > { %v1196_v20 = vpop.f32.mrb[14].mxu1  ;;  %v2989_v21 = vpop.f32.mrb[9].mxu0  ;;  %v1472_v34 = vmul.f32 0.17677669, %v1465_v18 }
 0x6c2   : > { %v1201_v22 = vmul.f32 0.17677669, %v1196_v20  ;;  %v2966_v23 = vpop.f32.mrb[15].mxu1  ;;  %v1468_v24 = vpop.f32.mrb[10].mxu0  ;;  %v1202_v26 = vsel %vm1074_vm2, %v1200_v16, -inf }
 0x6c3   : > { %v2990_v27 = vpop.f32.mrb[11].mxu0  ;;  %1203 = vmax.xlane.f32.xlu0 %v1202_v26  ;;  %v1473_v28 = vmul.f32 0.17677669, %v1468_v24  ;;  %v1474_v36 = vsel %vm1074_vm2, %v1472_v34, -inf }
 0x6c4   : > { %v1205_v29 = vsel %vm1074_vm2, %v1201_v22, -inf }
 0x6c5   : > { %1206 = vmax.xlane.f32.xlu1 %v1205_v29  ;;  %v1477_v33 = vsel %vm1074_vm2, %v1473_v28, -inf }
 0x6c7   : > { %1339 = vmax.xlane.f32.xlu0 %v1338_v32 }
 0x6c9   : > { %1478 = vmax.xlane.f32.xlu1 %v1477_v33 }
 0x6cb   : > { %1342 = vmax.xlane.f32.xlu0 %v1341_v35  ;;  %v3249_v35 = vld [vmem:[#allocation13] sm:$0xff]  }
 0x6cc   : > { %2998 = vmatpush3.bf16.msra.mxu0 %v3249_v35  ;;  %v3274_v35 = vld [vmem:[#allocation21 + $0x4c] ss:$16 sps:$4 sm:$0xff]  }
 0x6cd   : > { %2999 = vmatprep.subr.bf16.mxu0 %v3932_v5 }
 0x6cf   : > { %1475 = vmax.xlane.f32.xlu0 %v1474_v36  ;;  %v3250_v36 = vld [vmem:[#allocation13 + $0x8] sm:$0xff]  }
 0x6d0   : > { %3000 = vmatpush3.bf16.msra.mxu0 %v3250_v36  ;;  %v3269_v36 = vld [vmem:[#allocation21 + $0x40] ss:$16 sps:$4 sm:$0xff]  }
 0x6d1   : > { %3001 = vmatprep.subr.bf16.mxu0 %v3932_v5 }
 0x750   : > { %v1204_v37 = vpop.xlane.xlu0 %1203 }
 0x751   : > { %v1208_v48 = vsub.f32 %v1200_v16, %v1204_v37  ;;  %v3251_v37 = vld [vmem:[#allocation13 + $0x10] sm:$0xff]  }
 0x752   : > { %v1207_v38 = vpop.xlane.xlu1 %1206  ;;  %3002 = vmatpush3.bf16.msra.mxu0 %v3251_v37  ;;  %v3272_v37 = vld [vmem:[#allocation21 + $0x48] ss:$16 sps:$4 sm:$0xff]  }
 0x753   : > { %v1209_v49 = vsub.f32 %v1201_v22, %v1207_v38  ;;  %v1210_v54 = vmul.f32 1.442695, %v1208_v48  ;;  %v3252_v38 = vld [vmem:[#allocation13 + $0x18] sm:$0xff]   ;;  %3003 = vmatprep.subr.bf16.mxu0 %v3932_v5 }
 0x754   : > { %v1340_v39 = vpop.xlane.xlu0 %1339 }
 0x755   : > { %v1344_v40 = vsub.f32 %v1336_v19, %v1340_v39  ;;  %v1212_v55 = vmul.f32 1.442695, %v1209_v49  ;;  %v3255_v49 = vld [vmem:[#allocation13 + $0x30] sm:$0xff]  }
 0x756   : > { %v1479_v41 = vpop.xlane.xlu1 %1478  ;;  %3004 = vmatpush3.bf16.msra.mxu0 %v3252_v38  ;;  %v3277_v38 = vld [vmem:[#allocation21 + $0x64] ss:$16 sps:$4 sm:$0xff]  }
 0x757   : > { %v1346_v42 = vmul.f32 1.442695, %v1344_v40  ;;  %v1481_v43 = vsub.f32 %v1473_v28, %v1479_v41  ;;  %3005 = vmatprep.subr.bf16.mxu0 %v3932_v5  ;;  %v3253_v40 = vld [vmem:[#allocation13 + $0x20] sm:$0xff]  }
 0x758   : > { %v1343_v45 = vpop.xlane.xlu0 %1342 }
 0x759   : > { %3349 = vpow2.f32 %v1346_v42  ;;  %v1345_v46 = vsub.f32 %v1337_v30, %v1343_v45  ;;  %v1484_v50 = vmul.f32 1.442695, %v1481_v43  ;;  %v3254_v43 = vld [vmem:[#allocation13 + $0x28] sm:$0xff]  }
 0x75a   : > { %3006 = vmatpush3.bf16.msra.mxu0 %v3253_v40  ;;  %v3275_v40 = vld [vmem:[#allocation21 + $0x60] ss:$16 sps:$4 sm:$0xff]  }
 0x75b   : > { %v1348_v51 = vmul.f32 1.442695, %v1345_v46  ;;  %3007 = vmatprep.subr.bf16.mxu0 %v3932_v5 }
 0x75c   : > { %v1476_v52 = vpop.xlane.xlu0 %1475 }
 0x75d   : > { %3351 = vpow2.f32 %v1348_v51  ;;  %v1480_v53 = vsub.f32 %v1472_v34, %v1476_v52  ;;  %v3256_v52 = vld [vmem:[#allocation13 + $0x38] sm:$0xff]  }
 0x75e   : > { %3353 = vpow2.f32 %v1484_v50  ;;  %3008 = vmatpush3.bf16.msra.mxu0 %v3254_v43  ;;  %v3286_v43 = vld [vmem:[#allocation21 + $0x8c] ss:$16 sps:$4 sm:$0xff]  }
 0x75f   : > { %v1482_v56 = vmul.f32 1.442695, %v1480_v53  ;;  %3009 = vmatprep.subr.bf16.mxu0 %v3932_v5 }
 0x761   : > { %3355 = vpow2.f32 %v1482_v56 }
 0x762   : > { %3357 = vpow2.f32 %v1210_v54  ;;  %3010 = vmatpush3.bf16.msra.mxu0 %v3255_v49  ;;  %v3292_v49 = vld [vmem:[#allocation21 + $0xac] ss:$16 sps:$4 sm:$0xff]  }
 0x763   : > { %v3350_v57 = vpop.eup %3349  ;;  %3359 = vpow2.f32 %v1212_v55  ;;  %3011 = vmatprep.subr.bf16.mxu0 %v3932_v5 }
 0x764   : > { %v1350_v58 = vsel %vm1074_vm2, %v3350_v57, 0.0 }
 0x765   : > { %1351 = vadd.xlane.f32.xlu0 %v1350_v58 }
 0x766   : > { %3012 = vmatpush3.bf16.msra.mxu0 %v3256_v52  ;;  %v3295_v52 = vld [vmem:[#allocation21 + $0xc4] ss:$16 sps:$4 sm:$0xff]  }
 0x767   : > { %v3352_v59 = vpop.eup %3351 }
 0x768   : > { %v1353_v60 = vsel %vm1074_vm2, %v3352_v59, 0.0  ;;  %v3354_v61 = vpop.eup %3353 }
 0x769   : > { %1354 = vadd.xlane.f32.xlu1 %v1353_v60  ;;  %v1489_v6 = vsel %vm1074_vm2, %v3354_v61, 0.0 }
 0x76b   : > { %v3356_v62 = vpop.eup %3355 }
 0x76c   : > { %v3358_v3 = vpop.eup %3357  ;;  %v1486_v4 = vsel %vm1074_vm2, %v3356_v62, 0.0 }
 0x76d   : > { %v3360_v7 = vpop.eup %3359  ;;  %1487 = vadd.xlane.f32.xlu0 %v1486_v4  ;;  %1490 = vadd.xlane.f32.xlu1 %v1489_v6  ;;  %v1214_v8 = vsel %vm1074_vm2, %v3358_v3, 0.0  ;;  %v1664_v4 = vld [vmem:[#allocation16] sm:$0x1] }
 0x76e   : > { %v1217_v9 = vsel %vm1074_vm2, %v3360_v7, 0.0 }
 0x771   : > { %1215 = vadd.xlane.f32.xlu0 %v1214_v8  ;;  %1218 = vadd.xlane.f32.xlu1 %v1217_v9 }
 0x782   : > { %1362 = vrot.lane.b32.xlu1 %v4527_v25, %s4780_s15 }
 0x786   : > { %1498 = vrot.lane.b32.xlu1 %v4527_v25, %s3937_s23 }
 0x787   : > { %1226 = vrot.lane.b32.xlu0 %v4527_v25, %s3935_s1 }
 0x7f2   : > { %v1352_v10 = vpop.xlane.xlu0 %1351 }
 0x7f6   : > { %v1355_v11 = vpop.xlane.xlu1 %1354 }
 0x7fa   : > { %v1488_v12 = vpop.xlane.xlu0 %1487  ;;  %v1491_v13 = vpop.xlane.xlu1 %1490 }
 0x7fe   : > { %v1216_v14 = vpop.xlane.xlu0 %1215  ;;  %v1219_v15 = vpop.xlane.xlu1 %1218 }
 0x7ff   : > { %3361 = vrcp.f32 %v1216_v14 }
 0x800   : > { %3363 = vrcp.f32 %v1219_v15 }
 0x801   : > { %3365 = vrcp.f32 %v1355_v11 }
 0x802   : > { %v1227_v16 = vpop.permute.xlu0 %1226  ;;  %3367 = vrcp.f32 %v1352_v10  ;;  %v1363_v22 = vpop.permute.xlu1 %1362 }
 0x803   : > { %2968 = vmatpush3.bf16.msra.mxu1 %v1227_v16  ;;  %3369 = vrcp.f32 %v1488_v12 }
 0x804   : > { %2979 = vmatprep.subr.bf16.mxu1 %v3932_v5  ;;  %3371 = vrcp.f32 %v1491_v13 }
 0x806   : > { %v1499_v30 = vpop.permute.xlu1 %1498 }
 0x809   : > { %v3362_v17 = vpop.eup %3361 }
 0x80a   : > { %v3364_v18 = vpop.eup %3363  ;;  %v1221_v19 = vmul.f32 %v3362_v17, %v3358_v3  ;;  %v1569_v3 = vld [vmem:[#allocation15] sm:$0x1] }
 0x80b   : > { %v1223_v20 = vmul.f32 %v3364_v18, %v3360_v7  ;;  %v3366_v21 = vpop.eup %3365  ;;  %v1570_v6 = vunpack.c.l.bf16 %v1569_v3  ;;  %v1665_v7 = vunpack.c.l.bf16 %v1664_v4 }
 0x80c   : > { %v3368_v23 = vpop.eup %3367  ;;  %v1359_v24 = vmul.f32 %v3366_v21, %v3352_v59  ;;  %v3262_v21 = vld [vmem:[#allocation21 + $0xc] ss:$16 sps:$4 sm:$0xff]  }
 0x80d   : > { %v1224_v25 = vpack.c.bf16 %v1223_v20, %v1221_v19  ;;  %v1357_v26 = vmul.f32 %v3368_v23, %v3350_v57  ;;  %v3370_v27 = vpop.eup %3369  ;;  %v1574_v8 = vrot.slane %v1570_v6, %v4507_v47  ;;  %v1669_v9 = vrot.slane %v1665_v7, %v4507_v47  ;;  %v3257_v19 = vld [vmem:[#allocation21] ss:$16 sps:$4 sm:$0xff]   ;;  %v3259_v20 = vld [vmem:[#allocation21 + $0x4] ss:$16 sps:$4 sm:$0xff]   ;;  %v3268_v23 = vld [vmem:[#allocation21 + $0x2c] ss:$16 sps:$4 sm:$0xff]   ;;  %1987 = vmatprep.subr.bf16.mxu0 %v3262_v21 }
 0x80e   : > { %v3372_v29 = vpop.eup %3371  ;;  %v1493_v32 = vmul.f32 %v3370_v27, %v3356_v62  ;;  %v1674_v6 = vld [vmem:[#allocation18] sm:$0x1]  ;;  %v3305_v21 = vld [vmem:[#allocation24 + $0x40] sm:$0xff]  }
 0x80f   : > { %2970 = vmatmul.mubr.msk.bf16.vlgmr.msra.gmra.mrb[16].mxu1 %vm1074_vm2, %v1224_v25  ;;  %v1360_v28 = vpack.c.bf16 %v1359_v24, %v1357_v26  ;;  %v1495_v33 = vmul.f32 %v3372_v29, %v3354_v61  ;;  %v3260_v25 = vld [vmem:[#allocation21 + $0x8] ss:$16 sps:$4 sm:$0xff]   ;;  %v3263_v24 = vld [vmem:[#allocation21 + $0x20] ss:$16 sps:$4 sm:$0xff]   ;;  %v1676_v7 = vunpack.c.l.bf16 %v1674_v6 }
 0x810   : > { %2980 = vmatpush3.bf16.msra.mxu1 %v1363_v22  ;;  %2981 = vmatprep.mubr.msk.bf16.mxu1 %vm3934_vm0, %v3932_v5  ;;  %v3265_v22 = vld [vmem:[#allocation21 + $0x24] ss:$16 sps:$4 sm:$0xff]  }
 0x811   : > { %2991 = vmatprep.subr.bf16.mxu1 %v3932_v5  ;;  %v1496_v34 = vpack.c.bf16 %v1495_v33, %v1493_v32 }
 0x817   : > { %2982 = vmatmul.mubr.msk.bf16.vlgmr.msra.gmra.mrb[20].mxu1 %vm1074_vm2, %v1360_v28 }
 0x818   : > { %2992 = vmatpush3.bf16.msra.mxu1 %v1499_v30  ;;  %2993 = vmatprep.mubr.msk.bf16.mxu1 %vm3934_vm0, %v3932_v5 }
 0x819   : > { %1944 = vmatprep.subr.bf16.mxu1 %v3259_v20 }
 0x81f   : > { %2994 = vmatmul.mubr.msk.bf16.vlgmr.msra.gmra.mrb[24].mxu1 %vm1074_vm2, %v1496_v34  ;;  %v3271_v34 = vld [vmem:[#allocation21 + $0x44] ss:$16 sps:$4 sm:$0xff]  }
 0x820   : > { %1976 = vmatprep.mubr.bf16.mxu1 %v3933_v31  ;;  %1945 = vmatpush1.bf16.msra.mxu1 %v3257_v19 }
 0x821   : > { %1946 = vmatprep.subr.bf16.mxu1 %v3265_v22  ;;  %v3306_v22 = vld [vmem:[#allocation24 + $0xc0] sm:$0xff]  }
 0x824   : > { %1947 = vmatpush1.bf16.msra.mxu1 %v3263_v24  ;;  %v3308_v24 = vld [vmem:[#allocation24 + $0x80] sm:$0xff]  }
 0x825   : > { %1948 = vmatprep.subr.bf16.mxu1 %v3271_v34  ;;  %v3318_v34 = vld [vmem:[#allocation24 + $0xd8] sm:$0xff]  }
 0x828   : > { %1949 = vmatpush1.bf16.msra.mxu1 %v3269_v36  ;;  %v3320_v36 = vld [vmem:[#allocation24 + $0x98] sm:$0xff]  }
 0x829   : > { %1950 = vmatprep.subr.bf16.mxu1 %v3277_v38  ;;  %v3322_v38 = vld [vmem:[#allocation24 + $0xe0] sm:$0xff]  }
 0x82c   : > { %1951 = vmatpush1.bf16.msra.mxu1 %v3275_v40  ;;  %v3324_v40 = vld [vmem:[#allocation24 + $0xa0] sm:$0xff]  }
 0x8e2   : > { %v1266_v39 = vpop.f32.mrb[16].mxu1 }
 0x8e3   : > { %v2971_v41 = vpop.f32.mrb[17].mxu1 }
 0x8e4   : > { %v1269_v42 = vpop.f32.mrb[18].mxu1  ;;  %v3278_v41 = vld [vmem:[#allocation21 + $0x68] ss:$16 sps:$4 sm:$0xff]  }
 0x8e5   : > { %v1273_v45 = vpack.c.bf16 %v1269_v42, %v1266_v39  ;;  %v2972_v46 = vpop.f32.mrb[19].mxu1  ;;  %v3280_v39 = vld [vmem:[#allocation21 + $0x6c] ss:$16 sps:$4 sm:$0xff]   ;;  %v3283_v42 = vld [vmem:[#allocation21 + $0x84] ss:$16 sps:$4 sm:$0xff]  }
 0x8e6   : > { %v3284_v46 = vld [vmem:[#allocation21 + $0x88] ss:$16 sps:$4 sm:$0xff]   ;;  %1952 = vmatprep.subr.bf16.mxu1 %v3283_v42  ;;  %v3326_v42 = vld [vmem:[#allocation24 + $0xe8] sm:$0xff]  }
 0x8e7   : > { %1275 = vrot.lane.b32.xlu1 %v1273_v45, %s3937_s23  ;;  %v3281_v45 = vld [vmem:[#allocation21 + $0x80] ss:$16 sps:$4 sm:$0xff]   ;;  %s3819_s23 = sshll.u32 %s3938_s16, 4  ;;  %s3820_s23 = int_to_ptr.vmem [resolvable:$false] %s3819_s23 }
 0x8e8   : > { %1953 = vmatpush1.bf16.msra.mxu1 %v3281_v45  ;;  %v3328_v45 = vld [vmem:[#allocation24 + $0xa8] sm:$0xff]   ;;  %p3822_p5 = scmp.lt.s32.totalorder %s4706_s26, %s3820_s23 }
 0x8ea   : > { %v1402_v48 = vpop.f32.mrb[20].mxu1 }
 0x8eb   : > { %v2983_v50 = vpop.f32.mrb[21].mxu1 }
 0x8ec   : > { %v1405_v51 = vpop.f32.mrb[22].mxu1  ;;  %v3287_v50 = vld [vmem:[#allocation21 + $0xa0] ss:$16 sps:$4 sm:$0xff]  }
 0x8ed   : > { %v1409_v53 = vpack.c.bf16 %v1405_v51, %v1402_v48  ;;  %v2984_v54 = vpop.f32.mrb[23].mxu1  ;;  %v3289_v48 = vld [vmem:[#allocation21 + $0xa4] ss:$16 sps:$4 sm:$0xff]   ;;  %v3290_v51 = vld [vmem:[#allocation21 + $0xa8] ss:$16 sps:$4 sm:$0xff]  }
 0x8ee   : > { %1954 = vmatprep.subr.bf16.mxu1 %v3289_v48  ;;  %v3293_v54 = vld [vmem:[#allocation21 + $0xc0] ss:$16 sps:$4 sm:$0xff]   ;;  %v3330_v48 = vld [vmem:[#allocation24 + $0xf0] sm:$0xff]  }
 0x8ef   : > { %1411 = vrot.lane.b32.xlu0 %v1409_v53, %s4780_s15  ;;  %1955 = vmatpush1.bf16.msra.mxu1 %v3287_v50  ;;  %v3298_v53 = vld [vmem:[#allocation21 + $0xcc] ss:$16 sps:$4 sm:$0xff]   ;;  %v3332_v50 = vld [vmem:[#allocation24 + $0xb0] sm:$0xff]   ;;  %s3821_s15 = scalar_lea.vmem %s3820_s23, 256 }
 0x8f0   : > { %1956 = vmatprep.subr.bf16.mxu1 %v3295_v52  ;;  %v3334_v52 = vld [vmem:[#allocation24 + $0xf8] sm:$0xff]  }
 0x8f2   : > { %v1538_v55 = vpop.f32.mrb[24].mxu1 }
 0x8f3   : > { %v2995_v56 = vpop.f32.mrb[25].mxu1  ;;  %1957 = vmatpush1.bf16.msra.mxu1 %v3293_v54  ;;  %v3336_v54 = vld [vmem:[#allocation24 + $0xb8] sm:$0xff]  }
 0x8f4   : > { %v1541_v57 = vpop.f32.mrb[26].mxu1  ;;  %v3301_v56 = vld [vmem:[#allocation21 + $0xe4] ss:$16 sps:$4 sm:$0xff]  }
 0x8f5   : > { %v1545_v58 = vpack.c.bf16 %v1541_v57, %v1538_v55  ;;  %v2996_v59 = vpop.f32.mrb[27].mxu1  ;;  %v3296_v55 = vld [vmem:[#allocation21 + $0xc8] ss:$16 sps:$4 sm:$0xff]   ;;  %v3304_v57 = vld [vmem:[#allocation21 + $0xec] ss:$16 sps:$4 sm:$0xff]   ;;  %1958 = vmatprep.subr.bf16.mxu1 %v3301_v56 }
 0x8f6   : > { %v3302_v59 = vld [vmem:[#allocation21 + $0xe8] ss:$16 sps:$4 sm:$0xff]  }
 0x8f7   : > { %1547 = vrot.lane.b32.xlu1 %v1545_v58, %s3935_s1  ;;  %v3299_v58 = vld [vmem:[#allocation21 + $0xe0] ss:$16 sps:$4 sm:$0xff]   ;;  %s3815_s1 = scalar_lea.vmem %s4706_s26, 128 }
 0x8f8   : > { %1959 = vmatpush1.bf16.msra.mxu1 %v3299_v58  ;;  %p3816_p10 = scmp.ne.s32.totalorder %s4706_s26, %s3815_s1  ;;  %p3823_p7 = scmp.lt.s32.totalorder %s3821_s15, %s3815_s1 }
 0x8f9   : > { %2885 = vmatprep.subr.bf16.mxu1 %v3305_v21 }
 0x8fa   : > { %p3817_p12 = pnand %p3816_p10, %p4826_p11  ;;  %p3824_p6 = por %p3823_p7, %p3822_p5 }
 0x8fc   : > { %p3818_p0 = pneg %p3817_p12 }
 0x8fe   : > { %p3825_p9 = pnand %p3824_p6, %p3818_p0 }
 0x959   : > { %v1276_v60 = vpop.permute.xlu1 %1275 }
 0x95a   : > { %1279 = vst.msk [vmem:[#allocation3] sm:$0xff] %vm1278_vm3, %v1276_v60 }
 0x961   : > { %v1412_v61 = vpop.permute.xlu0 %1411 }
 0x962   : > { %1415 = vst.msk [vmem:[#allocation3] sm:$0xff] %vm1414_vm4, %v1412_v61 }
 0x969   : > { %v1548_v62 = vpop.permute.xlu1 %1547 }
 0x96a   : > { %1551 = vst.msk [vmem:[#allocation3] sm:$0xff] %vm1550_vm5, %v1548_v62 }
 0x971   : > { %v1552_v5 = vld [vmem:[#allocation3] sm:$0xff] }
 0x972   : > { %3014 = vmatmul.mubr.bf16.vlgmr.msra.gmra.mrb[12].mxu0 %v1552_v5 }
 0x973   : > { %2019 = vmatprep.mubr.bf16.mxu0 %v3933_v31  ;;  %1988 = vmatpush1.bf16.msra.mxu0 %v3260_v25 }
 0x974   : > { %1989 = vmatprep.subr.bf16.mxu0 %v3268_v23  ;;  %v3307_v23 = vld [vmem:[#allocation24] sm:$0xff]  }
 0xa45   : > { %v1657_v10 = vpop.f32.mrb[12].mxu0 }
 0xa46   : > { %v1658_v11 = vadd.f32 %v1657_v10, %v1574_v8  ;;  %v3015_v12 = vpop.f32.mrb[13].mxu0 }
 0xa47   : > { %v1660_v13 = vpop.f32.mrb[14].mxu0  ;;  %v1703_v12 = vrot.slane %v1676_v7, %v4507_v47 }
 0xa48   : > { %v1670_v14 = vmul.f32 %v1669_v9, %v1658_v11  ;;  %v1661_v15 = vadd.f32 %v1660_v13, %v1574_v8  ;;  %v3016_v16 = vpop.f32.mrb[15].mxu0  ;;  %v1675_v8 = vld [vmem:[#allocation19] sm:$0x1] }
 0xa49   : > { %v1677_v11 = vunpack.c.l.bf16 %v1675_v8 }
 0xa4a   : > { %v1671_v17 = vmul.f32 %v1669_v9, %v1661_v15  ;;  %v4607_v18 = vadd.f32 %v4475_v1, %v1670_v14  ;;  %v3266_v1 = vld [vmem:[#allocation21 + $0x28] ss:$16 sps:$4 sm:$0xff]  }
 0xa4b   : > { %1990 = vmatpush1.bf16.msra.mxu0 %v3266_v1  ;;  %v1709_v16 = vrot.slane %v1677_v11, %v4507_v47  ;;  %v3309_v1 = vld [vmem:[#allocation24 + $0x48] sm:$0xff]  }
 0xa4c   : > { %1678 = vadd.xlane.f32.xlu0 %v4607_v18  ;;  %v4611_v31 = vadd.f32 %v4478_v2, %v1671_v17  ;;  %1991 = vmatprep.subr.bf16.mxu0 %v3274_v35  ;;  %v3319_v35 = vld [vmem:[#allocation24 + $0x18] sm:$0xff]  }
 0xa4e   : > { %1680 = vadd.xlane.f32.xlu1 %v4611_v31 }
 0xa4f   : > { %1992 = vmatpush1.bf16.msra.mxu0 %v3272_v37  ;;  %v3321_v37 = vld [vmem:[#allocation24 + $0x60] sm:$0xff]  }
 0xa50   : > { %1993 = vmatprep.subr.bf16.mxu0 %v3280_v39  ;;  %v3323_v39 = vld [vmem:[#allocation24 + $0x20] sm:$0xff]  }
 0xa53   : > { %1994 = vmatpush1.bf16.msra.mxu0 %v3278_v41  ;;  %v3325_v41 = vld [vmem:[#allocation24 + $0x68] sm:$0xff]  }
 0xa54   : > { %1995 = vmatprep.subr.bf16.mxu0 %v3286_v43  ;;  %v3327_v43 = vld [vmem:[#allocation24 + $0x28] sm:$0xff]  }
 0xa57   : > { %1996 = vmatpush1.bf16.msra.mxu0 %v3284_v46  ;;  %v3329_v46 = vld [vmem:[#allocation24 + $0x70] sm:$0xff]  }
 0xa58   : > { %1997 = vmatprep.subr.bf16.mxu0 %v3292_v49  ;;  %v3331_v49 = vld [vmem:[#allocation24 + $0x30] sm:$0xff]  }
 0xa5b   : > { %1998 = vmatpush1.bf16.msra.mxu0 %v3290_v51  ;;  %v3333_v51 = vld [vmem:[#allocation24 + $0x78] sm:$0xff]  }
 0xa5c   : > { %1999 = vmatprep.subr.bf16.mxu0 %v3298_v53  ;;  %v3335_v53 = vld [vmem:[#allocation24 + $0x38] sm:$0xff]  }
 0xa5f   : > { %2000 = vmatpush1.bf16.msra.mxu0 %v3296_v55  ;;  %v1745_v55 = vld [vmem:[#allocation22] sm:$0xf] }
 0xa60   : > { %2001 = vmatprep.subr.bf16.mxu0 %v3304_v57  ;;  %v1746_v56 = vunpack.c.l.bf16 %v1745_v55  ;;  %v1762_v57 = vsub.s32 6, %v4504_v44 }
 0xa62   : > { %v1751_v58 = vrot.slane %v1746_v56, %v4507_v47 }
 0xa63   : > { %2002 = vmatpush1.bf16.msra.mxu0 %v3302_v59  ;;  %v1759_v59 = vrot.slane %v1746_v56, %v786_v63 }
 0xa64   : > { %2907 = vmatprep.subr.bf16.mxu0 %v3306_v22 }
 0xad9   : > { %v1679_v2 = vpop.xlane.xlu0 %1678 }
 0xada   : > { %v1682_v26 = vmul.f32 0.0078125, %v1679_v2  ;;  %v3310_v2 = vld [vmem:[#allocation24 + $0xc8] sm:$0xff]  }
 0xadb   : > { %v1681_v27 = vpop.xlane.xlu1 %1680 }
 0xadc   : > { %v4615_v28 = vsub.f32 %v4607_v18, %v1682_v26  ;;  %v1683_v29 = vmul.f32 0.0078125, %v1681_v27  ;;  %v3311_v26 = vld [vmem:[#allocation24 + $0x8] sm:$0xff]  }
 0xadd   : > { %v3312_v27 = vld [vmem:[#allocation24 + $0x88] sm:$0xff]  }
 0xade   : > { %v4618_v30 = vsub.f32 %v4611_v31, %v1683_v29  ;;  %v1686_v32 = vmul.f32 %v4615_v28, %v4615_v28  ;;  %v3314_v29 = vld [vmem:[#allocation24 + $0xd0] sm:$0xff]  }
 0xae0   : > { %1688 = vadd.xlane.f32.xlu0 %v1686_v32  ;;  %v1687_v33 = vmul.f32 %v4618_v30, %v4618_v30  ;;  %v3316_v32 = vld [vmem:[#allocation24 + $0x90] sm:$0xff]  }
 0xae4   : > { %1690 = vadd.xlane.f32.xlu0 %v1687_v33  ;;  %v3317_v33 = vld [vmem:[#allocation24 + $0x58] sm:$0xff]  }
 0xb6d   : > { %v1689_v60 = vpop.xlane.xlu0 %1688 }
 0xb6e   : > { %v1692_v61 = vmul.f32 0.0078125, %v1689_v60  ;;  %v1755_v60 = vrot.slane %v1746_v56, %v782_v0 }
 0xb70   : > { %v1694_v62 = vadd.f32 1e-05, %v1692_v61  ;;  %v1763_v61 = vrot.slane %v1746_v56, %v1762_v57 }
 0xb71   : > { %v1691_v5 = vpop.xlane.xlu0 %1690 }
 0xb72   : > { %3373 = vrsqrt.f32 %v1694_v62  ;;  %v1693_v3 = vmul.f32 0.0078125, %v1691_v5  ;;  %v1771_v62 = vrot.slane %v1751_v58, %v4507_v47  ;;  %v1779_v5 = vrot.slane %v1759_v59, %v4507_v47 }
 0xb74   : > { %v1695_v4 = vadd.f32 1e-05, %v1693_v3  ;;  %v1775_v3 = vrot.slane %v1755_v60, %v4507_v47 }
 0xb76   : > { %3375 = vrsqrt.f32 %v1695_v4  ;;  %v1783_v4 = vrot.slane %v1763_v61, %v4507_v47 }
 0xb7c   : > { %v3374_v9 = vpop.eup %3373 }
 0xb7d   : > { %v1698_v10 = vmul.f32 %v3374_v9, %v4615_v28  ;;  %v3313_v28 = vld [vmem:[#allocation24 + $0x50] sm:$0xff]  }
 0xb7f   : > { %v1704_v15 = vmul.f32 %v1703_v12, %v1698_v10 }
 0xb80   : > { %v3376_v13 = vpop.eup %3375 }
 0xb81   : > { %v1699_v14 = vmul.f32 %v3376_v13, %v4618_v30  ;;  %v1710_v19 = vadd.f32 %v1709_v16, %v1704_v15  ;;  %v3315_v30 = vld [vmem:[#allocation24 + $0x10] sm:$0xff]  }
 0xb83   : > { %v1705_v17 = vmul.f32 %v1703_v12, %v1699_v14 }
 0xb85   : > { %v1711_v20 = vadd.f32 %v1709_v16, %v1705_v17 }
 0xb87   : > { %v1712_v25 = vpack.c.bf16 %v1711_v20, %v1710_v19 }
 0xb89   : > { %1977 = vmatmul.mubr.bf16.vlgmr.msra.gmra.mrb[28].mxu1 %v1712_v25  ;;  %2020 = vmatmul.mubr.bf16.vlgmr.msra.gmra.mrb[16].mxu0 %v1712_v25 }
 0xb8a   : > { %2886 = vmatpush3.bf16.msra.mxu1 %v3307_v23  ;;  %2908 = vmatpush3.bf16.msra.mxu0 %v3308_v24 }
 0xb8b   : > { %2887 = vmatprep.subr.bf16.mxu1 %v3309_v1  ;;  %2909 = vmatprep.subr.bf16.mxu0 %v3310_v2 }
 0xb8e   : > { %2888 = vmatpush3.bf16.msra.mxu1 %v3311_v26  ;;  %2910 = vmatpush3.bf16.msra.mxu0 %v3312_v27 }
 0xb8f   : > { %2889 = vmatprep.subr.bf16.mxu1 %v3313_v28  ;;  %2911 = vmatprep.subr.bf16.mxu0 %v3314_v29 }
 0xb92   : > { %2890 = vmatpush3.bf16.msra.mxu1 %v3315_v30  ;;  %2912 = vmatpush3.bf16.msra.mxu0 %v3316_v32 }
 0xb93   : > { %2891 = vmatprep.subr.bf16.mxu1 %v3317_v33  ;;  %2913 = vmatprep.subr.bf16.mxu0 %v3318_v34 }
 0xb96   : > { %2892 = vmatpush3.bf16.msra.mxu1 %v3319_v35  ;;  %2914 = vmatpush3.bf16.msra.mxu0 %v3320_v36 }
 0xb97   : > { %2893 = vmatprep.subr.bf16.mxu1 %v3321_v37  ;;  %2915 = vmatprep.subr.bf16.mxu0 %v3322_v38 }
 0xb9a   : > { %2894 = vmatpush3.bf16.msra.mxu1 %v3323_v39  ;;  %2916 = vmatpush3.bf16.msra.mxu0 %v3324_v40 }
 0xb9b   : > { %2895 = vmatprep.subr.bf16.mxu1 %v3325_v41  ;;  %2917 = vmatprep.subr.bf16.mxu0 %v3326_v42 }
 0xb9e   : > { %2896 = vmatpush3.bf16.msra.mxu1 %v3327_v43  ;;  %2918 = vmatpush3.bf16.msra.mxu0 %v3328_v45 }
 0xb9f   : > { %2897 = vmatprep.subr.bf16.mxu1 %v3329_v46  ;;  %2919 = vmatprep.subr.bf16.mxu0 %v3330_v48 }
 0xba2   : > { %2898 = vmatpush3.bf16.msra.mxu1 %v3331_v49  ;;  %2920 = vmatpush3.bf16.msra.mxu0 %v3332_v50 }
 0xba3   : > { %2899 = vmatprep.subr.bf16.mxu1 %v3333_v51  ;;  %2921 = vmatprep.subr.bf16.mxu0 %v3334_v52 }
 0xba6   : > { %2900 = vmatpush3.bf16.msra.mxu1 %v3335_v53  ;;  %2922 = vmatpush3.bf16.msra.mxu0 %v3336_v54 }
 0xc5c   : > { %v1978_v6 = vpop.f32.mrb[28].mxu1  ;;  %v2021_v7 = vpop.f32.mrb[16].mxu0 }
 0xc5d   : > { %v4638_v8 = vadd.f32 %v1978_v6, %v1771_v62  ;;  %v4640_v9 = vadd.f32 %v2021_v7, %v1779_v5  ;;  %v1980_v10 = vpop.f32.mrb[29].mxu1  ;;  %v2023_v63 = vpop.f32.mrb[17].mxu0 }
 0xc5e   : > { %v4642_v11 = vadd.f32 %v1980_v10, %v1775_v3  ;;  %v4644_v44 = vadd.f32 %v2023_v63, %v1783_v4  ;;  %v1982_v0 = vpop.f32.mrb[30].mxu1  ;;  %v2025_v12 = vpop.f32.mrb[18].mxu0 }
 0xc5f   : > { %v2030_v13 = vmul.f32 %v4638_v8, %v4638_v8  ;;  %v2032_v14 = vmul.f32 %v4640_v9, %v4640_v9  ;;  %v4650_v15 = vadd.f32 %v1982_v0, %v1771_v62  ;;  %v4652_v16 = vadd.f32 %v2025_v12, %v1779_v5  ;;  %v1984_v17 = vpop.f32.mrb[31].mxu1  ;;  %v2027_v19 = vpop.f32.mrb[19].mxu0 }
 0xc60   : > { %v2031_v20 = vmul.f32 %v4642_v11, %v4642_v11  ;;  %v2033_v25 = vmul.f32 %v4644_v44, %v4644_v44  ;;  %v4658_v21 = vadd.f32 %v1984_v17, %v1775_v3  ;;  %v4660_v22 = vadd.f32 %v2027_v19, %v1783_v4 }
 0xc61   : > { %v2038_v23 = vmul.f32 %v2030_v13, %v4638_v8  ;;  %v2040_v24 = vmul.f32 %v2032_v14, %v4640_v9  ;;  %v2034_v1 = vmul.f32 %v4650_v15, %v4650_v15  ;;  %v2036_v2 = vmul.f32 %v4652_v16, %v4652_v16 }
 0xc62   : > { %v2039_v26 = vmul.f32 %v2031_v20, %v4642_v11  ;;  %v2041_v27 = vmul.f32 %v2033_v25, %v4644_v44  ;;  %v2035_v28 = vmul.f32 %v4658_v21, %v4658_v21  ;;  %v2037_v29 = vmul.f32 %v4660_v22, %v4660_v22 }
 0xc63   : > { %v2046_v30 = vmul.f32 0.044715, %v2038_v23  ;;  %v2048_v32 = vmul.f32 0.044715, %v2040_v24  ;;  %v2042_v33 = vmul.f32 %v2034_v1, %v4650_v15  ;;  %v2044_v34 = vmul.f32 %v2036_v2, %v4652_v16 }
 0xc64   : > { %v2047_v35 = vmul.f32 0.044715, %v2039_v26  ;;  %v2049_v36 = vmul.f32 0.044715, %v2041_v27  ;;  %v2043_v37 = vmul.f32 %v2035_v28, %v4658_v21  ;;  %v2045_v38 = vmul.f32 %v2037_v29, %v4660_v22 }
 0xc65   : > { %v2054_v39 = vadd.f32 %v2046_v30, %v4638_v8  ;;  %v2056_v40 = vadd.f32 %v2048_v32, %v4640_v9  ;;  %v2050_v41 = vmul.f32 0.044715, %v2042_v33  ;;  %v2052_v42 = vmul.f32 0.044715, %v2044_v34 }
 0xc66   : > { %v2055_v43 = vadd.f32 %v2047_v35, %v4642_v11  ;;  %v2057_v45 = vadd.f32 %v2049_v36, %v4644_v44  ;;  %v2051_v46 = vmul.f32 0.044715, %v2043_v37  ;;  %v2053_v48 = vmul.f32 0.044715, %v2045_v38 }
 0xc67   : > { %v2062_v49 = vmul.f32 0.7978846, %v2054_v39  ;;  %v2064_v50 = vmul.f32 0.7978846, %v2056_v40  ;;  %v2058_v51 = vadd.f32 %v2050_v41, %v4650_v15  ;;  %v2060_v52 = vadd.f32 %v2052_v42, %v4652_v16 }
 0xc68   : > { %v2063_v53 = vmul.f32 0.7978846, %v2055_v43  ;;  %v2065_v54 = vmul.f32 0.7978846, %v2057_v45  ;;  %v2059_v55 = vadd.f32 %v2051_v46, %v4658_v21  ;;  %v2061_v56 = vadd.f32 %v2053_v48, %v4660_v22 }
 0xc69   : > { %3377 = vtanh.f32 %v2062_v49  ;;  %v2066_v57 = vmul.f32 0.7978846, %v2058_v51  ;;  %v2068_v58 = vmul.f32 0.7978846, %v2060_v52 }
 0xc6a   : > { %3379 = vtanh.f32 %v2064_v50  ;;  %v2067_v59 = vmul.f32 0.7978846, %v2059_v55  ;;  %v2069_v60 = vmul.f32 0.7978846, %v2061_v56 }
 0xc6b   : > { %3381 = vtanh.f32 %v2063_v53 }
 0xc6c   : > { %3383 = vtanh.f32 %v2065_v54 }
 0xc6d   : > { %3385 = vtanh.f32 %v2066_v57 }
 0xc6e   : > { %3387 = vtanh.f32 %v2068_v58 }
 0xc6f   : > { %3389 = vtanh.f32 %v2067_v59 }
 0xc70   : > { %3391 = vtanh.f32 %v2069_v60 }
 0xc73   : > { %v3378_v61 = vpop.eup %3377 }
 0xc74   : > { %v3380_v62 = vpop.eup %3379  ;;  %v2078_v5 = vadd.f32 1.0, %v3378_v61 }
 0xc75   : > { %v3382_v3 = vpop.eup %3381  ;;  %v2080_v4 = vadd.f32 1.0, %v3380_v62 }
 0xc76   : > { %v3384_v6 = vpop.eup %3383  ;;  %v2079_v7 = vadd.f32 1.0, %v3382_v3  ;;  %v2086_v12 = vmul.f32 0.5, %v2078_v5 }
 0xc77   : > { %v3386_v10 = vpop.eup %3385  ;;  %v2081_v63 = vadd.f32 1.0, %v3384_v6  ;;  %v2088_v17 = vmul.f32 0.5, %v2080_v4 }
 0xc78   : > { %v3388_v0 = vpop.eup %3387  ;;  %v2082_v13 = vadd.f32 1.0, %v3386_v10  ;;  %v2087_v24 = vmul.f32 0.5, %v2079_v7  ;;  %v2094_v27 = vmul.f32 %v2086_v12, %v4638_v8 }
 0xc79   : > { %v3390_v14 = vpop.eup %3389  ;;  %v2084_v19 = vadd.f32 1.0, %v3388_v0  ;;  %v2089_v26 = vmul.f32 0.5, %v2081_v63  ;;  %v2096_v30 = vmul.f32 %v2088_v17, %v4640_v9  ;;  %v2170_v9 = vld [vmem:[#allocation25] sm:$0x1] }
 0xc7a   : > { %v3392_v20 = vpop.eup %3391  ;;  %v2090_v25 = vmul.f32 0.5, %v2082_v13  ;;  %v2083_v23 = vadd.f32 1.0, %v3390_v14  ;;  %v2095_v34 = vmul.f32 %v2087_v24, %v4642_v11 }
 0xc7b   : > { %v2092_v1 = vmul.f32 0.5, %v2084_v19  ;;  %v2085_v2 = vadd.f32 1.0, %v3392_v20  ;;  %v2097_v37 = vmul.f32 %v2089_v26, %v4644_v44 }
 0xc7c   : > { %v2098_v28 = vmul.f32 %v2090_v25, %v4650_v15  ;;  %v2091_v29 = vmul.f32 0.5, %v2083_v23  ;;  %v2171_v15 = vunpack.c.l.bf16 %v2170_v9 }
 0xc7d   : > { %v2100_v32 = vmul.f32 %v2092_v1, %v4652_v16  ;;  %v2093_v33 = vmul.f32 0.5, %v2085_v2  ;;  %v2450_v16 = vld [vmem:[#allocation27] sm:$0x1] }
 0xc7e   : > { %v2099_v35 = vmul.f32 %v2091_v29, %v4658_v21  ;;  %v2102_v36 = vpack.c.bf16 %v2098_v28, %v2094_v27  ;;  %v2175_v11 = vrot.slane %v2171_v15, %v4507_v47  ;;  %v2451_v42 = vunpack.c.l.bf16 %v2450_v16 }
 0xc7f   : > { %v2101_v38 = vmul.f32 %v2093_v33, %v4660_v22  ;;  %v2104_v39 = vpack.c.bf16 %v2100_v32, %v2096_v30 }
 0xc80   : > { %v2103_v40 = vpack.c.bf16 %v2099_v35, %v2095_v34  ;;  %v2455_v51 = vrot.slane %v2451_v42, %v4507_v47 }
 0xc81   : > { %v2105_v8 = vpack.c.bf16 %v2101_v38, %v2097_v37 }
 0xc82   : > { %2400 = vmatprep.mubr.bf16.mxu1 %v2103_v40 }
 0xc83   : > { %2441 = vmatprep.mubr.bf16.mxu0 %v2105_v8  ;;  %2401 = vmatmul.mubr.bf16.vlgmr.msra.gmra.mrb[32].mxu1 %v2102_v36 }
 0xc84   : > { %2442 = vmatmul.mubr.bf16.vlgmr.msra.gmra.mrb[20].mxu0 %v2104_v39 }
 0xd56   : > { %v2901_v41 = vpop.f32.mrb[32].mxu1 }
 0xd57   : > { %v2923_v21 = vpop.f32.mrb[20].mxu0  ;;  %v2902_v43 = vpop.f32.mrb[33].mxu1 }
 0xd58   : > { %v2903_v45 = vadd.f32 %v2902_v43, %v2901_v41  ;;  %v2924_v44 = vpop.f32.mrb[21].mxu0  ;;  %v2904_v22 = vpop.f32.mrb[34].mxu1 }
 0xd59   : > { %v2925_v46 = vadd.f32 %v2924_v44, %v2923_v21  ;;  %v2926_v48 = vpop.f32.mrb[22].mxu0  ;;  %v2905_v49 = vpop.f32.mrb[35].mxu1 }
 0xd5a   : > { %v2403_v50 = vadd.f32 %v2903_v45, %v2175_v11  ;;  %v2906_v52 = vadd.f32 %v2905_v49, %v2904_v22  ;;  %v2927_v53 = vpop.f32.mrb[23].mxu0 }
 0xd5b   : > { %v2928_v54 = vadd.f32 %v2927_v53, %v2926_v48 }
 0xd5c   : > { %v2444_v55 = vadd.f32 %v2925_v46, %v2403_v50  ;;  %v2406_v56 = vadd.f32 %v2906_v52, %v2175_v11 }
 0xd5e   : > { %v2456_v57 = vmul.f32 %v2455_v51, %v2444_v55  ;;  %v2447_v58 = vadd.f32 %v2928_v54, %v2406_v56 }
 0xd60   : > { %v2457_v59 = vmul.f32 %v2455_v51, %v2447_v58  ;;  %v2458_v60 = vadd.f32 %v2456_v57, %v4607_v18 }
 0xd62   : > { %v2459_v61 = vadd.f32 %v2457_v59, %v4611_v31 }
 0xd64   : > { %v2849_v47 = vpack.c.bf16 %v2459_v61, %v2458_v60 }
 0xd66   : > { %2850 = vst [vmem:[%s695_s20] sm:$0xff] %v2849_v47  }
 0xd67   : > { %3828 = shalt.err (!%p3825_p9)
}
 0xd68   : > { %s3829_s17 = scalar_lea.hbm %s4704_s28, 128  ;;  %s3833_s30 = scalar_lea.hbm %s4825_s24, 256 }
 0xd69   : > { %p3830_p4 = scmp.ne.s32.totalorder %s4704_s28, %s3829_s17  ;;  %p3834_p3 = scmp.lt.u32.totalorder %s4704_s28, %s4825_s24 }
 0xd6a   : > { %p3835_p2 = scmp.lt.u32.totalorder %s3833_s30, %s3829_s17  ;;  %p3837_p10 = scmp.lt.u32.totalorder %s3829_s17, %s4704_s28 }
 0xd6b   : > { %p3831_p13 = pnand %p3830_p4, %p4826_p11 }
 0xd6c   : > { %p3836_p8 = por %p3835_p2, %p3834_p3 }
 0xd6d   : > { %p3832_p1 = pneg %p3831_p13 }
 0xd6e   : > { %p3838_p12 = por %p3837_p10, %p3836_p8 }
 0xd70   : > { %p3839_p0 = pnand %p3838_p12, %p3832_p1 }
 0xd72   : > { %3842 = shalt.err (!%p3839_p0)
}
 0xd73   : > { %s3939_s15 = smov 4   ;;  %s4827_s1 = smov 64  }
 0xd74   : > { %3075 = dma.vmem_to_hbm [thread:$0]  (%p4826_p11), %s4706_s26, 128, %s4704_s28, %s2471_s18, %s4827_s1, %s4827_s1, %s3939_s15  }
 0xd75 PF: > { %s4828_s20 = sld [smem:[#allocation38_spill]]  ;;  %p4829_p5 = scmp.ne.s32.totalorder %s4803_s19, 0 }
 0xd76   : > { %p4830_p7 = scmp.ge.s32.totalorder %s3909_s21, 2 }
 0xd78   : > { %p3125_p6 = pnand %p4830_p7, %p4829_p5 }
 0xd7b   : > { %s2499_s0 = sand.u32 1, %s4828_s20  }
 0xd7c   : > { %s2500_s17 = scalar_lea.sflag [#allocation6], %s2499_s0 }
 0xd7d   : > { %3892 = dma.done.wait (!%p3125_p6), %s2500_s17, 128  }
 0xd7e   : > { %3894 = vsyncadd (!%p3125_p6), %s2500_s17, 4294967168  ;;  %s4831_s18 = sld [smem:[#allocation39_spill]]  ;;  %s4832_s19 = sld [smem:[#allocation40_spill]] }
 0xd7f   : > { %p35_p9 = scmp.ge.s32.totalorder %s4355_s22, 4   ;;  %s4833_s20 = smov %s4366_s27 }
 0xd80   : > { %s4834_s21 = smov %s4355_s22 }
 0xd81   :  { %37 = sbr.rel (!%p35_p9) target bundleno = 17 (0x11), region = 181 }
 0xd88   :  { %2505 = vsyncpa [#allocation5], 1 }
 0xd89   :  { %2507 = vsyncpa [#allocation5 + $0x1], 1 }
 0xd8a   :  { %2508 = vsyncpa [#allocation8], 1 }
 0xd8b   :  { %2509 = vsyncpa [#allocation11], 1 }
 0xd8c   :  { %2510 = vsyncpa [#allocation14], 1 }
 0xd8d   :  { %2511 = vsyncpa [#allocation17], 1 }
 0xd8e   :  { %2512 = vsyncpa [#allocation20], 1 }
 0xd8f   :  { %2513 = vsyncpa [#allocation23], 1 }
 0xd90   :  { %2514 = vsyncpa [#allocation26], 1 }
 0xd91   :  { %2515 = vsyncpa [#allocation6], 1 }
 0xd92   :  { %2517 = vsyncpa [#allocation6 + $0x1], 1 }

</bundles_post_ra>
